<compile_context>
chip_gen: v5e
topology: v5e:2x2
jax: 0.10.0
libtpu: 0.0.40
codegen_flags: <defaults>
</compile_context>

<pallas_src>
import math

import jax
import jax.numpy as jnp
from jax import lax
from jax.experimental import pallas as pl
from jax.experimental.pallas import tpu as pltpu


def _round_up(x, m):
    return (x + m - 1) // m * m


def _pick_row_block(H, W, target_rows=128):
    """Even divisor of H giving >= target flattened rows per layer-1 block."""
    if H % 2:
        return H                         # odd height: single block, pool crops
    for r in range(2, H + 1, 2):
        if H % r == 0 and r * W >= target_rows:
            return r
    return H


# ----------------------------- fused Pallas kernel ---------------------------

def _fused_cnn_kernel(H, W, C0, row_block):
    C1, C2, C3 = 32, 64, 64
    H1, W1 = H // 2, W // 2
    H2, W2 = H1 // 2, W1 // 2

    def border_masks(S, Wc, Cin):
        # Hoisted once per layer (item 4): (S, Cin) bool masks for dx = +-1.
        ww = lax.broadcasted_iota(jnp.int32, (S, 1), 0) % Wc
        m_left = jnp.broadcast_to(ww >= 1, (S, Cin))
        m_right = jnp.broadcast_to(ww <= Wc - 2, (S, Cin))
        return m_left, m_right

    def zero_pads(xp_ref, S, P, Cin):
        # Item 2: zero ONLY the pad bands; the interior is fully overwritten.
        zeros = jnp.zeros((P, Cin), xp_ref.dtype)
        xp_ref[pl.ds(0, P), :] = zeros
        xp_ref[pl.ds(P + S, P), :] = zeros

    def tap_builder(xp_ref, base, S, Wc, m_left, m_right):
        # Shifted (S, Cin) f32 taps; horizontal borders masked in f32 (v5e note),
        # vertical borders land in the zero pad rows.
        def make(t):
            dy, dx = t // 3 - 1, t % 3 - 1
            sh = xp_ref[pl.ds(base + dy * Wc + dx, S), :]
            if dx == -1:
                sh = jnp.where(m_left, sh, 0.0)
            elif dx == 1:
                sh = jnp.where(m_right, sh, 0.0)
            return sh
        return make

    def maxpool2(y, Hc, Wc, Cout):
        # MaxPool2d(2) with PyTorch floor semantics (crop odd trailing row/col).
        Ho, Wo = Hc // 2, Wc // 2
        y3 = y.reshape(Hc, Wc, Cout)
        if (Ho * 2, Wo * 2) != (Hc, Wc):
            y3 = y3[:Ho * 2, :Wo * 2, :]
        p = jnp.max(y3.reshape(Ho, 2, Wo, 2, Cout), axis=(1, 3))
        return p.reshape(Ho * Wo, Cout), Ho, Wo

    def conv_block(x2d, xp_ref, col_ref, w_ref, b_ref, Hc, Wc, Cin, Cout, pool):
        """3x3 'same' conv + bias + ReLU (+ 2x2 maxpool), 128-lane slab im2col."""
        S = Hc * Wc
        P = Wc + 1
        zero_pads(xp_ref, S, P, Cin)
        if x2d is not None:
            xp_ref[pl.ds(P, S), :] = x2d      # interior staging (f32)
        m_left, m_right = border_masks(S, Wc, Cin)
        make = tap_builder(xp_ref, P, S, Wc, m_left, m_right)

        # Item 1: build the patch in exact 128-lane slabs -> full-lane stores.
        group = 128 // Cin                    # taps per 128-lane slab (4 or 2)
        n_slab = col_ref.shape[1] // 128
        for g in range(n_slab):
            chunk = [make(t) for t in range(g * group, min((g + 1) * group, 9))]
            width = len(chunk) * Cin
            if width < 128:                   # zero tail keeps the store full-lane
                chunk.append(jnp.zeros((S, 128 - width), jnp.float32))
            col_ref[:, pl.ds(g * 128, 128)] = (
                jnp.concatenate(chunk, axis=-1).astype(jnp.bfloat16))

        # Single MXU matmul per layer (K padded to a multiple of 128, f32 acc).
        y = jnp.dot(col_ref[...], w_ref[...], preferred_element_type=jnp.float32)
        y = jnp.maximum(y + b_ref[...], 0.0)
        if not pool:
            return y, Hc, Wc
        return maxpool2(y, Hc, Wc, Cout)

    def layer1(x_ref, xp1_ref, xp2_ref, w_ref, b_ref):
        """Row-tiled conv1 + pool (item 6); pooled rows go straight into xp2."""
        S = H * W
        P = W + 1
        P2 = W1 + 1
        zero_pads(xp1_ref, S, P, C0)
        xp1_ref[pl.ds(P, S), :] = x_ref[...]

        n_blk = max(H // row_block, 1)
        S_blk = row_block * W
        rows_out = (row_block // 2) * W1
        m_left, m_right = border_masks(S_blk, W, C0)
        w = w_ref[...]                        # (36, 32) bf16, hoisted
        bias = b_ref[...]                     # (1, 32) f32, hoisted

        def body(b, carry):
            base = P + b * S_blk
            make = tap_builder(xp1_ref, base, S_blk, W, m_left, m_right)
            # Item 1 (conv1): register-value patch, no col scratch, one bf16 dot.
            patch = jnp.concatenate([make(t) for t in range(9)],
                                    axis=-1).astype(jnp.bfloat16)
            y = jnp.dot(patch, w, preferred_element_type=jnp.float32)
            y = jnp.maximum(y + bias, 0.0)
            p, _, _ = maxpool2(y, row_block, W, C1)
            xp2_ref[pl.ds(P2 + b * rows_out, rows_out), :] = p
            return carry

        lax.fori_loop(0, n_blk, body, 0)

    def kernel(x_ref, w1_ref, b1_ref, w2_ref, b2_ref, w3_ref, b3_ref,
               wf_ref, bf_ref, o_ref,
               xp1_ref, xp2_ref, col2_ref, xp3_ref, col3_ref):
        # Dropout2d = identity (eval / inference mode).
        layer1(x_ref, xp1_ref, xp2_ref, w1_ref, b1_ref)
        # Layer 2 interior was already staged by layer1 -> x2d=None.
        y, h2, w2 = conv_block(None, xp2_ref, col2_ref, w2_ref, b2_ref,
                               H1, W1, C1, C2, True)
        y, h3, w3 = conv_block(y, xp3_ref, col3_ref, w3_ref, b3_ref,
                               h2, w2, C2, C3, False)

        # Item 8: AdaptiveAvgPool2d((1,1)) as a sublane sum; FC as one bf16 pass.
        S3 = h3 * w3
        feat = jnp.sum(y, axis=0, keepdims=True) * (1.0 / S3)       # (1, 64) f32
        o_ref[...] = (jnp.dot(feat.astype(jnp.bfloat16), wf_ref[...],
                              preferred_element_type=jnp.float32)
                      + bf_ref[...]).astype(o_ref.dtype)            # (1, 128)

    return kernel


# --------------------------------- wrapper -----------------------------------

_VMEM = pl.BlockSpec(memory_space=pltpu.MemorySpace.VMEM)


@jax.jit
def multi_channel_cnn(x_chw, params):
    """x_chw: [num_channels, H, W] (PyTorch CHW). Returns [dim_out]."""
    (w1, b1), (w2, b2), (w3, b3), (wf, bf) = params
    C0, H, W = x_chw.shape
    D = wf.shape[-1]
    H1, W1 = H // 2, W // 2
    H2, W2 = H1 // 2, W1 // 2
    K2 = _round_up(9 * 32, 128)              # 384
    K3 = _round_up(9 * 64, 128)              # 640
    D_pad = _round_up(D, 128)                # lane-dense FC output (last item)
    row_block = _pick_row_block(H, W)

    # CHW -> (H*W, C) channel-last 2D layout for the kernel.
    x2d = jnp.transpose(x_chw, (1, 2, 0)).reshape(H * W, C0).astype(jnp.float32)

    def prep_w(w, kpad=None):
        # (3,3,Cin,Cout) HWIO -> (9*Cin, Cout) bf16, zero-row padded to kpad.
        kh, kw_, ci, co = w.shape
        w2 = w.reshape(kh * kw_ * ci, co)
        if kpad is not None and kpad > w2.shape[0]:
            w2 = jnp.concatenate(
                [w2, jnp.zeros((kpad - w2.shape[0], co), w2.dtype)], axis=0)
        return w2.astype(jnp.bfloat16)

    def prep_b(b, width=None):
        b2 = b.reshape(1, -1).astype(jnp.float32)
        if width is not None and width > b2.shape[1]:
            b2 = jnp.concatenate(
                [b2, jnp.zeros((1, width - b2.shape[1]), jnp.float32)], axis=1)
        return b2

    wf_p = wf
    if D_pad > D:
        wf_p = jnp.concatenate(
            [wf, jnp.zeros((wf.shape[0], D_pad - D), wf.dtype)], axis=1)
    wf_p = wf_p.astype(jnp.bfloat16)
    bf_p = prep_b(bf, D_pad)

    out = pl.pallas_call(
        _fused_cnn_kernel(H, W, C0, row_block),
        out_shape=jax.ShapeDtypeStruct((1, D_pad), jnp.float32),
        in_specs=[_VMEM] * 9,
        out_specs=_VMEM,
        scratch_shapes=[
            # zero-padded activation row buffers (f32) + K-padded im2col (bf16)
            pltpu.VMEM((H * W + 2 * (W + 1), C0), jnp.float32),
            pltpu.VMEM((H1 * W1 + 2 * (W1 + 1), 32), jnp.float32),
            pltpu.VMEM((H1 * W1, K2), jnp.bfloat16),
            pltpu.VMEM((H2 * W2 + 2 * (W2 + 1), 64), jnp.float32),
            pltpu.VMEM((H2 * W2, K3), jnp.bfloat16),
        ],
    )(x2d,
      prep_w(w1),
      prep_b(b1),
      prep_w(w2, K2),
      prep_b(b2),
      prep_w(w3, K3),
      prep_b(b3),
      wf_p, bf_p)
    # NOTE: PyTorch uses nn.Identity when dim_out == 64; here the Linear is
    # always applied (the test uses dim_out != 64).
    return out[0, :D]                                               # [dim_out]


# ------------------------- deterministic parameters --------------------------

def init_params(key, num_channels, dim_out):
    def conv_init(k, cin, cout):
        kw, kb = jax.random.split(k)
        fan_in = cin * 9
        bound = 1.0 / math.sqrt(fan_in)
        w = jax.random.uniform(kw, (3, 3, cin, cout), jnp.float32, -bound, bound)
        b = jax.random.uniform(kb, (cout,), jnp.float32, -bound, bound)
        return w, b

    def fc_init(k, cin, cout):
        kw, kb = jax.random.split(k)
        bound = 1.0 / math.sqrt(cin)
        w = jax.random.uniform(kw, (cin, cout), jnp.float32, -bound, bound)
        b = jax.random.uniform(kb, (cout,), jnp.float32, -bound, bound)
        return w, b

    k1, k2, k3, k4 = jax.random.split(key, 4)
    return (
        conv_init(k1, num_channels, 32),
        conv_init(k2, 32, 64),
        conv_init(k3, 64, 64),
        fc_init(k4, 64, dim_out),
    )


# ----------------------------- pure-JAX reference ----------------------------

def reference_forward(x_chw, params):
    (w1, b1), (w2, b2), (w3, b3), (wf, bf) = params
    x = jnp.transpose(x_chw, (1, 2, 0))[None]                       # NHWC, N=1
    dn = ("NHWC", "HWIO", "NHWC")
    for i, (w, b) in enumerate(((w1, b1), (w2, b2), (w3, b3))):
        x = lax.conv_general_dilated(x, w, (1, 1), "SAME", dimension_numbers=dn)
        x = jax.nn.relu(x + b)
        if i < 2:
            x = lax.reduce_window(x, -jnp.inf, lax.max,
                                  (1, 2, 2, 1), (1, 2, 2, 1), "VALID")
    feat = jnp.mean(x, axis=(1, 2))                                 # (1, 64)
    return (feat @ wf + bf)[0]                                      # [dim_out]


# ---------------------------------- main --------------------------------------

if __name__ == "__main__":
    NUM_CHANNELS = 4      # 2 * len(cfg.topo.filtration), len(filtration) = 2
    H = W = 16            # small spatial size (module doc says 50x50)
    DIM_OUT = 16

    key = jax.random.PRNGKey(0)
    kx, kp = jax.random.split(key)
    x = jax.random.normal(kx, (NUM_CHANNELS, H, W), jnp.float32)
    params = init_params(kp, NUM_CHANNELS, DIM_OUT)

    out = jax.block_until_ready(multi_channel_cnn(x, params))
    assert out.shape == (DIM_OUT,), out.shape

    ref = jax.block_until_ready(reference_forward(x, params))
    assert jnp.allclose(out, ref, rtol=2e-2, atol=2e-2), (out, ref)

    print("KERNEL_OK")
</pallas_src>

<mosaic_0001>
module attributes {stable_mosaic.version = 11 : i64} {
  func.func @kernel(%arg0: memref<256x4xf32, #tpu.memory_space<vmem>>, %arg1: memref<36x32xbf16, #tpu.memory_space<vmem>>, %arg2: memref<1x32xf32, #tpu.memory_space<vmem>>, %arg3: memref<384x64xbf16, #tpu.memory_space<vmem>>, %arg4: memref<1x64xf32, #tpu.memory_space<vmem>>, %arg5: memref<640x64xbf16, #tpu.memory_space<vmem>>, %arg6: memref<1x64xf32, #tpu.memory_space<vmem>>, %arg7: memref<64x128xbf16, #tpu.memory_space<vmem>>, %arg8: memref<1x128xf32, #tpu.memory_space<vmem>>, %arg9: memref<1x128xf32, #tpu.memory_space<vmem>>, %arg10: memref<290x4xf32, #tpu.memory_space<vmem>>, %arg11: memref<82x32xf32, #tpu.memory_space<vmem>>, %arg12: memref<64x384xbf16, #tpu.memory_space<vmem>>, %arg13: memref<26x64xf32, #tpu.memory_space<vmem>>, %arg14: memref<16x640xbf16, #tpu.memory_space<vmem>>) attributes {dimension_semantics = [], scalar_prefetch = 0 : i64, scratch_operands = 5 : i64, tpu.core_type = #tpu.core_type<tc>} {
    %cst = arith.constant 0.000000e+00 : f32
    %0 = vector.broadcast %cst : f32 to vector<17x4xf32>
    %c0 = arith.constant 0 : index
    %c0_0 = arith.constant 0 : index
    %1 = vector.load %arg10[%c0, %c0_0] : memref<290x4xf32, #tpu.memory_space<vmem>>, vector<17x4xf32>
    tpu.vector_store %arg10[%c0, %c0_0], %0 {strides = array<i32>} : memref<290x4xf32, #tpu.memory_space<vmem>>, vector<17x4xf32>,
    %c273 = arith.constant 273 : index
    %c0_1 = arith.constant 0 : index
    %2 = vector.load %arg10[%c273, %c0_1] : memref<290x4xf32, #tpu.memory_space<vmem>>, vector<17x4xf32>
    tpu.vector_store %arg10[%c273, %c0_1], %0 {strides = array<i32>} : memref<290x4xf32, #tpu.memory_space<vmem>>, vector<17x4xf32>,
    %c0_2 = arith.constant 0 : index
    %c0_3 = arith.constant 0 : index
    %3 = vector.load %arg0[%c0_2, %c0_3] : memref<256x4xf32, #tpu.memory_space<vmem>>, vector<256x4xf32>
    %c17 = arith.constant 17 : index
    %c0_4 = arith.constant 0 : index
    %4 = vector.load %arg10[%c17, %c0_4] : memref<290x4xf32, #tpu.memory_space<vmem>>, vector<256x4xf32>
    tpu.vector_store %arg10[%c17, %c0_4], %3 {strides = array<i32>} : memref<290x4xf32, #tpu.memory_space<vmem>>, vector<256x4xf32>,
    %5 = tpu.iota {dimensions = array<i32: 0>} : vector<128x1xi32>
    %c16_i32 = arith.constant 16 : i32
    %c0_i32 = arith.constant 0 : i32
    %6 = arith.cmpi eq, %c16_i32, %c0_i32 : i32
    %c1_i32 = arith.constant 1 : i32
    %7 = arith.select %6, %c1_i32, %c16_i32 : i32
    %8 = vector.broadcast %7 : i32 to vector<128x1xi32>
    %9 = arith.remsi %5, %8 : vector<128x1xi32>
    %c0_i32_5 = arith.constant 0 : i32
    %10 = vector.broadcast %c0_i32_5 : i32 to vector<128x1xi32>
    %11 = arith.cmpi ne, %9, %10 : vector<128x1xi32>
    %c0_i32_6 = arith.constant 0 : i32
    %12 = vector.broadcast %c0_i32_6 : i32 to vector<128x1xi32>
    %13 = arith.cmpi slt, %9, %12 : vector<128x1xi32>
    %c0_i32_7 = arith.constant 0 : i32
    %14 = arith.cmpi slt, %7, %c0_i32_7 : i32
    %15 = vector.broadcast %14 : i1 to vector<128x1xi1>
    %16 = vector.broadcast %15 : vector<128x1xi1> to vector<128x1xi1>
    %17 = arith.xori %13, %16 : vector<128x1xi1>
    %18 = arith.andi %17, %11 : vector<128x1xi1>
    %19 = vector.broadcast %7 : i32 to vector<128x1xi32>
    %20 = arith.addi %9, %19 : vector<128x1xi32>
    %21 = arith.select %18, %20, %9 : vector<128x1xi1>, vector<128x1xi32>
    %c1_i32_8 = arith.constant 1 : i32
    %22 = vector.broadcast %c1_i32_8 : i32 to vector<128x1xi32>
    %23 = arith.cmpi sge, %21, %22 : vector<128x1xi32>
    %24 = vector.shape_cast %23 : vector<128x1xi1> to vector<128x1xi1>
    %25 = vector.broadcast %24 : vector<128x1xi1> to vector<128x4xi1>
    %c14_i32 = arith.constant 14 : i32
    %26 = vector.broadcast %c14_i32 : i32 to vector<128x1xi32>
    %27 = arith.cmpi sle, %21, %26 : vector<128x1xi32>
    %28 = vector.shape_cast %27 : vector<128x1xi1> to vector<128x1xi1>
    %29 = vector.broadcast %28 : vector<128x1xi1> to vector<128x4xi1>
    %c0_9 = arith.constant 0 : index
    %c0_10 = arith.constant 0 : index
    %30 = vector.load %arg1[%c0_9, %c0_10] : memref<36x32xbf16, #tpu.memory_space<vmem>>, vector<36x32xbf16>
    %c0_11 = arith.constant 0 : index
    %c0_12 = arith.constant 0 : index
    %31 = vector.load %arg2[%c0_11, %c0_12] : memref<1x32xf32, #tpu.memory_space<vmem>>, vector<1x32xf32>
    %c0_i32_13 = arith.constant 0 : i32
    %c2_i32 = arith.constant 2 : i32
    %32 = arith.addi %c0_i32_13, %c2_i32 : i32
    %c1_i32_14 = arith.constant 1 : i32
    scf.for %arg15 = %c0_i32_13 to %32 step %c1_i32_14  : i32 {
      %c128_i32 = arith.constant 128 : i32
      %188 = arith.muli %arg15, %c128_i32 : i32
      %c17_i32 = arith.constant 17 : i32
      %189 = arith.addi %c17_i32, %188 : i32
      %c-16_i32 = arith.constant -16 : i32
      %190 = arith.addi %189, %c-16_i32 : i32
      %c-1_i32 = arith.constant -1 : i32
      %191 = arith.addi %190, %c-1_i32 : i32
      %192 = arith.index_cast %191 : i32 to index
      %c0_117 = arith.constant 0 : index
      %193 = vector.load %arg10[%192, %c0_117] : memref<290x4xf32, #tpu.memory_space<vmem>>, vector<128x4xf32>
      %cst_118 = arith.constant 0.000000e+00 : f32
      %194 = vector.broadcast %cst_118 : f32 to vector<128x4xf32>
      %195 = arith.select %25, %193, %194 : vector<128x4xi1>, vector<128x4xf32>
      %c-16_i32_119 = arith.constant -16 : i32
      %196 = arith.addi %189, %c-16_i32_119 : i32
      %c0_i32_120 = arith.constant 0 : i32
      %197 = arith.addi %196, %c0_i32_120 : i32
      %198 = arith.index_cast %197 : i32 to index
      %c0_121 = arith.constant 0 : index
      %199 = vector.load %arg10[%198, %c0_121] : memref<290x4xf32, #tpu.memory_space<vmem>>, vector<128x4xf32>
      %c-16_i32_122 = arith.constant -16 : i32
      %200 = arith.addi %189, %c-16_i32_122 : i32
      %c1_i32_123 = arith.constant 1 : i32
      %201 = arith.addi %200, %c1_i32_123 : i32
      %202 = arith.index_cast %201 : i32 to index
      %c0_124 = arith.constant 0 : index
      %203 = vector.load %arg10[%202, %c0_124] : memref<290x4xf32, #tpu.memory_space<vmem>>, vector<128x4xf32>
      %cst_125 = arith.constant 0.000000e+00 : f32
      %204 = vector.broadcast %cst_125 : f32 to vector<128x4xf32>
      %205 = arith.select %29, %203, %204 : vector<128x4xi1>, vector<128x4xf32>
      %c0_i32_126 = arith.constant 0 : i32
      %206 = arith.addi %189, %c0_i32_126 : i32
      %c-1_i32_127 = arith.constant -1 : i32
      %207 = arith.addi %206, %c-1_i32_127 : i32
      %208 = arith.index_cast %207 : i32 to index
      %c0_128 = arith.constant 0 : index
      %209 = vector.load %arg10[%208, %c0_128] : memref<290x4xf32, #tpu.memory_space<vmem>>, vector<128x4xf32>
      %cst_129 = arith.constant 0.000000e+00 : f32
      %210 = vector.broadcast %cst_129 : f32 to vector<128x4xf32>
      %211 = arith.select %25, %209, %210 : vector<128x4xi1>, vector<128x4xf32>
      %c0_i32_130 = arith.constant 0 : i32
      %212 = arith.addi %189, %c0_i32_130 : i32
      %c0_i32_131 = arith.constant 0 : i32
      %213 = arith.addi %212, %c0_i32_131 : i32
      %214 = arith.index_cast %213 : i32 to index
      %c0_132 = arith.constant 0 : index
      %215 = vector.load %arg10[%214, %c0_132] : memref<290x4xf32, #tpu.memory_space<vmem>>, vector<128x4xf32>
      %c0_i32_133 = arith.constant 0 : i32
      %216 = arith.addi %189, %c0_i32_133 : i32
      %c1_i32_134 = arith.constant 1 : i32
      %217 = arith.addi %216, %c1_i32_134 : i32
      %218 = arith.index_cast %217 : i32 to index
      %c0_135 = arith.constant 0 : index
      %219 = vector.load %arg10[%218, %c0_135] : memref<290x4xf32, #tpu.memory_space<vmem>>, vector<128x4xf32>
      %cst_136 = arith.constant 0.000000e+00 : f32
      %220 = vector.broadcast %cst_136 : f32 to vector<128x4xf32>
      %221 = arith.select %29, %219, %220 : vector<128x4xi1>, vector<128x4xf32>
      %c16_i32_137 = arith.constant 16 : i32
      %222 = arith.addi %189, %c16_i32_137 : i32
      %c-1_i32_138 = arith.constant -1 : i32
      %223 = arith.addi %222, %c-1_i32_138 : i32
      %224 = arith.index_cast %223 : i32 to index
      %c0_139 = arith.constant 0 : index
      %225 = vector.load %arg10[%224, %c0_139] : memref<290x4xf32, #tpu.memory_space<vmem>>, vector<128x4xf32>
      %cst_140 = arith.constant 0.000000e+00 : f32
      %226 = vector.broadcast %cst_140 : f32 to vector<128x4xf32>
      %227 = arith.select %25, %225, %226 : vector<128x4xi1>, vector<128x4xf32>
      %c16_i32_141 = arith.constant 16 : i32
      %228 = arith.addi %189, %c16_i32_141 : i32
      %c0_i32_142 = arith.constant 0 : i32
      %229 = arith.addi %228, %c0_i32_142 : i32
      %230 = arith.index_cast %229 : i32 to index
      %c0_143 = arith.constant 0 : index
      %231 = vector.load %arg10[%230, %c0_143] : memref<290x4xf32, #tpu.memory_space<vmem>>, vector<128x4xf32>
      %c16_i32_144 = arith.constant 16 : i32
      %232 = arith.addi %189, %c16_i32_144 : i32
      %c1_i32_145 = arith.constant 1 : i32
      %233 = arith.addi %232, %c1_i32_145 : i32
      %234 = arith.index_cast %233 : i32 to index
      %c0_146 = arith.constant 0 : index
      %235 = vector.load %arg10[%234, %c0_146] : memref<290x4xf32, #tpu.memory_space<vmem>>, vector<128x4xf32>
      %cst_147 = arith.constant 0.000000e+00 : f32
      %236 = vector.broadcast %cst_147 : f32 to vector<128x4xf32>
      %237 = arith.select %29, %235, %236 : vector<128x4xi1>, vector<128x4xf32>
      %238 = tpu.concatenate %195, %199, %205, %211, %215, %221, %227, %231, %237 in 1 : vector<128x4xf32>, vector<128x4xf32>, vector<128x4xf32>, vector<128x4xf32>, vector<128x4xf32>, vector<128x4xf32>, vector<128x4xf32>, vector<128x4xf32>, vector<128x4xf32> -> vector<128x36xf32>
      %239 = arith.truncf %238 : vector<128x36xf32> to vector<128x36xbf16>
      %cst_148 = arith.constant dense<0.000000e+00> : vector<128x32xf32>
      %240 = tpu.matmul %239, %30, %cst_148 {dimension_numbers = #tpu.dot_dimension_numbers<[1], [0], [0], [1], [0, 0, 1, 1], [], []>} : vector<128x36xbf16>, vector<36x32xbf16>, vector<128x32xf32> -> vector<128x32xf32>
      %241 = vector.broadcast %31 : vector<1x32xf32> to vector<128x32xf32>
      %242 = arith.addf %240, %241 : vector<128x32xf32>
      %cst_149 = arith.constant 0.000000e+00 : f32
      %243 = vector.broadcast %cst_149 : f32 to vector<128x32xf32>
      %244 = arith.maximumf %242, %243 : vector<128x32xf32>
      %245 = vector.shape_cast %244 : vector<128x32xf32> to vector<8x16x32xf32>
      %246 = vector.shape_cast %245 : vector<8x16x32xf32> to vector<4x2x8x2x32xf32>
      %cst_150 = arith.constant dense<0xFF800000> : vector<4x8x32xf32>
      %247 = vector.multi_reduction <maximumf>, %246, %cst_150 [1, 3] : vector<4x2x8x2x32xf32> to vector<4x8x32xf32>
      %248 = vector.shape_cast %247 : vector<4x8x32xf32> to vector<32x32xf32>
      %c32_i32 = arith.constant 32 : i32
      %249 = arith.muli %arg15, %c32_i32 : i32
      %c9_i32 = arith.constant 9 : i32
      %250 = arith.addi %c9_i32, %249 : i32
      %251 = arith.index_cast %250 : i32 to index
      %c0_151 = arith.constant 0 : index
      %252 = vector.load %arg11[%251, %c0_151] : memref<82x32xf32, #tpu.memory_space<vmem>>, vector<32x32xf32>
      tpu.vector_store %arg11[%251, %c0_151], %248 {strides = array<i32>} : memref<82x32xf32, #tpu.memory_space<vmem>>, vector<32x32xf32>,
    }
    %c2_i32_15 = arith.constant 2 : i32
    %cst_16 = arith.constant 0.000000e+00 : f32
    %33 = vector.broadcast %cst_16 : f32 to vector<9x32xf32>
    %c0_17 = arith.constant 0 : index
    %c0_18 = arith.constant 0 : index
    %34 = vector.load %arg11[%c0_17, %c0_18] : memref<82x32xf32, #tpu.memory_space<vmem>>, vector<9x32xf32>
    tpu.vector_store %arg11[%c0_17, %c0_18], %33 {strides = array<i32>} : memref<82x32xf32, #tpu.memory_space<vmem>>, vector<9x32xf32>,
    %c73 = arith.constant 73 : index
    %c0_19 = arith.constant 0 : index
    %35 = vector.load %arg11[%c73, %c0_19] : memref<82x32xf32, #tpu.memory_space<vmem>>, vector<9x32xf32>
    tpu.vector_store %arg11[%c73, %c0_19], %33 {strides = array<i32>} : memref<82x32xf32, #tpu.memory_space<vmem>>, vector<9x32xf32>,
    %36 = tpu.iota {dimensions = array<i32: 0>} : vector<64x1xi32>
    %c8_i32 = arith.constant 8 : i32
    %c0_i32_20 = arith.constant 0 : i32
    %37 = arith.cmpi eq, %c8_i32, %c0_i32_20 : i32
    %c1_i32_21 = arith.constant 1 : i32
    %38 = arith.select %37, %c1_i32_21, %c8_i32 : i32
    %39 = vector.broadcast %38 : i32 to vector<64x1xi32>
    %40 = arith.remsi %36, %39 : vector<64x1xi32>
    %c0_i32_22 = arith.constant 0 : i32
    %41 = vector.broadcast %c0_i32_22 : i32 to vector<64x1xi32>
    %42 = arith.cmpi ne, %40, %41 : vector<64x1xi32>
    %c0_i32_23 = arith.constant 0 : i32
    %43 = vector.broadcast %c0_i32_23 : i32 to vector<64x1xi32>
    %44 = arith.cmpi slt, %40, %43 : vector<64x1xi32>
    %c0_i32_24 = arith.constant 0 : i32
    %45 = arith.cmpi slt, %38, %c0_i32_24 : i32
    %46 = vector.broadcast %45 : i1 to vector<64x1xi1>
    %47 = vector.broadcast %46 : vector<64x1xi1> to vector<64x1xi1>
    %48 = arith.xori %44, %47 : vector<64x1xi1>
    %49 = arith.andi %48, %42 : vector<64x1xi1>
    %50 = vector.broadcast %38 : i32 to vector<64x1xi32>
    %51 = arith.addi %40, %50 : vector<64x1xi32>
    %52 = arith.select %49, %51, %40 : vector<64x1xi1>, vector<64x1xi32>
    %c1_i32_25 = arith.constant 1 : i32
    %53 = vector.broadcast %c1_i32_25 : i32 to vector<64x1xi32>
    %54 = arith.cmpi sge, %52, %53 : vector<64x1xi32>
    %55 = vector.shape_cast %54 : vector<64x1xi1> to vector<64x1xi1>
    %56 = vector.broadcast %55 : vector<64x1xi1> to vector<64x32xi1>
    %c6_i32 = arith.constant 6 : i32
    %57 = vector.broadcast %c6_i32 : i32 to vector<64x1xi32>
    %58 = arith.cmpi sle, %52, %57 : vector<64x1xi32>
    %59 = vector.shape_cast %58 : vector<64x1xi1> to vector<64x1xi1>
    %60 = vector.broadcast %59 : vector<64x1xi1> to vector<64x32xi1>
    %c0_26 = arith.constant 0 : index
    %c0_27 = arith.constant 0 : index
    %61 = vector.load %arg11[%c0_26, %c0_27] : memref<82x32xf32, #tpu.memory_space<vmem>>, vector<64x32xf32>
    %cst_28 = arith.constant 0.000000e+00 : f32
    %62 = vector.broadcast %cst_28 : f32 to vector<64x32xf32>
    %63 = arith.select %56, %61, %62 : vector<64x32xi1>, vector<64x32xf32>
    %c1 = arith.constant 1 : index
    %c0_29 = arith.constant 0 : index
    %64 = vector.load %arg11[%c1, %c0_29] : memref<82x32xf32, #tpu.memory_space<vmem>>, vector<64x32xf32>
    %c2 = arith.constant 2 : index
    %c0_30 = arith.constant 0 : index
    %65 = vector.load %arg11[%c2, %c0_30] : memref<82x32xf32, #tpu.memory_space<vmem>>, vector<64x32xf32>
    %cst_31 = arith.constant 0.000000e+00 : f32
    %66 = vector.broadcast %cst_31 : f32 to vector<64x32xf32>
    %67 = arith.select %60, %65, %66 : vector<64x32xi1>, vector<64x32xf32>
    %c8 = arith.constant 8 : index
    %c0_32 = arith.constant 0 : index
    %68 = vector.load %arg11[%c8, %c0_32] : memref<82x32xf32, #tpu.memory_space<vmem>>, vector<64x32xf32>
    %cst_33 = arith.constant 0.000000e+00 : f32
    %69 = vector.broadcast %cst_33 : f32 to vector<64x32xf32>
    %70 = arith.select %56, %68, %69 : vector<64x32xi1>, vector<64x32xf32>
    %71 = tpu.concatenate %63, %64, %67, %70 in 1 : vector<64x32xf32>, vector<64x32xf32>, vector<64x32xf32>, vector<64x32xf32> -> vector<64x128xf32>
    %72 = arith.truncf %71 : vector<64x128xf32> to vector<64x128xbf16>
    %c0_34 = arith.constant 0 : index
    %c0_35 = arith.constant 0 : index
    %73 = vector.load %arg12[%c0_34, %c0_35] : memref<64x384xbf16, #tpu.memory_space<vmem>>, vector<64x128xbf16>
    tpu.vector_store %arg12[%c0_34, %c0_35], %72 {strides = array<i32>} : memref<64x384xbf16, #tpu.memory_space<vmem>>, vector<64x128xbf16>,
    %c9 = arith.constant 9 : index
    %c0_36 = arith.constant 0 : index
    %74 = vector.load %arg11[%c9, %c0_36] : memref<82x32xf32, #tpu.memory_space<vmem>>, vector<64x32xf32>
    %c10 = arith.constant 10 : index
    %c0_37 = arith.constant 0 : index
    %75 = vector.load %arg11[%c10, %c0_37] : memref<82x32xf32, #tpu.memory_space<vmem>>, vector<64x32xf32>
    %cst_38 = arith.constant 0.000000e+00 : f32
    %76 = vector.broadcast %cst_38 : f32 to vector<64x32xf32>
    %77 = arith.select %60, %75, %76 : vector<64x32xi1>, vector<64x32xf32>
    %c16 = arith.constant 16 : index
    %c0_39 = arith.constant 0 : index
    %78 = vector.load %arg11[%c16, %c0_39] : memref<82x32xf32, #tpu.memory_space<vmem>>, vector<64x32xf32>
    %cst_40 = arith.constant 0.000000e+00 : f32
    %79 = vector.broadcast %cst_40 : f32 to vector<64x32xf32>
    %80 = arith.select %56, %78, %79 : vector<64x32xi1>, vector<64x32xf32>
    %c17_41 = arith.constant 17 : index
    %c0_42 = arith.constant 0 : index
    %81 = vector.load %arg11[%c17_41, %c0_42] : memref<82x32xf32, #tpu.memory_space<vmem>>, vector<64x32xf32>
    %82 = tpu.concatenate %74, %77, %80, %81 in 1 : vector<64x32xf32>, vector<64x32xf32>, vector<64x32xf32>, vector<64x32xf32> -> vector<64x128xf32>
    %83 = arith.truncf %82 : vector<64x128xf32> to vector<64x128xbf16>
    %c0_43 = arith.constant 0 : index
    %c128 = arith.constant 128 : index
    %84 = vector.load %arg12[%c0_43, %c128] : memref<64x384xbf16, #tpu.memory_space<vmem>>, vector<64x128xbf16>
    tpu.vector_store %arg12[%c0_43, %c128], %83 {strides = array<i32>} : memref<64x384xbf16, #tpu.memory_space<vmem>>, vector<64x128xbf16>,
    %c18 = arith.constant 18 : index
    %c0_44 = arith.constant 0 : index
    %85 = vector.load %arg11[%c18, %c0_44] : memref<82x32xf32, #tpu.memory_space<vmem>>, vector<64x32xf32>
    %cst_45 = arith.constant 0.000000e+00 : f32
    %86 = vector.broadcast %cst_45 : f32 to vector<64x32xf32>
    %87 = arith.select %60, %85, %86 : vector<64x32xi1>, vector<64x32xf32>
    %cst_46 = arith.constant 0.000000e+00 : f32
    %88 = vector.broadcast %cst_46 : f32 to vector<64x96xf32>
    %89 = tpu.concatenate %87, %88 in 1 : vector<64x32xf32>, vector<64x96xf32> -> vector<64x128xf32>
    %90 = arith.truncf %89 : vector<64x128xf32> to vector<64x128xbf16>
    %c0_47 = arith.constant 0 : index
    %c256 = arith.constant 256 : index
    %91 = vector.load %arg12[%c0_47, %c256] : memref<64x384xbf16, #tpu.memory_space<vmem>>, vector<64x128xbf16>
    tpu.vector_store %arg12[%c0_47, %c256], %90 {strides = array<i32>} : memref<64x384xbf16, #tpu.memory_space<vmem>>, vector<64x128xbf16>,
    %c0_48 = arith.constant 0 : index
    %c0_49 = arith.constant 0 : index
    %92 = vector.load %arg12[%c0_48, %c0_49] : memref<64x384xbf16, #tpu.memory_space<vmem>>, vector<64x384xbf16>
    %c0_50 = arith.constant 0 : index
    %c0_51 = arith.constant 0 : index
    %93 = vector.load %arg3[%c0_50, %c0_51] : memref<384x64xbf16, #tpu.memory_space<vmem>>, vector<384x64xbf16>
    %cst_52 = arith.constant dense<0.000000e+00> : vector<64x64xf32>
    %94 = tpu.matmul %92, %93, %cst_52 {dimension_numbers = #tpu.dot_dimension_numbers<[1], [0], [0], [1], [0, 0, 1, 1], [], []>} : vector<64x384xbf16>, vector<384x64xbf16>, vector<64x64xf32> -> vector<64x64xf32>
    %c0_53 = arith.constant 0 : index
    %c0_54 = arith.constant 0 : index
    %95 = vector.load %arg4[%c0_53, %c0_54] : memref<1x64xf32, #tpu.memory_space<vmem>>, vector<1x64xf32>
    %96 = vector.broadcast %95 : vector<1x64xf32> to vector<64x64xf32>
    %97 = arith.addf %94, %96 : vector<64x64xf32>
    %cst_55 = arith.constant 0.000000e+00 : f32
    %98 = vector.broadcast %cst_55 : f32 to vector<64x64xf32>
    %99 = arith.maximumf %97, %98 : vector<64x64xf32>
    %100 = vector.shape_cast %99 : vector<64x64xf32> to vector<8x8x64xf32>
    %101 = vector.shape_cast %100 : vector<8x8x64xf32> to vector<4x2x4x2x64xf32>
    %cst_56 = arith.constant dense<0xFF800000> : vector<4x4x64xf32>
    %102 = vector.multi_reduction <maximumf>, %101, %cst_56 [1, 3] : vector<4x2x4x2x64xf32> to vector<4x4x64xf32>
    %103 = vector.shape_cast %102 : vector<4x4x64xf32> to vector<16x64xf32>
    %cst_57 = arith.constant 0.000000e+00 : f32
    %104 = vector.broadcast %cst_57 : f32 to vector<5x64xf32>
    %c0_58 = arith.constant 0 : index
    %c0_59 = arith.constant 0 : index
    %105 = vector.load %arg13[%c0_58, %c0_59] : memref<26x64xf32, #tpu.memory_space<vmem>>, vector<5x64xf32>
    tpu.vector_store %arg13[%c0_58, %c0_59], %104 {strides = array<i32>} : memref<26x64xf32, #tpu.memory_space<vmem>>, vector<5x64xf32>,
    %c21 = arith.constant 21 : index
    %c0_60 = arith.constant 0 : index
    %106 = vector.load %arg13[%c21, %c0_60] : memref<26x64xf32, #tpu.memory_space<vmem>>, vector<5x64xf32>
    tpu.vector_store %arg13[%c21, %c0_60], %104 {strides = array<i32>} : memref<26x64xf32, #tpu.memory_space<vmem>>, vector<5x64xf32>,
    %c5 = arith.constant 5 : index
    %c0_61 = arith.constant 0 : index
    %107 = vector.load %arg13[%c5, %c0_61] : memref<26x64xf32, #tpu.memory_space<vmem>>, vector<16x64xf32>
    tpu.vector_store %arg13[%c5, %c0_61], %103 {strides = array<i32>} : memref<26x64xf32, #tpu.memory_space<vmem>>, vector<16x64xf32>,
    %108 = tpu.iota {dimensions = array<i32: 0>} : vector<16x1xi32>
    %c4_i32 = arith.constant 4 : i32
    %c0_i32_62 = arith.constant 0 : i32
    %109 = arith.cmpi eq, %c4_i32, %c0_i32_62 : i32
    %c1_i32_63 = arith.constant 1 : i32
    %110 = arith.select %109, %c1_i32_63, %c4_i32 : i32
    %111 = vector.broadcast %110 : i32 to vector<16x1xi32>
    %112 = arith.remsi %108, %111 : vector<16x1xi32>
    %c0_i32_64 = arith.constant 0 : i32
    %113 = vector.broadcast %c0_i32_64 : i32 to vector<16x1xi32>
    %114 = arith.cmpi ne, %112, %113 : vector<16x1xi32>
    %c0_i32_65 = arith.constant 0 : i32
    %115 = vector.broadcast %c0_i32_65 : i32 to vector<16x1xi32>
    %116 = arith.cmpi slt, %112, %115 : vector<16x1xi32>
    %c0_i32_66 = arith.constant 0 : i32
    %117 = arith.cmpi slt, %110, %c0_i32_66 : i32
    %118 = vector.broadcast %117 : i1 to vector<16x1xi1>
    %119 = vector.broadcast %118 : vector<16x1xi1> to vector<16x1xi1>
    %120 = arith.xori %116, %119 : vector<16x1xi1>
    %121 = arith.andi %120, %114 : vector<16x1xi1>
    %122 = vector.broadcast %110 : i32 to vector<16x1xi32>
    %123 = arith.addi %112, %122 : vector<16x1xi32>
    %124 = arith.select %121, %123, %112 : vector<16x1xi1>, vector<16x1xi32>
    %c1_i32_67 = arith.constant 1 : i32
    %125 = vector.broadcast %c1_i32_67 : i32 to vector<16x1xi32>
    %126 = arith.cmpi sge, %124, %125 : vector<16x1xi32>
    %127 = vector.shape_cast %126 : vector<16x1xi1> to vector<16x1xi1>
    %128 = vector.broadcast %127 : vector<16x1xi1> to vector<16x64xi1>
    %c2_i32_68 = arith.constant 2 : i32
    %129 = vector.broadcast %c2_i32_68 : i32 to vector<16x1xi32>
    %130 = arith.cmpi sle, %124, %129 : vector<16x1xi32>
    %131 = vector.shape_cast %130 : vector<16x1xi1> to vector<16x1xi1>
    %132 = vector.broadcast %131 : vector<16x1xi1> to vector<16x64xi1>
    %c0_69 = arith.constant 0 : index
    %c0_70 = arith.constant 0 : index
    %133 = vector.load %arg13[%c0_69, %c0_70] : memref<26x64xf32, #tpu.memory_space<vmem>>, vector<16x64xf32>
    %cst_71 = arith.constant 0.000000e+00 : f32
    %134 = vector.broadcast %cst_71 : f32 to vector<16x64xf32>
    %135 = arith.select %128, %133, %134 : vector<16x64xi1>, vector<16x64xf32>
    %c1_72 = arith.constant 1 : index
    %c0_73 = arith.constant 0 : index
    %136 = vector.load %arg13[%c1_72, %c0_73] : memref<26x64xf32, #tpu.memory_space<vmem>>, vector<16x64xf32>
    %137 = tpu.concatenate %135, %136 in 1 : vector<16x64xf32>, vector<16x64xf32> -> vector<16x128xf32>
    %138 = arith.truncf %137 : vector<16x128xf32> to vector<16x128xbf16>
    %c0_74 = arith.constant 0 : index
    %c0_75 = arith.constant 0 : index
    %139 = vector.load %arg14[%c0_74, %c0_75] : memref<16x640xbf16, #tpu.memory_space<vmem>>, vector<16x128xbf16>
    tpu.vector_store %arg14[%c0_74, %c0_75], %138 {strides = array<i32>} : memref<16x640xbf16, #tpu.memory_space<vmem>>, vector<16x128xbf16>,
    %c2_76 = arith.constant 2 : index
    %c0_77 = arith.constant 0 : index
    %140 = vector.load %arg13[%c2_76, %c0_77] : memref<26x64xf32, #tpu.memory_space<vmem>>, vector<16x64xf32>
    %cst_78 = arith.constant 0.000000e+00 : f32
    %141 = vector.broadcast %cst_78 : f32 to vector<16x64xf32>
    %142 = arith.select %132, %140, %141 : vector<16x64xi1>, vector<16x64xf32>
    %c4 = arith.constant 4 : index
    %c0_79 = arith.constant 0 : index
    %143 = vector.load %arg13[%c4, %c0_79] : memref<26x64xf32, #tpu.memory_space<vmem>>, vector<16x64xf32>
    %cst_80 = arith.constant 0.000000e+00 : f32
    %144 = vector.broadcast %cst_80 : f32 to vector<16x64xf32>
    %145 = arith.select %128, %143, %144 : vector<16x64xi1>, vector<16x64xf32>
    %146 = tpu.concatenate %142, %145 in 1 : vector<16x64xf32>, vector<16x64xf32> -> vector<16x128xf32>
    %147 = arith.truncf %146 : vector<16x128xf32> to vector<16x128xbf16>
    %c0_81 = arith.constant 0 : index
    %c128_82 = arith.constant 128 : index
    %148 = vector.load %arg14[%c0_81, %c128_82] : memref<16x640xbf16, #tpu.memory_space<vmem>>, vector<16x128xbf16>
    tpu.vector_store %arg14[%c0_81, %c128_82], %147 {strides = array<i32>} : memref<16x640xbf16, #tpu.memory_space<vmem>>, vector<16x128xbf16>,
    %c5_83 = arith.constant 5 : index
    %c0_84 = arith.constant 0 : index
    %149 = vector.load %arg13[%c5_83, %c0_84] : memref<26x64xf32, #tpu.memory_space<vmem>>, vector<16x64xf32>
    %c6 = arith.constant 6 : index
    %c0_85 = arith.constant 0 : index
    %150 = vector.load %arg13[%c6, %c0_85] : memref<26x64xf32, #tpu.memory_space<vmem>>, vector<16x64xf32>
    %cst_86 = arith.constant 0.000000e+00 : f32
    %151 = vector.broadcast %cst_86 : f32 to vector<16x64xf32>
    %152 = arith.select %132, %150, %151 : vector<16x64xi1>, vector<16x64xf32>
    %153 = tpu.concatenate %149, %152 in 1 : vector<16x64xf32>, vector<16x64xf32> -> vector<16x128xf32>
    %154 = arith.truncf %153 : vector<16x128xf32> to vector<16x128xbf16>
    %c0_87 = arith.constant 0 : index
    %c256_88 = arith.constant 256 : index
    %155 = vector.load %arg14[%c0_87, %c256_88] : memref<16x640xbf16, #tpu.memory_space<vmem>>, vector<16x128xbf16>
    tpu.vector_store %arg14[%c0_87, %c256_88], %154 {strides = array<i32>} : memref<16x640xbf16, #tpu.memory_space<vmem>>, vector<16x128xbf16>,
    %c8_89 = arith.constant 8 : index
    %c0_90 = arith.constant 0 : index
    %156 = vector.load %arg13[%c8_89, %c0_90] : memref<26x64xf32, #tpu.memory_space<vmem>>, vector<16x64xf32>
    %cst_91 = arith.constant 0.000000e+00 : f32
    %157 = vector.broadcast %cst_91 : f32 to vector<16x64xf32>
    %158 = arith.select %128, %156, %157 : vector<16x64xi1>, vector<16x64xf32>
    %c9_92 = arith.constant 9 : index
    %c0_93 = arith.constant 0 : index
    %159 = vector.load %arg13[%c9_92, %c0_93] : memref<26x64xf32, #tpu.memory_space<vmem>>, vector<16x64xf32>
    %160 = tpu.concatenate %158, %159 in 1 : vector<16x64xf32>, vector<16x64xf32> -> vector<16x128xf32>
    %161 = arith.truncf %160 : vector<16x128xf32> to vector<16x128xbf16>
    %c0_94 = arith.constant 0 : index
    %c384 = arith.constant 384 : index
    %162 = vector.load %arg14[%c0_94, %c384] : memref<16x640xbf16, #tpu.memory_space<vmem>>, vector<16x128xbf16>
    tpu.vector_store %arg14[%c0_94, %c384], %161 {strides = array<i32>} : memref<16x640xbf16, #tpu.memory_space<vmem>>, vector<16x128xbf16>,
    %c10_95 = arith.constant 10 : index
    %c0_96 = arith.constant 0 : index
    %163 = vector.load %arg13[%c10_95, %c0_96] : memref<26x64xf32, #tpu.memory_space<vmem>>, vector<16x64xf32>
    %cst_97 = arith.constant 0.000000e+00 : f32
    %164 = vector.broadcast %cst_97 : f32 to vector<16x64xf32>
    %165 = arith.select %132, %163, %164 : vector<16x64xi1>, vector<16x64xf32>
    %cst_98 = arith.constant 0.000000e+00 : f32
    %166 = vector.broadcast %cst_98 : f32 to vector<16x64xf32>
    %167 = tpu.concatenate %165, %166 in 1 : vector<16x64xf32>, vector<16x64xf32> -> vector<16x128xf32>
    %168 = arith.truncf %167 : vector<16x128xf32> to vector<16x128xbf16>
    %c0_99 = arith.constant 0 : index
    %c512 = arith.constant 512 : index
    %169 = vector.load %arg14[%c0_99, %c512] : memref<16x640xbf16, #tpu.memory_space<vmem>>, vector<16x128xbf16>
    tpu.vector_store %arg14[%c0_99, %c512], %168 {strides = array<i32>} : memref<16x640xbf16, #tpu.memory_space<vmem>>, vector<16x128xbf16>,
    %c0_100 = arith.constant 0 : index
    %c0_101 = arith.constant 0 : index
    %170 = vector.load %arg14[%c0_100, %c0_101] : memref<16x640xbf16, #tpu.memory_space<vmem>>, vector<16x640xbf16>
    %c0_102 = arith.constant 0 : index
    %c0_103 = arith.constant 0 : index
    %171 = vector.load %arg5[%c0_102, %c0_103] : memref<640x64xbf16, #tpu.memory_space<vmem>>, vector<640x64xbf16>
    %cst_104 = arith.constant dense<0.000000e+00> : vector<16x64xf32>
    %172 = tpu.matmul %170, %171, %cst_104 {dimension_numbers = #tpu.dot_dimension_numbers<[1], [0], [0], [1], [0, 0, 1, 1], [], []>} : vector<16x640xbf16>, vector<640x64xbf16>, vector<16x64xf32> -> vector<16x64xf32>
    %c0_105 = arith.constant 0 : index
    %c0_106 = arith.constant 0 : index
    %173 = vector.load %arg6[%c0_105, %c0_106] : memref<1x64xf32, #tpu.memory_space<vmem>>, vector<1x64xf32>
    %174 = vector.broadcast %173 : vector<1x64xf32> to vector<16x64xf32>
    %175 = arith.addf %172, %174 : vector<16x64xf32>
    %cst_107 = arith.constant 0.000000e+00 : f32
    %176 = vector.broadcast %cst_107 : f32 to vector<16x64xf32>
    %177 = arith.maximumf %175, %176 : vector<16x64xf32>
    %cst_108 = arith.constant dense<0.000000e+00> : vector<64xf32>
    %178 = vector.multi_reduction <add>, %177, %cst_108 [0] : vector<16x64xf32> to vector<64xf32>
    %179 = vector.shape_cast %178 : vector<64xf32> to vector<1x64xf32>
    %cst_109 = arith.constant 6.250000e-02 : f32
    %180 = vector.broadcast %cst_109 : f32 to vector<1x64xf32>
    %181 = arith.mulf %179, %180 : vector<1x64xf32>
    %182 = arith.truncf %181 : vector<1x64xf32> to vector<1x64xbf16>
    %c0_110 = arith.constant 0 : index
    %c0_111 = arith.constant 0 : index
    %183 = vector.load %arg7[%c0_110, %c0_111] : memref<64x128xbf16, #tpu.memory_space<vmem>>, vector<64x128xbf16>
    %cst_112 = arith.constant dense<0.000000e+00> : vector<1x128xf32>
    %184 = tpu.matmul %182, %183, %cst_112 {dimension_numbers = #tpu.dot_dimension_numbers<[1], [0], [0], [1], [0, 0, 1, 1], [], []>} : vector<1x64xbf16>, vector<64x128xbf16>, vector<1x128xf32> -> vector<1x128xf32>
    %c0_113 = arith.constant 0 : index
    %c0_114 = arith.constant 0 : index
    %185 = vector.load %arg8[%c0_113, %c0_114] : memref<1x128xf32, #tpu.memory_space<vmem>>, vector<1x128xf32>
    %186 = arith.addf %184, %185 : vector<1x128xf32>
    %c0_115 = arith.constant 0 : index
    %c0_116 = arith.constant 0 : index
    %187 = vector.load %arg9[%c0_115, %c0_116] : memref<1x128xf32, #tpu.memory_space<vmem>>, vector<1x128xf32>
    tpu.vector_store %arg9[%c0_115, %c0_116], %186 {strides = array<i32>} : memref<1x128xf32, #tpu.memory_space<vmem>>, vector<1x128xf32>,
    return
  }
}

</mosaic_0001>

<bundles_post_ra>
// kernel: multi_channel_cnn.1
= control target key start
LH: loop header
LB: loop body
LE: loop exit
PB: predicated region body
PF: predicated region fallthrough
CT: control target
= control target key end

     0   :  { %vm6822_vm0 = vcmask 31744   ;;  %v105_v0 = vlaneseq  ;;  %v6807_v1 = vmov 0.0   ;;  %vm36_vm1 = vcmask 24576   ;;  %s5171_s16 = smov 0   ;;  %s6796_s1 = inlined_call_operand.vmem [shape: bf16[36,32], index: 1, kind: input, shape index: {}]   ;;  %s6797_s2 = inlined_call_operand.vmem [shape: f32[1,32], index: 2, kind: input, shape index: {}]   ;;  %s6798_s3 = inlined_call_operand.vmem [shape: bf16[384,64], index: 3, kind: input, shape index: {}]   ;;  %s6799_s4 = inlined_call_operand.vmem [shape: f32[1,64], index: 4, kind: input, shape index: {}]   ;;  %s6800_s5 = inlined_call_operand.vmem [shape: bf16[640,64], index: 5, kind: input, shape index: {}]   ;;  %s6801_s6 = inlined_call_operand.vmem [shape: f32[1,64], index: 6, kind: input, shape index: {}]   ;;  %s6802_s7 = inlined_call_operand.vmem [shape: bf16[64,128], index: 7, kind: input, shape index: {}]   ;;  %s6803_s8 = inlined_call_operand.vmem [shape: f32[1,128], index: 8, kind: input, shape index: {}]   ;;  %s6804_s9 = inlined_call_operand.vmem [shape: f32[1,128], index: 9, kind: output, shape index: {}]   ;;  %s6805_s0 = inlined_call_operand.vmem [shape: f32[256,4], index: 0, kind: input, shape index: {}]  }
   0x1   :  { %34 = vst.msk [vmem:[#allocation2] sm:$0xff] %vm6822_vm0, %v6807_v1  ;;  %v4903_v2 = vld [vmem:[%s6796_s1] sm:$0xf]  ;;  %v4908_v3 = vld [vmem:[%s6796_s1] sm:$0xf0]  ;;  %v42_v10 = vld [vmem:[%s6805_s0 + $0x8] sm:$0xff] }
   0x2   :  { %6839 = vst [vmem:[#allocation7_spill] sm:$0xff] %v4903_v2  ;;  %v4912_v4 = vshrl.u32 %v105_v0, 7  ;;  %v4917_v5 = vld [vmem:[%s6796_s1 + $0x8] sm:$0xf]  ;;  %v4922_v6 = vld [vmem:[%s6796_s1 + $0x8] sm:$0xf0] }
   0x3   :  { %6840 = vst [vmem:[#allocation8_spill] sm:$0xff] %v4908_v3  ;;  %v41_v7 = vld [vmem:[%s6805_s0] sm:$0xff]  ;;  %v4932_v8 = vld [vmem:[%s6796_s1 + $0x10] sm:$0x3]  ;;  %v44_v28 = vld [vmem:[%s6805_s0 + $0x18] sm:$0xff]  ;;  %v6853_v47 = vmov 0 }
   0x4   :  { %35 = vst.msk [vmem:[#allocation2 + $0x8] sm:$0xff] %vm6822_vm0, %v6807_v1  ;;  %v4937_v9 = vld [vmem:[%s6797_s2] sm:$0x1]  ;;  %v4945_v11 = vadd.s32 8, %v4912_v4  ;;  %v4948_v12 = vadd.s32 16, %v4912_v4  ;;  %v4951_v13 = vadd.s32 24, %v4912_v4 }
   0x5   :  { %6841 = vst [vmem:[#allocation9_spill] sm:$0xff] %v4912_v4  ;;  %v4954_v14 = vadd.s32 32, %v4912_v4  ;;  %v43_v15 = vld [vmem:[%s6805_s0 + $0x10] sm:$0xff]  ;;  %v4960_v16 = vadd.s32 40, %v4912_v4  ;;  %v4963_v17 = vadd.s32 48, %v4912_v4  ;;  %v4966_v18 = vadd.s32 56, %v4912_v4 }
   0x6   :  { %6842 = vst [vmem:[#allocation10_spill] sm:$0xff] %v4917_v5  ;;  %v114_v19 = vadd.s32 64, %v4912_v4  ;;  %v115_v20 = vadd.s32 72, %v4912_v4  ;;  %v116_v21 = vadd.s32 80, %v4912_v4  ;;  %v117_v22 = vadd.s32 88, %v4912_v4  ;;  %v45_v33 = vld [vmem:[%s6805_s0 + $0x20] sm:$0xff] }
   0x7   :  { %6843 = vst [vmem:[#allocation11_spill] sm:$0xff] %v4922_v6  ;;  %v118_v23 = vadd.s32 96, %v4912_v4  ;;  %v119_v24 = vadd.s32 104, %v4912_v4  ;;  %v120_v25 = vadd.s32 112, %v4912_v4  ;;  %v121_v26 = vadd.s32 120, %v4912_v4  ;;  %v46_v38 = vld [vmem:[%s6805_s0 + $0x28] sm:$0xff] }
   0x8   :  { %38 = vst.msk [vmem:[#allocation2 + $0x111] sm:$0xff] %vm6822_vm0, %v6807_v1  ;;  %v126_v27 = vand.u32 15, %v4912_v4  ;;  %v133_v29 = vand.u32 15, %v4945_v11  ;;  %v140_v30 = vand.u32 15, %v4948_v12  ;;  %v147_v31 = vand.u32 15, %v4951_v13  ;;  %v47_v43 = vld [vmem:[%s6805_s0 + $0x30] sm:$0xff] }
   0x9   :  { %6844 = vst [vmem:[#allocation12_spill] sm:$0xff] %v4932_v8  ;;  %v154_v32 = vand.u32 15, %v4954_v14  ;;  %v161_v34 = vand.u32 15, %v4960_v16  ;;  %v168_v35 = vand.u32 15, %v4963_v17  ;;  %v175_v36 = vand.u32 15, %v4966_v18  ;;  %v48_v48 = vld [vmem:[%s6805_s0 + $0x38] sm:$0xff] }
   0xa   :  { %6845 = vst [vmem:[#allocation13_spill] sm:$0xff] %v4937_v9  ;;  %v182_v37 = vand.u32 15, %v114_v19  ;;  %v189_v39 = vand.u32 15, %v115_v20  ;;  %v196_v40 = vand.u32 15, %v116_v21  ;;  %v203_v41 = vand.u32 15, %v117_v22  ;;  %v49_v53 = vld [vmem:[%s6805_s0 + $0x40] sm:$0xff] }
   0xb   :  { %39 = vst.msk [vmem:[#allocation2 + $0x119] sm:$0xff] %vm6822_vm0, %v6807_v1  ;;  %v210_v42 = vand.u32 15, %v118_v23  ;;  %v217_v44 = vand.u32 15, %v119_v24  ;;  %v224_v45 = vand.u32 15, %v120_v25  ;;  %v231_v46 = vand.u32 15, %v121_v26  ;;  %v50_v58 = vld [vmem:[%s6805_s0 + $0x48] sm:$0xff] }
   0xc   :  { %6846 = vst [vmem:[#allocation14_spill] sm:$0xff] %v4945_v11  ;;  %vm5004_vm2 = vcmp.ge.s32.totalorder %v126_v27, 1  ;;  %vm5012_vm3 = vcmp.ge.s32.totalorder %v140_v30, 1  ;;  %vm5016_vm4 = vcmp.ge.s32.totalorder %v154_v32, 1  ;;  %v6858_v50 = vmov 0  ;;  %v51_v63 = vld [vmem:[%s6805_s0 + $0x50] sm:$0xff] }
   0xd   :  { %6847 = vst [vmem:[#allocation15_spill] sm:$0xff] %v4948_v12  ;;  %v6854_v47 = vsel %vm5004_vm2, 4294967295, %v6853_v47  ;;  %v6859_v50 = vsel %vm5016_vm4, 4294967295, %v6858_v50  ;;  %vm5020_vm5 = vcmp.ge.s32.totalorder %v168_v35, 1  ;;  %vm5024_vm6 = vcmp.ge.s32.totalorder %v182_v37, 1  ;;  %v53_v19 = vld [vmem:[%s6805_s0 + $0x60] sm:$0xff] }
   0xe   :  { %6848 = vst [vmem:[#allocation16_spill] sm:$0xff] %v4951_v13  ;;  %v6862_v52 = vmov 0  ;;  %vm5032_vm7 = vcmp.ge.s32.totalorder %v196_v40, 1  ;;  %v6864_v54 = vmov 0  ;;  %vm5036_vm8 = vcmp.ge.s32.totalorder %v210_v42, 1  ;;  %v54_v20 = vld [vmem:[%s6805_s0 + $0x68] sm:$0xff] }
   0xf   :  { %6849 = vst [vmem:[#allocation17_spill] sm:$0xff] %v4954_v14  ;;  %v6863_v52 = vsel %vm5024_vm6, 4294967295, %v6862_v52  ;;  %v6865_v54 = vsel %vm5032_vm7, 4294967295, %v6864_v54  ;;  %vm5040_vm9 = vcmp.ge.s32.totalorder %v224_v45, 1  ;;  %vm5044_vm10 = vcmp.le.s32.totalorder %v133_v29, 14  ;;  %v55_v21 = vld [vmem:[%s6805_s0 + $0x70] sm:$0xff] }
  0x10   :  { %6850 = vst [vmem:[#allocation18_spill] sm:$0xff] %v4960_v16  ;;  %v6870_v57 = vmov 0  ;;  %vm5052_vm11 = vcmp.le.s32.totalorder %v147_v31, 14  ;;  %vm5056_vm12 = vcmp.le.s32.totalorder %v161_v34, 14  ;;  %v6874_v60 = vmov 0  ;;  %v56_v22 = vld [vmem:[%s6805_s0 + $0x78] sm:$0xff] }
  0x11   :  { %6851 = vst [vmem:[#allocation19_spill] sm:$0xff] %v4963_v17  ;;  %v6871_v57 = vsel %vm5044_vm10, 4294967295, %v6870_v57  ;;  %v6875_v60 = vsel %vm5056_vm12, 4294967295, %v6874_v60  ;;  %vm5060_vm13 = vcmp.le.s32.totalorder %v175_v36, 14  ;;  %v6876_v61 = vmov 0  ;;  %v57_v23 = vld [vmem:[%s6805_s0 + $0x80] sm:$0xff] }
  0x12   :  { %6852 = vst [vmem:[#allocation20_spill] sm:$0xff] %v4966_v18  ;;  %v6877_v61 = vsel %vm5060_vm13, 4294967295, %v6876_v61  ;;  %vm5064_vm14 = vcmp.le.s32.totalorder %v189_v39, 14  ;;  %v6879_v62 = vmov 0  ;;  %vm5072_vm15 = vcmp.le.s32.totalorder %v203_v41, 14  ;;  %v58_v24 = vld [vmem:[%s6805_s0 + $0x88] sm:$0xff] }
  0x13   :  { %37 = vst.msk [vmem:[#allocation2 + $0x10] sm:$0x1] %vm36_vm1, %v6807_v1  ;;  %v6880_v62 = vsel %vm5064_vm14, 4294967295, %v6879_v62  ;;  %v6881_v0 = vmov 0  ;;  %vm5080_vm7 = vcmp.le.s32.totalorder %v231_v46, 14  ;;  %v59_v25 = vld [vmem:[%s6805_s0 + $0x90] sm:$0xff] }
  0x14   :  { %40 = vst.msk [vmem:[#allocation2 + $0x121] sm:$0x1] %vm36_vm1, %v6807_v1  ;;  %v6882_v0 = vsel %vm5072_vm15, 4294967295, %v6881_v0  ;;  %vm5076_vm1 = vcmp.le.s32.totalorder %v217_v44, 14  ;;  %v60_v26 = vld [vmem:[%s6805_s0 + $0x98] sm:$0xff]  ;;  %v61_v27 = vld [vmem:[%s6805_s0 + $0xa0] sm:$0xff] }
  0x15   :  { %73 = vst.msk [vmem:[#allocation2 + $0x11] sm:$0xff] %vm6822_vm0, %v41_v7  ;;  %v6884_v7 = vmov 0  ;;  %v63_v29 = vld [vmem:[%s6805_s0 + $0xb0] sm:$0xff]  ;;  %v64_v30 = vld [vmem:[%s6805_s0 + $0xb8] sm:$0xff]  ;;  %v65_v31 = vld [vmem:[%s6805_s0 + $0xc0] sm:$0xff] }
  0x16   :  { %74 = vst.msk [vmem:[#allocation2 + $0x19] sm:$0xff] %vm6822_vm0, %v42_v10  ;;  %v6885_v7 = vsel %vm5076_vm1, 4294967295, %v6884_v7  ;;  %v6887_v10 = vmov 0  ;;  %v66_v32 = vld [vmem:[%s6805_s0 + $0xc8] sm:$0xff]  ;;  %v68_v34 = vld [vmem:[%s6805_s0 + $0xd8] sm:$0xff]  ;;  %v69_v35 = vld [vmem:[%s6805_s0 + $0xe0] sm:$0xff] }
  0x17   :  { %75 = vst.msk [vmem:[#allocation2 + $0x21] sm:$0xff] %vm6822_vm0, %v43_v15  ;;  %v6888_v10 = vsel %vm5080_vm7, 4294967295, %v6887_v10  ;;  %v52_v15 = vld [vmem:[%s6805_s0 + $0x58] sm:$0xff]  ;;  %v70_v36 = vld [vmem:[%s6805_s0 + $0xe8] sm:$0xff]  ;;  %v71_v37 = vld [vmem:[%s6805_s0 + $0xf0] sm:$0xff] }
  0x18   :  { %76 = vst.msk [vmem:[#allocation2 + $0x29] sm:$0xff] %vm6822_vm0, %v44_v28  ;;  %v62_v28 = vld [vmem:[%s6805_s0 + $0xa8] sm:$0xff] }
  0x19   :  { %6855 = vst [vmem:[#allocation21_spill] sm:$0xff] %v6854_v47 }
  0x1a   :  { %77 = vst.msk [vmem:[#allocation2 + $0x31] sm:$0xff] %vm6822_vm0, %v45_v33  ;;  %v67_v33 = vld [vmem:[%s6805_s0 + $0xd0] sm:$0xff] }
  0x1b   :  { %78 = vst.msk [vmem:[#allocation2 + $0x39] sm:$0xff] %vm6822_vm0, %v46_v38  ;;  %v72_v38 = vld [vmem:[%s6805_s0 + $0xf8] sm:$0xff] }
  0x1c   :  { %79 = vst.msk [vmem:[#allocation2 + $0x41] sm:$0xff] %vm6822_vm0, %v47_v43 }
  0x1d   :  { %6878 = vst [vmem:[#allocation22_spill] sm:$0xff] %v6877_v61 }
  0x1e   :  { %80 = vst.msk [vmem:[#allocation2 + $0x49] sm:$0xff] %vm6822_vm0, %v48_v48 }
  0x1f   :  { %6883 = vst [vmem:[#allocation23_spill] sm:$0xff] %v6882_v0 }
  0x20   :  { %6886 = vst [vmem:[#allocation24_spill] sm:$0xff] %v6885_v7 }
  0x21   :  { %6889 = vst [vmem:[#allocation25_spill] sm:$0xff] %v6888_v10 }
  0x22   :  { %81 = vst.msk [vmem:[#allocation2 + $0x51] sm:$0xff] %vm6822_vm0, %v49_v53 }
  0x23   :  { %82 = vst.msk [vmem:[#allocation2 + $0x59] sm:$0xff] %vm6822_vm0, %v50_v58 }
  0x24   :  { %83 = vst.msk [vmem:[#allocation2 + $0x61] sm:$0xff] %vm6822_vm0, %v51_v63 }
  0x25   :  { %84 = vst.msk [vmem:[#allocation2 + $0x69] sm:$0xff] %vm6822_vm0, %v52_v15 }
  0x26   :  { %85 = vst.msk [vmem:[#allocation2 + $0x71] sm:$0xff] %vm6822_vm0, %v53_v19 }
  0x27   :  { %86 = vst.msk [vmem:[#allocation2 + $0x79] sm:$0xff] %vm6822_vm0, %v54_v20 }
  0x28   :  { %87 = vst.msk [vmem:[#allocation2 + $0x81] sm:$0xff] %vm6822_vm0, %v55_v21 }
  0x29   :  { %88 = vst.msk [vmem:[#allocation2 + $0x89] sm:$0xff] %vm6822_vm0, %v56_v22 }
  0x2a   :  { %89 = vst.msk [vmem:[#allocation2 + $0x91] sm:$0xff] %vm6822_vm0, %v57_v23 }
  0x2b   :  { %90 = vst.msk [vmem:[#allocation2 + $0x99] sm:$0xff] %vm6822_vm0, %v58_v24 }
  0x2c   :  { %91 = vst.msk [vmem:[#allocation2 + $0xa1] sm:$0xff] %vm6822_vm0, %v59_v25 }
  0x2d   :  { %92 = vst.msk [vmem:[#allocation2 + $0xa9] sm:$0xff] %vm6822_vm0, %v60_v26 }
  0x2e   :  { %93 = vst.msk [vmem:[#allocation2 + $0xb1] sm:$0xff] %vm6822_vm0, %v61_v27 }
  0x2f   :  { %94 = vst.msk [vmem:[#allocation2 + $0xb9] sm:$0xff] %vm6822_vm0, %v62_v28 }
  0x30   :  { %95 = vst.msk [vmem:[#allocation2 + $0xc1] sm:$0xff] %vm6822_vm0, %v63_v29 }
  0x31   :  { %96 = vst.msk [vmem:[#allocation2 + $0xc9] sm:$0xff] %vm6822_vm0, %v64_v30 }
  0x32   :  { %97 = vst.msk [vmem:[#allocation2 + $0xd1] sm:$0xff] %vm6822_vm0, %v65_v31 }
  0x33   :  { %98 = vst.msk [vmem:[#allocation2 + $0xd9] sm:$0xff] %vm6822_vm0, %v66_v32 }
  0x34   :  { %99 = vst.msk [vmem:[#allocation2 + $0xe1] sm:$0xff] %vm6822_vm0, %v67_v33 }
  0x35   :  { %100 = vst.msk [vmem:[#allocation2 + $0xe9] sm:$0xff] %vm6822_vm0, %v68_v34 }
  0x36   :  { %101 = vst.msk [vmem:[#allocation2 + $0xf1] sm:$0xff] %vm6822_vm0, %v69_v35 }
  0x37   :  { %102 = vst.msk [vmem:[#allocation2 + $0xf9] sm:$0xff] %vm6822_vm0, %v70_v36 }
  0x38   :  { %103 = vst.msk [vmem:[#allocation2 + $0x101] sm:$0xff] %vm6822_vm0, %v71_v37 }
  0x39   :  { %104 = vst.msk [vmem:[#allocation2 + $0x109] sm:$0xff] %vm6822_vm0, %v72_v38 }
  0x3a LB: > { %v6890_v47 = vld [vmem:[#allocation21_spill] sm:$0xff]  ;;  %v6892_v0 = vld [vmem:[#allocation23_spill] sm:$0xff]  ;;  %v6893_v7 = vld [vmem:[#allocation24_spill] sm:$0xff]  ;;  %s3751_s17 = sshll.u32 %s4834_s16, 7  ;;  %s4837_s0 = smov 4   ;;  %vm6896_vm10 = vnez %v6871_v57  ;;  %vm6898_vm12 = vnez %v6875_v60  ;;  %vm6901_vm14 = vnez %v6880_v62  ;;  %vm6905_vm6 = vnez %v6863_v52  ;;  %s4834_s16 = sphi %s5171_s16, %s421_s16  }
  0x3b   : > { %v6891_v10 = vld [vmem:[#allocation25_spill] sm:$0xff]  ;;  %s5177_s18 = scalar_lea.vmem [#allocation2], %s3751_s17  ;;  %s4838_s19 = smov 8   ;;  %vm6899_vm1 = vnez %v6893_v7  ;;  %vm6900_vm15 = vnez %v6892_v0  ;;  %vm6902_vm2 = vnez %v6890_v47  ;;  %vm6906_vm4 = vnez %v6859_v50 }
  0x3c   : > { %vm6903_vm7 = vnez %v6891_v10  ;;  %s4839_s20 = smov 12   ;;  %vm6907_vm0 = vnez %v6865_v54  ;;  %s4840_s21 = smov 16  }
  0x3d   : > { %s4841_s22 = smov 20   ;;  %s4842_s23 = smov 24  }
  0x3e   : > { %s4843_s24 = smov 32   ;;  %s4844_s1 = smov 28  }
  0x3f   : > { %s3904_s2 = sshll.u32 %s4834_s16, 5  ;;  %s421_s16 = sadd.s32 1, %s4834_s16  }
  0x40   : > { %v3761_v39 = vld [vmem:[%s5177_s18 + $0x41] sm:$0xff]  ;;  %v3762_v40 = vld [vmem:[%s5177_s18 + $0x49] sm:$0xff]  ;;  %v5192_v53 = vld [vmem:[%s5177_s18 + $0x51] sm:$0xff]  ;;  %s6001_s25 = scalar_lea.vmem [#allocation3], %s3904_s2  ;;  %p418_p0 = scmp.ge.s32.totalorder %s421_s16, 2  }
  0x41   : > { %v3757_v41 = vld [vmem:[%s5177_s18 + $0x21] sm:$0xff]  ;;  %v5182_v42 = vpack.i.bf16 %v3762_v40, %v3761_v39  ;;  %v3758_v43 = vld [vmem:[%s5177_s18 + $0x29] sm:$0xff]  ;;  %v5198_v58 = vld [vmem:[%s5177_s18 + $0x59] sm:$0xff]  ;;  %s4845_s26 = smov (%p418_p0), 64   ;;  %s4846_s27 = smov (%p418_p0), 32  }
  0x42   : > { %v3753_v44 = vld [vmem:[%s5177_s18 + $0x1] sm:$0xff]  ;;  %v3754_v45 = vld [vmem:[%s5177_s18 + $0x9] sm:$0xff]  ;;  %v5187_v46 = vpack.i.bf16 %v3758_v43, %v3757_v41  ;;  %v5201_v63 = vld [vmem:[%s5177_s18 + $0x31] sm:$0xff]  ;;  %v5210_v21 = vpack.i.bf16 %v5198_v58, %v5192_v53  ;;  %s4847_s28 = smov (%p418_p0), 96  }
  0x43   : > { %v4366_v48 = vpack.i.bf16 %v3754_v45, %v3753_v44  ;;  %4387 = vrot.lane.b32.xlu2 %v5182_v42, %s4837_s0  ;;  %v5204_v15 = vld [vmem:[%s5177_s18 + $0x39] sm:$0xff]  ;;  %v3755_v19 = vld [vmem:[%s5177_s18 + $0x11] sm:$0xff]  ;;  %v3770_v25 = vld [vmem:[%s5177_s18 + $0x2] sm:$0xff] }
  0x44   : > { %4377 = vrot.lane.b32.xlu1 %v5187_v46, %s4837_s0  ;;  %v3756_v20 = vld [vmem:[%s5177_s18 + $0x19] sm:$0xff]  ;;  %6894 = vst [vmem:[#allocation26_spill] sm:$0xff] %v5210_v21  ;;  %v5214_v22 = vpack.i.bf16 %v5204_v15, %v5201_v63  ;;  %v3771_v24 = vld [vmem:[%s5177_s18 + $0xa] sm:$0xff]  ;;  %v3765_v29 = vld [vmem:[%s5177_s18 + $0x61] sm:$0xff] }
  0x45   : > { %4367 = vrot.lane.b32.xlu0 %v4366_v48, %s4837_s0  ;;  %v5216_v23 = vpack.i.bf16 %v3756_v20, %v3755_v19  ;;  %v494_v26 = vsel %vm6896_vm10, %v3771_v24, 0.0  ;;  %v5229_v27 = vld [vmem:[%s5177_s18 + $0x71] sm:$0xff]  ;;  %v5232_v28 = vld [vmem:[%s5177_s18 + $0x79] sm:$0xff]  ;;  %v3766_v30 = vld [vmem:[%s5177_s18 + $0x69] sm:$0xff] }
  0x46   : > { %6895 = vst [vmem:[#allocation27_spill] sm:$0xff] %v5214_v22  ;;  %v4406_v31 = vpack.i.bf16 %v494_v26, %v3770_v25  ;;  %v5238_v32 = vpack.i.bf16 %v5232_v28, %v5229_v27  ;;  %v5240_v33 = vpack.i.bf16 %v3766_v30, %v3765_v29  ;;  %v5243_v34 = vld [vmem:[%s5177_s18 + $0x3a] sm:$0xff]  ;;  %v5246_v35 = vld [vmem:[%s5177_s18 + $0x2a] sm:$0xff]  ;;  %v5257_v37 = vld [vmem:[%s5177_s18 + $0x32] sm:$0xff] }
  0x47   : > { %v5249_v36 = vld [vmem:[%s5177_s18 + $0x1a] sm:$0xff]  ;;  %v500_v38 = vsel %vm5060_vm13, %v5243_v34, 0.0  ;;  %v5263_v39 = vld [vmem:[%s5177_s18 + $0x22] sm:$0xff]  ;;  %v498_v40 = vsel %vm6898_vm12, %v5246_v35, 0.0  ;;  %v5269_v41 = vld [vmem:[%s5177_s18 + $0x12] sm:$0xff] }
  0x48   : > { %v496_v43 = vsel %vm5052_vm11, %v5249_v36, 0.0  ;;  %v4421_v44 = vpack.i.bf16 %v500_v38, %v5257_v37  ;;  %v4416_v45 = vpack.i.bf16 %v498_v40, %v5263_v39  ;;  %v5278_v19 = vld [vmem:[%s5177_s18 + $0x6a] sm:$0xff]  ;;  %v5281_v20 = vld [vmem:[%s5177_s18 + $0x5a] sm:$0xff]  ;;  %v5290_v25 = vld [vmem:[%s5177_s18 + $0x62] sm:$0xff] }
  0x49   : > { %v4411_v48 = vpack.i.bf16 %v496_v43, %v5269_v41  ;;  %v5284_v24 = vld [vmem:[%s5177_s18 + $0x4a] sm:$0xff]  ;;  %v506_v26 = vsel %vm6899_vm1, %v5278_v19, 0.0  ;;  %v5296_v29 = vld [vmem:[%s5177_s18 + $0x52] sm:$0xff]  ;;  %v504_v30 = vsel %vm6900_vm15, %v5281_v20, 0.0  ;;  %v5317_v1 = vld [vmem:[%s5177_s18 + $0x7a] sm:$0xff] }
  0x4a   : > { %v502_v38 = vsel %vm6901_vm14, %v5284_v24, 0.0  ;;  %v4436_v40 = vpack.i.bf16 %v506_v26, %v5290_v25  ;;  %v4431_v43 = vpack.i.bf16 %v504_v30, %v5296_v29  ;;  %v5323_v26 = vld [vmem:[%s5177_s18 + $0x28] sm:$0xff]  ;;  %v5335_v17 = vld [vmem:[%s5177_s18 + $0x72] sm:$0xff]  ;;  %v5347_v13 = vld [vmem:[%s5177_s18 + $0x40] sm:$0xff] }
  0x4b   : > { %4392 = vrot.lane.b32.xlu2 %v5210_v21, %s4837_s0  ;;  %v5344_v14 = vld [vmem:[%s5177_s18 + $0x50] sm:$0xff]  ;;  %v533_v4 = vsel %vm5020_vm5, %v5347_v13, 0.0  ;;  %v5366_v11 = vld [vmem:[%s5177_s18 + $0x38] sm:$0xff]  ;;  %v3801_v3 = vld [vmem:[%s5177_s18 + $0x80] sm:$0xff] }
  0x4c   : > { %4382 = vrot.lane.b32.xlu1 %v5214_v22, %s4837_s0  ;;  %v5350_v12 = vld [vmem:[%s5177_s18 + $0x30] sm:$0xff]  ;;  %v5379_v6 = vld [vmem:[%s5177_s18 + $0x60] sm:$0xff]  ;;  %v3802_v5 = vld [vmem:[%s5177_s18 + $0x88] sm:$0xff]  ;;  %v541_v8 = vsel %vm5040_vm9, %v3801_v3, 0.0 }
  0x4d   : > { %4372 = vrot.lane.b32.xlu0 %v5216_v23, %s4837_s0  ;;  %v5376_v2 = vld [vmem:[%s5177_s18 + $0x70] sm:$0xff]  ;;  %v5385_v22 = vld [vmem:[%s5177_s18 + $0x78] sm:$0xff]  ;;  %v4481_v21 = vpack.i.bf16 %v3802_v5, %v541_v8  ;;  %v587_v8 = vsel %vm6901_vm14, %v5281_v20, 0.0 }
  0x53   : > { %4407 = vrot.lane.b32.xlu2 %v4406_v31, %s4838_s19  ;;  %v5302_v31 = vld [vmem:[%s5177_s18 + $0x42] sm:$0xff] }
  0x54   : > { %4402 = vrot.lane.b32.xlu1 %v5238_v32, %s4837_s0 }
  0x55   : > { %4397 = vrot.lane.b32.xlu0 %v5240_v33, %s4837_s0 }
  0x5b   : > { %4422 = vrot.lane.b32.xlu2 %v4421_v44, %s4838_s19  ;;  %v4426_v44 = vpack.i.bf16 %v502_v38, %v5302_v31  ;;  %v5329_v38 = vld [vmem:[%s5177_s18 + $0x18] sm:$0xff] }
  0x5c   : > { %4417 = vrot.lane.b32.xlu1 %v4416_v45, %s4838_s19  ;;  %v5311_v45 = vld [vmem:[%s5177_s18 + $0x20] sm:$0xff] }
  0x5d   : > { %4412 = vrot.lane.b32.xlu0 %v4411_v48, %s4838_s19  ;;  %v5314_v48 = vld [vmem:[%s5177_s18 + $0x10] sm:$0xff]  ;;  %v529_v30 = vsel %vm5012_vm3, %v5311_v45, 0.0 }
  0x5e   : > { %v527_v18 = vsel %vm6902_vm2, %v5314_v48, 0.0 }
  0x63   : > { %4437 = vrot.lane.b32.xlu2 %v4436_v40, %s4838_s19  ;;  %v508_v40 = vsel %vm6903_vm7, %v5317_v1, 0.0 }
  0x64   : > { %4432 = vrot.lane.b32.xlu1 %v4431_v43, %s4838_s19  ;;  %v4451_v43 = vpack.i.bf16 %v5323_v26, %v529_v30  ;;  %v4441_v16 = vpack.i.bf16 %v508_v40, %v5335_v17  ;;  %v5354_v30 = vld [vmem:[%s5177_s18 + $0x58] sm:$0xff]  ;;  %v5360_v40 = vld [vmem:[%s5177_s18 + $0x48] sm:$0xff] }
  0x65   : > { %4427 = vrot.lane.b32.xlu0 %v4426_v44, %s4838_s19  ;;  %v4446_v44 = vpack.i.bf16 %v5329_v38, %v527_v18  ;;  %6904 = vst [vmem:[#allocation28_spill] sm:$0xff] %v5354_v30  ;;  %v535_v18 = vsel %vm6905_vm6, %v5344_v14, 0.0 }
  0x6b   : > { %4452 = vrot.lane.b32.xlu2 %v4451_v43, %s4839_s20  ;;  %v4466_v43 = vpack.i.bf16 %v5354_v30, %v535_v18  ;;  %v5391_v18 = vld [vmem:[%s5177_s18 + $0x68] sm:$0xff]  ;;  %v579_v30 = vsel %vm6896_vm10, %v5249_v36, 0.0 }
  0x6c   : > { %4447 = vrot.lane.b32.xlu1 %v4446_v44, %s4839_s20  ;;  %v4461_v44 = vpack.i.bf16 %v5360_v40, %v533_v4  ;;  %v539_v4 = vsel %vm5036_vm8, %v5376_v2, 0.0  ;;  %v4551_v61 = vpack.i.bf16 %v579_v30, %v5269_v41  ;;  %v3867_v41 = vld [vmem:[%s5177_s18 + $0x81] sm:$0xff]  ;;  %v3868_v30 = vld [vmem:[%s5177_s18 + $0x89] sm:$0xff] }
  0x6d   : > { %4442 = vrot.lane.b32.xlu0 %v4441_v16, %s4838_s19  ;;  %v531_v16 = vsel %vm6906_vm4, %v5350_v12, 0.0 }
  0x6e   : > { %v4456_v9 = vpack.i.bf16 %v5366_v11, %v531_v16  ;;  %v537_v16 = vsel %vm6907_vm0, %v5379_v6, 0.0 }
  0x73   : > { %4467 = vrot.lane.b32.xlu2 %v4466_v43, %s4839_s20  ;;  %v4476_v43 = vpack.i.bf16 %v5385_v22, %v539_v4  ;;  %v4536_v4 = vpack.i.bf16 %v3868_v30, %v3867_v41  ;;  %v665_v41 = vsel %vm6896_vm10, %v5246_v35, 0.0 }
  0x74   : > { %4462 = vrot.lane.b32.xlu1 %v4461_v44, %s4839_s20  ;;  %v4496_v44 = vpack.i.bf16 %v5192_v53, %v5201_v63  ;;  %v4511_v53 = vpack.i.bf16 %v587_v8, %v5296_v29  ;;  %v4506_v63 = vpack.i.bf16 %v5204_v15, %v5232_v28  ;;  %v620_v15 = vsel %vm6905_vm6, %v5379_v6, 0.0  ;;  %v3884_v8 = vld [vmem:[%s5177_s18 + $0x82] sm:$0xff] }
  0x75   : > { %4457 = vrot.lane.b32.xlu0 %v4456_v9, %s4839_s20  ;;  %v4471_v9 = vpack.i.bf16 %v5391_v18, %v537_v16  ;;  %v4521_v28 = vpack.i.bf16 %v5391_v18, %v620_v15  ;;  %v5440_v16 = vld [vmem:[%s5177_s18 + $0x8a] sm:$0xff] }
  0x7b   : > { %4482 = vrot.lane.b32.xlu2 %v4481_v21, %s4839_s20  ;;  %v4501_v21 = vpack.i.bf16 %v5229_v27, %v5198_v58  ;;  %v591_v58 = vsel %vm6899_vm1, %v5317_v1, 0.0 }
  0x7c   : > { %4477 = vrot.lane.b32.xlu1 %v4476_v43, %s4839_s20  ;;  %v4516_v36 = vpack.i.bf16 %v591_v58, %v5335_v17  ;;  %v583_v43 = vsel %vm6898_vm12, %v5243_v34, 0.0 }
  0x7d   : > { %4472 = vrot.lane.b32.xlu0 %v4471_v9, %s4839_s20 }
  0x83   : > { %4497 = vrot.lane.b32.xlu2 %v4496_v44, %s4840_s21  ;;  %v449_v44 = vsel %vm6905_vm6, %v5347_v13, 0.0 }
  0x84   : > { %4492 = vrot.lane.b32.xlu1 %v5187_v46, %s4840_s21 }
  0x85   : > { %4487 = vrot.lane.b32.xlu0 %v5216_v23, %s4840_s21  ;;  %v624_v23 = vsel %vm5036_vm8, %v3801_v3, 0.0  ;;  %v673_v3 = vsel %vm6901_vm14, %v5278_v19, 0.0  ;;  %vm6908_vm14 = vcmask 31744  }
  0x86   : > { %v4526_v27 = vpack.i.bf16 %v3802_v5, %v624_v23  ;;  %v4541_v5 = vpack.i.bf16 %v673_v3, %v5290_v25 }
  0x8b   : > { %4512 = vrot.lane.b32.xlu2 %v4511_v53, %s4841_s22  ;;  %v677_v53 = vsel %vm6899_vm1, %v5440_v16, 0.0  ;;  %vm6909_vm1 = vcmask 31744  }
  0x8c   : > { %4507 = vrot.lane.b32.xlu1 %v4506_v63, %s4840_s21  ;;  %v4546_v15 = vpack.i.bf16 %v677_v53, %v3884_v8  ;;  %vm6910_vm6 = vmmov %vm6909_vm1 }
  0x8d   : > { %4502 = vrot.lane.b32.xlu0 %v4501_v21, %s4840_s21  ;;  %v4556_v21 = vpack.i.bf16 %v583_v43, %v5257_v37  ;;  %v589_v43 = vsel %vm6900_vm15, %v5278_v19, 0.0 }
  0x93   : > { %4527 = vrot.lane.b32.xlu2 %v4526_v27, %s4842_s23  ;;  %v616_v27 = vsel %vm6906_vm4, %v5347_v13, 0.0  ;;  %v669_v13 = vsel %vm6898_vm12, %v5284_v24, 0.0 }
  0x94   : > { %4522 = vrot.lane.b32.xlu1 %v4521_v28, %s4842_s23  ;;  %v612_v28 = vsel %vm6902_vm2, %v5311_v45, 0.0  ;;  %v4586_v30 = vpack.i.bf16 %v669_v13, %v5302_v31  ;;  %v4601_v13 = vpack.i.bf16 %v589_v43, %v5290_v25 }
  0x95   : > { %4517 = vrot.lane.b32.xlu0 %v4516_v36, %s4841_s22  ;;  %v4566_v36 = vpack.i.bf16 %v5360_v40, %v616_v27  ;;  %v4561_v3 = vpack.i.bf16 %v5323_v26, %v612_v28  ;;  %v426_v27 = vld [vmem:[%s5177_s18 + $0x8] sm:$0xff] }
  0x9b   : > { %4542 = vrot.lane.b32.xlu2 %v4541_v5, %s4843_s24  ;;  %v4581_v5 = vpack.i.bf16 %v665_v41, %v5263_v39 }
  0x9c   : > { %4537 = vrot.lane.b32.xlu1 %v4536_v4, %s4844_s1 }
  0x9d   : > { %4532 = vrot.lane.b32.xlu0 %v5240_v33, %s4844_s1  ;;  %v5449_v9 = vpop.permute.xlu2 %4387 }
  0x9e   : > { %v4389_v63 = vunpack.i.l.bf16 %v5449_v9 }
  0xa0   : > { %v5461_v23 = vsel %vm6908_vm14, %v449_v44, %v4389_v63  ;;  %vm6832_vm14 = vcmask 64512  }
  0xa3   : > { %4557 = vrot.lane.b32.xlu2 %v4556_v21, %s4841_s22 }
  0xa4   : > { %4552 = vrot.lane.b32.xlu1 %v4551_v61, %s4841_s22 }
  0xa5   : > { %4547 = vrot.lane.b32.xlu0 %v4546_v15, %s4843_s24  ;;  %v5466_v58 = vpop.permute.xlu2 %4392 }
  0xab   : > { %4572 = vrot.lane.b32.xlu2 %v5187_v46, %s4844_s1  ;;  %v425_v46 = vld [vmem:[%s5177_s18] sm:$0xff] }
  0xac   : > { %4567 = vrot.lane.b32.xlu1 %v4566_v36, %s4842_s23  ;;  %v441_v28 = vsel %vm6902_vm2, %v425_v46, 0.0  ;;  %v3853_v46 = vld [vmem:[%s5177_s18 + $0x98] sm:$0xff]  ;;  %vm6913_vm2 = vmmov %vm6909_vm1 }
  0xad   : > { %4562 = vrot.lane.b32.xlu0 %v4561_v3, %s4842_s23  ;;  %v4408_v61 = vpop.permute.xlu2 %4407 }
  0xae   : > { %v4410_v53 = vunpack.i.h.bf16 %v4408_v61  ;;  %v4409_v63 = vunpack.i.l.bf16 %v4408_v61 }
  0xb3   : > { %4587 = vrot.lane.b32.xlu2 %v4586_v30, %s4843_s24  ;;  %v3852_v30 = vld [vmem:[%s5177_s18 + $0x90] sm:$0xff] }
  0xb4   : > { %4582 = vrot.lane.b32.xlu1 %v4581_v5, %s4843_s24  ;;  %v626_v25 = vsel %vm5040_vm9, %v3852_v30, 0.0 }
  0xb5   : > { %4577 = vrot.lane.b32.xlu0 %v5182_v42, %s4844_s1  ;;  %v4423_v44 = vpop.permute.xlu2 %4422 }
  0xb6   : > { %v5496_v21 = vpop.permute.xlu1 %4377 }
  0xb7   : > { %v4368_v15 = vpop.permute.xlu0 %4367 }
  0xb8   : > { %v4370_v36 = vunpack.i.h.bf16 %v4368_v15  ;;  %v4369_v3 = vunpack.i.l.bf16 %v4368_v15  ;;  %v4425_v15 = vunpack.i.h.bf16 %v4423_v44 }
  0xba   : > { %v1192_v41 = vsel %vm6909_vm1, %v441_v28, %v4369_v3  ;;  %v1193_v19 = vsel %vm6910_vm6, %v426_v27, %v4370_v36  ;;  %v4424_v27 = vunpack.i.l.bf16 %v4423_v44  ;;  %vm6911_vm6 = vmmov %vm6909_vm1 }
  0xbb   : > { %v5506_v61 = vsel %vm6832_vm14, %v1192_v41, %v4409_v63  ;;  %v5509_v5 = vsel %vm6832_vm14, %v1193_v19, %v4410_v53  ;;  %4602 = vrot.lane.b32.xlu2 %v4601_v13, %s4841_s22  ;;  %v622_v63 = vsel %vm6907_vm0, %v5376_v2, 0.0  ;;  %v593_v53 = vsel %vm6903_vm7, %v5440_v16, 0.0 }
  0xbc   : > { %4597 = vrot.lane.b32.xlu1 %v4536_v4, %s4840_s21  ;;  %v4616_v13 = vpack.i.bf16 %v3853_v46, %v626_v25  ;;  %v4611_v41 = vpack.i.bf16 %v5385_v22, %v622_v63  ;;  %v4606_v19 = vpack.i.bf16 %v593_v53, %v3884_v8  ;;  %v675_v8 = vsel %vm6900_vm15, %v5317_v1, 0.0  ;;  %v3869_v25 = vld [vmem:[%s5177_s18 + $0x91] sm:$0xff]  ;;  %v3870_v63 = vld [vmem:[%s5177_s18 + $0x99] sm:$0xff] }
  0xbd   : > { %4592 = vrot.lane.b32.xlu0 %v5240_v33, %s4840_s21  ;;  %v5518_v43 = vpop.permute.xlu2 %4437  ;;  %v447_v33 = vsel %vm5020_vm5, %v5350_v12, 0.0  ;;  %vm6919_vm15 = vcmask 97280  }
  0xbe   : > { %v4383_v4 = vpop.permute.xlu1 %4382 }
  0xbf   : > { %v4373_v28 = vpop.permute.xlu0 %4372  ;;  %v4385_v36 = vunpack.i.h.bf16 %v4383_v4  ;;  %v4384_v3 = vunpack.i.l.bf16 %v4383_v4  ;;  %v4626_v4 = vpack.i.bf16 %v3870_v63, %v3869_v25 }
  0xc1   : > { %v1198_v30 = vsel %vm6911_vm6, %v447_v33, %v4384_v3  ;;  %v1199_v16 = vsel %vm6909_vm1, %v5366_v11, %v4385_v36  ;;  %v3887_v33 = vld [vmem:[%s5177_s18 + $0x9a] sm:$0xff]  ;;  %v581_v36 = vsel %vm5052_vm11, %v5246_v35, 0.0  ;;  %v3886_v3 = vld [vmem:[%s5177_s18 + $0x92] sm:$0xff]  ;;  %v443_v35 = vsel %vm5012_vm3, %v5314_v48, 0.0  ;;  %vm6914_vm6 = vmmov %vm6909_vm1 }
  0xc2   : > { %v5534_v44 = vsel %vm6832_vm14, %v1198_v30, %v4424_v27  ;;  %v5537_v7 = vsel %vm6832_vm14, %v1199_v16, %v4425_v15  ;;  %v4631_v15 = vpack.i.bf16 %v675_v8, %v5335_v17  ;;  %v679_v1 = vsel %vm6903_vm7, %v3887_v33, 0.0  ;;  %vm6912_vm14 = vmmov %vm6909_vm1 }
  0xc3   : > { %4617 = vrot.lane.b32.xlu2 %v4616_v13, %s4842_s23  ;;  %v4380_v13 = vunpack.i.h.bf16 %v5496_v21  ;;  %v4374_v30 = vunpack.i.l.bf16 %v4373_v28  ;;  %v445_v17 = vsel %vm6906_vm4, %v5311_v45, 0.0  ;;  %v4646_v63 = vpack.i.bf16 %v581_v36, %v5263_v39 }
  0xc4   : > { %4612 = vrot.lane.b32.xlu1 %v4611_v41, %s4842_s23  ;;  %v4379_v41 = vunpack.i.l.bf16 %v5496_v21  ;;  %vm6915_vm4 = vcmask 64512  }
  0xc5   : > { %4607 = vrot.lane.b32.xlu0 %v4606_v19, %s4841_s22  ;;  %v4453_v46 = vpop.permute.xlu2 %4452  ;;  %v4375_v19 = vunpack.i.h.bf16 %v4373_v28  ;;  %v1197_v10 = vsel %vm6912_vm14, %v5323_v26, %v4380_v13  ;;  %v1194_v48 = vsel %vm6913_vm2, %v443_v35, %v4374_v30  ;;  %vm6916_vm7 = vmmov %vm6915_vm4  ;;  %v4394_v13 = vunpack.i.l.bf16 %v5466_v58 }
  0xc6   : > { %v5547_v53 = vpop.permute.xlu1 %4402  ;;  %v4455_v8 = vunpack.i.h.bf16 %v4453_v46  ;;  %v4454_v21 = vunpack.i.l.bf16 %v4453_v46  ;;  %v1196_v45 = vsel %vm6909_vm1, %v445_v17, %v4379_v41  ;;  %vm6917_vm10 = vmmov %vm6915_vm4  ;;  %v614_v41 = vsel %vm5012_vm3, %v5350_v12, 0.0 }
  0xc7   : > { %v5549_v27 = vpop.permute.xlu0 %4397  ;;  %v1195_v47 = vsel %vm6914_vm6, %v5329_v38, %v4375_v19  ;;  %vm6918_vm12 = vmmov %vm6915_vm4  ;;  %v4395_v38 = vunpack.i.h.bf16 %v5466_v58  ;;  %v585_v19 = vsel %vm5060_vm13, %v5284_v24, 0.0 }
  0xc8   : > { %vm6920_vm1 = vmmov %vm6919_vm15  ;;  %v4651_v12 = vpack.i.bf16 %v585_v19, %v5302_v31 }
  0xc9   : > { %vm6927_vm14 = vmmov %vm6920_vm1 }
  0xca   : > { %vm6928_vm6 = vmmov %vm6920_vm1 }
  0xcb   : > { %4632 = vrot.lane.b32.xlu2 %v4631_v15, %s4843_s24  ;;  %v4636_v15 = vpack.i.bf16 %v679_v1, %v3886_v3 }
  0xcc   : > { %4627 = vrot.lane.b32.xlu1 %v4626_v4, %s4844_s1 }
  0xcd   : > { %4622 = vrot.lane.b32.xlu0 %v5238_v32, %s4844_s1  ;;  %v5571_v16 = vpop.permute.xlu2 %4467 }
  0xce   : > { %v4418_v25 = vpop.permute.xlu1 %4417 }
  0xcf   : > { %v4413_v28 = vpop.permute.xlu0 %4412  ;;  %v4420_v4 = vunpack.i.h.bf16 %v4418_v25  ;;  %v4419_v32 = vunpack.i.l.bf16 %v4418_v25 }
  0xd0   : > { %v4415_v33 = vunpack.i.h.bf16 %v4413_v28  ;;  %v4414_v0 = vunpack.i.l.bf16 %v4413_v28  ;;  %v4656_v28 = vpack.i.bf16 %v5366_v11, %v614_v41  ;;  %v455_v11 = vsel %vm5040_vm9, %v5376_v2, 0.0 }
  0xd1   : > { %v5581_v46 = vsel %vm6915_vm4, %v1196_v45, %v4419_v32  ;;  %v5584_v39 = vsel %vm6916_vm7, %v1197_v10, %v4420_v4  ;;  %vm6923_vm4 = vmmov %vm6913_vm2  ;;  %v4405_v4 = vunpack.i.h.bf16 %v5547_v53  ;;  %v4404_v32 = vunpack.i.l.bf16 %v5547_v53 }
  0xd2   : > { %v1211_v36 = vsel %vm6917_vm10, %v1194_v48, %v4414_v0  ;;  %v1212_v3 = vsel %vm6918_vm12, %v1195_v47, %v4415_v33  ;;  %v618_v47 = vsel %vm5020_vm5, %v5344_v14, 0.0  ;;  %v451_v0 = vsel %vm6907_vm0, %v5344_v14, 0.0  ;;  %vm6924_vm10 = vmmov %vm6916_vm7 }
  0xd3   : > { %v5589_v1 = vsel %vm6919_vm15, %v1211_v36, %v4454_v21  ;;  %v5592_v26 = vsel %vm6920_vm1, %v1212_v3, %v4455_v8  ;;  %4647 = vrot.lane.b32.xlu2 %v4646_v63, %s4841_s22  ;;  %v6922_v8 = vld [vmem:[#allocation28_spill] sm:$0xff]  ;;  %v1202_v25 = vsel %vm6913_vm2, %v451_v0, %v4394_v13  ;;  %vm6925_vm12 = vmmov %vm6913_vm2 }
  0xd4   : > { %4642 = vrot.lane.b32.xlu1 %v5182_v42, %s4840_s21  ;;  %v4661_v21 = vpack.i.bf16 %v6922_v8, %v618_v47  ;;  %v1203_v14 = vsel %vm6923_vm4, %v6922_v8, %v4395_v38  ;;  %v1206_v47 = vsel %vm6925_vm12, %v455_v11, %v4404_v32  ;;  %vm6926_vm15 = vmmov %vm6913_vm2  ;;  %v6938_v32 = vld [vmem:[#allocation10_spill] sm:$0xff]  ;;  %v6939_v11 = vld [vmem:[#allocation11_spill] sm:$0xff] }
  0xd5   : > { %4637 = vrot.lane.b32.xlu0 %v4636_v15, %s4843_s24  ;;  %v4483_v10 = vpop.permute.xlu2 %4482  ;;  %v667_v15 = vsel %vm5052_vm11, %v5243_v34, 0.0  ;;  %v1207_v0 = vsel %vm6926_vm15, %v5385_v22, %v4405_v4  ;;  %vm6929_vm1 = vmmov %vm6916_vm7  ;;  %v6933_v22 = vld [vmem:[#allocation26_spill] sm:$0xff] }
  0xd6   : > { %v4433_v42 = vpop.permute.xlu1 %4432  ;;  %v4485_v33 = vunpack.i.h.bf16 %v4483_v10  ;;  %v4484_v45 = vunpack.i.l.bf16 %v4483_v10  ;;  %v4676_v34 = vpack.i.bf16 %v667_v15, %v5257_v37  ;;  %vm6930_vm2 = vmmov %vm6929_vm1 }
  0xd7   : > { %v5612_v30 = vpop.permute.xlu0 %4427  ;;  %v4435_v17 = vunpack.i.h.bf16 %v4433_v42  ;;  %v4434_v35 = vunpack.i.l.bf16 %v4433_v42  ;;  %vm6931_vm4 = vmmov %vm6928_vm6 }
  0xd8   : > { %vm6936_vm12 = vmmov %vm6931_vm4 }
  0xd9   : > { %v1219_v63 = vsel %vm6916_vm7, %v1202_v25, %v4434_v35  ;;  %v1220_v24 = vsel %vm6924_vm10, %v1203_v14, %v4435_v17  ;;  %vm6932_vm7 = vmmov %vm6931_vm4  ;;  %v6935_v17 = vld [vmem:[#allocation12_spill] sm:$0xff]  ;;  %vm1378_vm10 = vcmask 1041408  }
  0xda   : > { %v1347_v35 = vunpack.c.l.b16 %v6935_v17  ;;  %vm6937_vm15 = vmmov %vm6931_vm4  ;;  %v4399_v17 = vunpack.i.l.bf16 %v5549_v27 }
  0xdb   : > { %4662 = vrot.lane.b32.xlu2 %v4661_v21, %s4842_s23 }
  0xdc   : > { %4657 = vrot.lane.b32.xlu1 %v4656_v28, %s4842_s23  ;;  %v1350_v15 = vpack.c.b16 %v1347_v35, %v1347_v35  ;;  %v4429_v35 = vunpack.i.l.bf16 %v5612_v30 }
  0xdd   : > { %4652 = vrot.lane.b32.xlu0 %v4651_v12, %s4841_s22  ;;  %v5633_v31 = vpop.permute.xlu2 %4497 }
  0xde   : > { %v4448_v48 = vpop.permute.xlu1 %4447  ;;  %v1380_v58 = vsel %vm1378_vm10, %v1350_v15, 0  ;;  %v4469_v15 = vunpack.i.l.bf16 %v5571_v16 }
  0xdf   : > { %v4443_v36 = vpop.permute.xlu0 %4442  ;;  %v4450_v3 = vunpack.i.h.bf16 %v4448_v48  ;;  %v4449_v38 = vunpack.i.l.bf16 %v4448_v48  ;;  %4338 = vmatpush.bf16.msra.mxu2 %v1380_v58  ;;  %4339 = vmatpush.bf16.msra.mxu3 %v1380_v58 }
  0xe0   : > { %v4445_v13 = vunpack.i.h.bf16 %v4443_v36  ;;  %v4444_v53 = vunpack.i.l.bf16 %v4443_v36  ;;  %1387 = vmatpush.bf16.msra.mxu0 %v1380_v58  ;;  %4337 = vmatpush.bf16.msra.mxu1 %v1380_v58  ;;  %v6940_v36 = vld [vmem:[#allocation7_spill] sm:$0xff] }
  0xe1   : > { %v5641_v2 = vsel %vm6927_vm14, %v5506_v61, %v4449_v38  ;;  %v5645_v10 = vsel %vm6928_vm6, %v5509_v5, %v4450_v3  ;;  %v6934_v61 = vld [vmem:[#allocation27_spill] sm:$0xff]  ;;  %v671_v5 = vsel %vm5060_vm13, %v5281_v20, 0.0  ;;  %vm6942_vm14 = vmmov %vm6931_vm4 }
  0xe2   : > { %v1223_v41 = vsel %vm6929_vm1, %v1206_v47, %v4444_v53  ;;  %v1224_v37 = vsel %vm6930_vm2, %v1207_v0, %v4445_v13  ;;  %v4681_v12 = vpack.i.bf16 %v671_v5, %v5296_v29  ;;  %vm6943_vm6 = vmmov %vm6931_vm4  ;;  %vm1242_vm1 = vcmask 130048  }
  0xe3   : > { %v5650_v19 = vsel %vm6931_vm4, %v1223_v41, %v4484_v45  ;;  %v5653_v42 = vsel %vm6932_vm7, %v1224_v37, %v4485_v33  ;;  %4677 = vrot.lane.b32.xlu2 %v4676_v34, %s4843_s24  ;;  %v3895_v33 = vor.u32 %v6939_v11, %v6938_v32  ;;  %v4390_v5 = vunpack.i.h.bf16 %v5449_v9 }
  0xe4   : > { %4672 = vrot.lane.b32.xlu1 %v6933_v22, %s4844_s1  ;;  %vm6944_vm2 = vcmask 31744   ;;  %v4439_v9 = vunpack.i.l.bf16 %v5518_v43  ;;  %v4470_v11 = vunpack.i.h.bf16 %v5571_v16  ;;  %vm6946_vm7 = vcmask 64512  }
  0xe5   : > { %4667 = vrot.lane.b32.xlu0 %v6934_v61, %s4844_s1  ;;  %v5666_v25 = vpop.permute.xlu2 %4512  ;;  %4341 = vmatpush.bf16.msra.mxu2 %v3895_v33  ;;  %vm6945_vm4 = vmmov %vm6944_vm2 }
  0xe6   : > { %v4463_v8 = vpop.permute.xlu1 %4462  ;;  %4342 = vmatpush.bf16.msra.mxu3 %v3895_v33  ;;  %1388 = vmatpush.bf16.msra.mxu0 %v3895_v33  ;;  %vm6947_vm10 = vmmov %vm6944_vm2 }
  0xe7   : > { %v5664_v21 = vpop.permute.xlu0 %4457  ;;  %v4465_v14 = vunpack.i.h.bf16 %v4463_v8  ;;  %v4464_v28 = vunpack.i.l.bf16 %v4463_v8  ;;  %4340 = vmatpush.bf16.msra.mxu1 %v3895_v33  ;;  %v4400_v8 = vunpack.i.h.bf16 %v5549_v27 }
  0xe9   : > { %v5671_v4 = vsel %vm6936_vm12, %v5534_v44, %v4464_v28  ;;  %v5675_v20 = vsel %vm6937_vm15, %v5537_v7, %v4465_v14  ;;  %v6941_v7 = vld [vmem:[#allocation8_spill] sm:$0xff]  ;;  %v1201_v28 = vsel %vm6944_vm2, %v5360_v40, %v4390_v5  ;;  %v1205_v40 = vsel %vm6947_vm10, %v5391_v18, %v4400_v8  ;;  %vm6948_vm12 = vmmov %vm6946_vm7 }
  0xea   : > { %v3891_v34 = vor.u32 %v6941_v7, %v6940_v36  ;;  %vm6949_vm15 = vmmov %vm6946_vm7  ;;  %v4515_v36 = vunpack.i.h.bf16 %v5666_v25  ;;  %vm1293_vm10 = vcmask 228352  }
  0xeb   : > { %vm6951_vm2 = vmmov %vm6946_vm7 }
  0xec   : > { %4344 = vmatpush.bf16.msra.mxu2 %v3891_v34  ;;  %4345 = vmatpush.bf16.msra.mxu3 %v3891_v34 }
  0xed   : > { %4682 = vrot.lane.b32.xlu0 %v4681_v12, %s4843_s24  ;;  %v5684_v3 = vpop.permute.xlu2 %4527  ;;  %1389 = vmatpush.bf16.msra.mxu0 %v3891_v34  ;;  %v4440_v12 = vunpack.i.h.bf16 %v5518_v43 }
  0xee   : > { %v5680_v29 = vpop.permute.xlu1 %4477  ;;  %4343 = vmatpush.bf16.msra.mxu1 %v3891_v34 }
  0xef   : > { %v4473_v45 = vpop.permute.xlu0 %4472  ;;  %v1222_v16 = vsel %vm6951_vm2, %v1205_v40, %v4440_v12  ;;  %v4479_v5 = vunpack.i.l.bf16 %v5680_v29  ;;  %vm1353_vm2 = vcmask 293888  }
  0xf0   : > { %v4475_v48 = vunpack.i.h.bf16 %v4473_v45  ;;  %v4474_v44 = vunpack.i.l.bf16 %v4473_v45  ;;  %v4514_v45 = vunpack.i.l.bf16 %v5666_v25 }
  0xf2   : > { %v5687_v38 = vsel %vm6942_vm14, %v1219_v63, %v4474_v44  ;;  %v5690_v13 = vsel %vm6943_vm6, %v1220_v24, %v4475_v48  ;;  %vm6950_vm14 = vmmov %vm6943_vm6  ;;  %vm1259_vm6 = vcmask 162816  }
  0xf5   : > { %v4543_v24 = vpop.permute.xlu2 %4542 }
  0xf6   : > { %v4493_v53 = vpop.permute.xlu1 %4492 }
  0xf7   : > { %v5692_v47 = vpop.permute.xlu0 %4487  ;;  %v4495_v0 = vunpack.i.h.bf16 %v4493_v53  ;;  %v4494_v41 = vunpack.i.l.bf16 %v4493_v53 }
  0xf9   : > { %v5696_v37 = vsel %vm1242_vm1, %v5589_v1, %v4494_v41  ;;  %v5700_v63 = vsel %vm1242_vm1, %v5592_v26, %v4495_v0  ;;  %v453_v1 = vsel %vm5036_vm8, %v5379_v6, 0.0  ;;  %v4430_v26 = vunpack.i.h.bf16 %v5612_v30 }
  0xfa   : > { %v1204_v27 = vsel %vm6945_vm4, %v453_v1, %v4399_v17  ;;  %v1217_v6 = vsel %vm6946_vm7, %v5461_v23, %v4429_v35  ;;  %v4500_v30 = vunpack.i.h.bf16 %v5633_v31  ;;  %vm6952_vm4 = vmmov %vm6950_vm14  ;;  %vm1276_vm7 = vcmask 195584  }
  0xfb   : > { %v1218_v33 = vsel %vm6948_vm12, %v1201_v28, %v4430_v26  ;;  %v1221_v48 = vsel %vm6949_vm15, %v1204_v27, %v4439_v9  ;;  %v1234_v44 = vsel %vm6950_vm14, %v1217_v6, %v4469_v15  ;;  %v4480_v41 = vunpack.i.h.bf16 %v5680_v29  ;;  %vm6953_vm15 = vmmov %vm6952_vm4 }
  0xfc   : > { %v1251_v23 = vsel %vm1242_vm1, %v1234_v44, %v4500_v30  ;;  %v1235_v7 = vsel %vm6952_vm4, %v1218_v33, %v4470_v11  ;;  %v4545_v17 = vunpack.i.h.bf16 %v4543_v24  ;;  %v4544_v35 = vunpack.i.l.bf16 %v4543_v24  ;;  %vm6954_vm14 = vmmov %vm6952_vm4 }
  0xfd   : > { %v5714_v14 = vpop.permute.xlu2 %4557  ;;  %v1268_v0 = vsel %vm1259_vm6, %v1251_v23, %v4514_v45  ;;  %vm1310_vm12 = vcmask 261120   ;;  %v4530_v24 = vunpack.i.h.bf16 %v5684_v3  ;;  %v1238_v6 = vsel %vm6953_vm15, %v1221_v48, %v4479_v5  ;;  %vm6955_vm15 = vmmov %vm6952_vm4 }
  0xfe   : > { %v5702_v22 = vpop.permute.xlu1 %4507  ;;  %v1239_v40 = vsel %vm6954_vm14, %v1222_v16, %v4480_v41  ;;  %v4529_v45 = vunpack.i.l.bf16 %v5684_v3  ;;  %vm1888_vm14 = vcmask 1044484  }
  0xff   : > { %v5704_v61 = vpop.permute.xlu0 %4502  ;;  %v4509_v8 = vunpack.i.l.bf16 %v5702_v22 }
 0x100   : > { %v4504_v43 = vunpack.i.l.bf16 %v5704_v61  ;;  %v4505_v26 = vunpack.i.h.bf16 %v5704_v61 }
 0x101   : > { %v1256_v44 = vsel %vm1242_vm1, %v1239_v40, %v4509_v8 }
 0x102   : > { %v1252_v18 = vsel %vm1242_vm1, %v1235_v7, %v4504_v43 }
 0x103   : > { %v1269_v12 = vsel %vm1259_vm6, %v1252_v18, %v4515_v36 }
 0x105   : > { %v5743_v28 = vpop.permute.xlu2 %4572 }
 0x106   : > { %v4523_v58 = vpop.permute.xlu1 %4522 }
 0x107   : > { %v4518_v32 = vpop.permute.xlu0 %4517  ;;  %v4525_v34 = vunpack.i.h.bf16 %v4523_v58  ;;  %v4524_v53 = vunpack.i.l.bf16 %v4523_v58 }
 0x108   : > { %v4520_v27 = vunpack.i.h.bf16 %v4518_v32  ;;  %v4519_v11 = vunpack.i.l.bf16 %v4518_v32  ;;  %v1255_v32 = vsel %vm1242_vm1, %v1238_v6, %v4505_v26  ;;  %v4459_v26 = vunpack.i.l.bf16 %v5664_v21 }
 0x109   : > { %v1285_v58 = vsel %vm1276_vm7, %v1268_v0, %v4524_v53  ;;  %v1286_v29 = vsel %vm1276_vm7, %v1269_v12, %v4525_v34  ;;  %v4460_v12 = vunpack.i.h.bf16 %v5664_v21  ;;  %v4499_v6 = vunpack.i.l.bf16 %v5633_v31 }
 0x10a   : > { %v1272_v48 = vsel %vm1259_vm6, %v1255_v32, %v4519_v11  ;;  %v1273_v36 = vsel %vm1259_vm6, %v1256_v44, %v4520_v27  ;;  %v4510_v27 = vunpack.i.h.bf16 %v5702_v22 }
 0x10b   : > { %v1289_v53 = vsel %vm1276_vm7, %v1272_v48, %v4529_v45  ;;  %v1290_v0 = vsel %vm1276_vm7, %v1273_v36, %v4530_v24  ;;  %v1231_v21 = vsel %vm6955_vm15, %v5584_v39, %v4460_v12  ;;  %v4575_v45 = vunpack.i.h.bf16 %v5743_v28 }
 0x10c   : > { %v1248_v31 = vsel %vm1242_vm1, %v1231_v21, %v4510_v27  ;;  %vm6837_vm15 = vcmask 1047559  }
 0x10e   : > { %v4538_v1 = vpop.permute.xlu1 %4537 }
 0x10f   : > { %v4533_v25 = vpop.permute.xlu0 %4532  ;;  %v4540_v7 = vunpack.i.h.bf16 %v4538_v1  ;;  %v4539_v18 = vunpack.i.l.bf16 %v4538_v1 }
 0x110   : > { %v4535_v9 = vunpack.i.h.bf16 %v4533_v25  ;;  %v4534_v15 = vunpack.i.l.bf16 %v4533_v25 }
 0x111   : > { %v1306_v5 = vsel %vm1293_vm10, %v1289_v53, %v4539_v18 }
 0x112   : > { %v1302_v30 = vsel %vm1293_vm10, %v1285_v58, %v4534_v15  ;;  %v1303_v61 = vsel %vm1293_vm10, %v1286_v29, %v4535_v9  ;;  %v4489_v9 = vunpack.i.l.bf16 %v5692_v47  ;;  %v4490_v29 = vunpack.i.h.bf16 %v5692_v47 }
 0x113   : > { %v1319_v33 = vsel %vm1310_vm12, %v1302_v30, %v4544_v35  ;;  %v1320_v43 = vsel %vm1310_vm12, %v1303_v61, %v4545_v17  ;;  %v1307_v17 = vsel %vm1293_vm10, %v1290_v0, %v4540_v7  ;;  %v4588_v35 = vpop.permute.xlu2 %4587  ;;  %v1230_v30 = vsel %vm6952_vm4, %v5581_v46, %v4459_v26 }
 0x114   : > { %v1331_v23 = vpack.c.bf16 %v1320_v43, %v1319_v33  ;;  %v1243_v33 = vsel %vm1242_vm1, %v5641_v2, %v4489_v9  ;;  %v4560_v43 = vunpack.i.h.bf16 %v5714_v14  ;;  %v4559_v47 = vunpack.i.l.bf16 %v5714_v14 }
 0x115   : > { %v1244_v22 = vsel %vm1242_vm1, %v5645_v10, %v4490_v29  ;;  %v4574_v46 = vunpack.i.l.bf16 %v5743_v28  ;;  %v1247_v48 = vsel %vm1242_vm1, %v1230_v30, %v4499_v6  ;;  %v4590_v7 = vunpack.i.h.bf16 %v4588_v35 }
 0x116   : > { %3900 = vmatmul.msk.bf16.vlgmr.msra.gmra.mxu2 %vm1353_vm2, %v1331_v23  ;;  %v4553_v16 = vpop.permute.xlu1 %4552  ;;  %v1264_v10 = vsel %vm1259_vm6, %v1247_v48, %v4559_v47  ;;  %v4589_v18 = vunpack.i.l.bf16 %v4588_v35  ;;  %vm6838_vm4 = vcmask 1046534  }
 0x117   : > { %v4548_v34 = vpop.permute.xlu0 %4547  ;;  %v4555_v11 = vunpack.i.h.bf16 %v4553_v16  ;;  %v4554_v24 = vunpack.i.l.bf16 %v4553_v16  ;;  %v1265_v16 = vsel %vm1259_vm6, %v1248_v31, %v4560_v43 }
 0x118   : > { %v4550_v3 = vunpack.i.h.bf16 %v4548_v34  ;;  %v4549_v41 = vunpack.i.l.bf16 %v4548_v34 }
 0x119   : > { %v1260_v32 = vsel %vm1259_vm6, %v1243_v33, %v4554_v24  ;;  %v1261_v39 = vsel %vm1259_vm6, %v1244_v22, %v4555_v11 }
 0x11a   : > { %v1323_v8 = vsel %vm1310_vm12, %v1306_v5, %v4549_v41  ;;  %v1324_v25 = vsel %vm1310_vm12, %v1307_v17, %v4550_v3 }
 0x11b   : > { %v1333_v1 = vpack.c.bf16 %v1324_v25, %v1323_v8  ;;  %v4603_v44 = vpop.permute.xlu2 %4602 }
 0x11c   : > { %v4605_v33 = vunpack.i.h.bf16 %v4603_v44  ;;  %v4604_v43 = vunpack.i.l.bf16 %v4603_v44 }
 0x11d   : > { %3902 = vmatmul.msk.bf16.vlgmr.msra.gmra.mxu3 %vm1353_vm2, %v1333_v1 }
 0x11e   : > { %v4568_v15 = vpop.permute.xlu1 %4567 }
 0x11f   : > { %v4563_v58 = vpop.permute.xlu0 %4562  ;;  %v4570_v23 = vunpack.i.h.bf16 %v4568_v15  ;;  %v4569_v2 = vunpack.i.l.bf16 %v4568_v15 }
 0x120   : > { %v4565_v61 = vunpack.i.h.bf16 %v4563_v58  ;;  %v4564_v40 = vunpack.i.l.bf16 %v4563_v58 }
 0x121   : > { %v1281_v5 = vsel %vm1276_vm7, %v1264_v10, %v4569_v2  ;;  %v1282_v17 = vsel %vm1276_vm7, %v1265_v16, %v4570_v23 }
 0x122   : > { %v1277_v14 = vsel %vm1276_vm7, %v1260_v32, %v4564_v40  ;;  %v1278_v36 = vsel %vm1276_vm7, %v1261_v39, %v4565_v61 }
 0x123   : > { %v1294_v8 = vsel %vm1293_vm10, %v1277_v14, %v4574_v46  ;;  %v1295_v25 = vsel %vm1293_vm10, %v1278_v36, %v4575_v45  ;;  %v4618_v27 = vpop.permute.xlu2 %4617 }
 0x126   : > { %v4583_v28 = vpop.permute.xlu1 %4582 }
 0x127   : > { %v4578_v34 = vpop.permute.xlu0 %4577  ;;  %v4585_v53 = vunpack.i.h.bf16 %v4583_v28  ;;  %v4584_v0 = vunpack.i.l.bf16 %v4583_v28 }
 0x128   : > { %v4580_v3 = vunpack.i.h.bf16 %v4578_v34  ;;  %v4579_v41 = vunpack.i.l.bf16 %v4578_v34 }
 0x129   : > { %v1311_v26 = vsel %vm1310_vm12, %v1294_v8, %v4584_v0  ;;  %v1312_v12 = vsel %vm1310_vm12, %v1295_v25, %v4585_v53  ;;  %v4620_v53 = vunpack.i.h.bf16 %v4618_v27 }
 0x12a   : > { %v1298_v1 = vsel %vm1293_vm10, %v1281_v5, %v4579_v41  ;;  %v1299_v35 = vsel %vm1293_vm10, %v1282_v17, %v4580_v3  ;;  %v1327_v9 = vpack.c.bf16 %v1312_v12, %v1311_v26  ;;  %v4619_v41 = vunpack.i.l.bf16 %v4618_v27 }
 0x12b   : > { %v1315_v15 = vsel %vm1310_vm12, %v1298_v1, %v4589_v18  ;;  %v1316_v58 = vsel %vm1310_vm12, %v1299_v35, %v4590_v7  ;;  %v4633_v61 = vpop.permute.xlu2 %4632 }
 0x12c   : > { %v1329_v29 = vpack.c.bf16 %v1316_v58, %v1315_v15  ;;  %3896 = vmatmul.msk.bf16.vlgmr.msra.gmra.mxu0 %vm1353_vm2, %v1327_v9  ;;  %v4635_v46 = vunpack.i.h.bf16 %v4633_v61  ;;  %v4634_v32 = vunpack.i.l.bf16 %v4633_v61 }
 0x12e   : > { %3898 = vmatmul.msk.bf16.vlgmr.msra.gmra.mxu1 %vm1353_vm2, %v1329_v29  ;;  %v4598_v11 = vpop.permute.xlu1 %4597 }
 0x12f   : > { %v4593_v24 = vpop.permute.xlu0 %4592  ;;  %v4600_v39 = vunpack.i.h.bf16 %v4598_v11  ;;  %v4599_v23 = vunpack.i.l.bf16 %v4598_v11 }
 0x130   : > { %v4595_v40 = vunpack.i.h.bf16 %v4593_v24  ;;  %v4594_v21 = vunpack.i.l.bf16 %v4593_v24 }
 0x131   : > { %v1257_v5 = vsel %vm1242_vm1, %v5650_v19, %v4599_v23  ;;  %v1258_v17 = vsel %vm1242_vm1, %v5653_v42, %v4600_v39 }
 0x132   : > { %v1253_v47 = vsel %vm1242_vm1, %v5687_v38, %v4594_v21  ;;  %v1254_v22 = vsel %vm1242_vm1, %v5690_v13, %v4595_v40 }
 0x133   : > { %v1270_v14 = vsel %vm1259_vm6, %v1253_v47, %v4604_v43  ;;  %v1271_v36 = vsel %vm1259_vm6, %v1254_v22, %v4605_v33  ;;  %v4648_v16 = vpop.permute.xlu2 %4647 }
 0x134   : > { %v4650_v21 = vunpack.i.h.bf16 %v4648_v16  ;;  %v4649_v33 = vunpack.i.l.bf16 %v4648_v16 }
 0x136   : > { %v4613_v6 = vpop.permute.xlu1 %4612 }
 0x137   : > { %v4608_v30 = vpop.permute.xlu0 %4607  ;;  %v4615_v31 = vunpack.i.h.bf16 %v4613_v6  ;;  %v4614_v45 = vunpack.i.l.bf16 %v4613_v6 }
 0x138   : > { %v4610_v18 = vunpack.i.h.bf16 %v4608_v30  ;;  %v4609_v13 = vunpack.i.l.bf16 %v4608_v30 }
 0x139   : > { %v1287_v7 = vsel %vm1276_vm7, %v1270_v14, %v4614_v45  ;;  %v1288_v38 = vsel %vm1276_vm7, %v1271_v36, %v4615_v31  ;;  %v1262_v31 = vsel %vm1259_vm6, %v5696_v37, %v4649_v33  ;;  %v1263_v45 = vsel %vm1259_vm6, %v5700_v63, %v4650_v21 }
 0x13a   : > { %v1274_v25 = vsel %vm1259_vm6, %v1257_v5, %v4609_v13  ;;  %v1275_v1 = vsel %vm1259_vm6, %v1258_v17, %v4610_v18 }
 0x13b   : > { %v1291_v15 = vsel %vm1276_vm7, %v1274_v25, %v4619_v41  ;;  %v1292_v58 = vsel %vm1276_vm7, %v1275_v1, %v4620_v53  ;;  %v4663_v6 = vpop.permute.xlu2 %4662 }
 0x13c   : > { %v4665_v13 = vunpack.i.h.bf16 %v4663_v6  ;;  %v4664_v53 = vunpack.i.l.bf16 %v4663_v6 }
 0x13e   : > { %v4628_v2 = vpop.permute.xlu1 %4627 }
 0x13f   : > { %v4623_v48 = vpop.permute.xlu0 %4622  ;;  %v4630_v35 = vunpack.i.h.bf16 %v4628_v2  ;;  %v4629_v26 = vunpack.i.l.bf16 %v4628_v2 }
 0x140   : > { %v4625_v10 = vunpack.i.h.bf16 %v4623_v48  ;;  %v4624_v44 = vunpack.i.l.bf16 %v4623_v48 }
 0x141   : > { %v1308_v27 = vsel %vm1293_vm10, %v1291_v15, %v4629_v26  ;;  %v1309_v42 = vsel %vm1293_vm10, %v1292_v58, %v4630_v35 }
 0x142   : > { %v1304_v28 = vsel %vm1293_vm10, %v1287_v7, %v4624_v44  ;;  %v1305_v34 = vsel %vm1293_vm10, %v1288_v38, %v4625_v10 }
 0x143   : > { %v1321_v0 = vsel %vm1310_vm12, %v1304_v28, %v4634_v32  ;;  %v1322_v3 = vsel %vm1310_vm12, %v1305_v34, %v4635_v46  ;;  %v4678_v43 = vpop.permute.xlu2 %4677 }
 0x144   : > { %v1332_v8 = vpack.c.bf16 %v1322_v3, %v1321_v0  ;;  %v4680_v32 = vunpack.i.h.bf16 %v4678_v43  ;;  %v4679_v39 = vunpack.i.l.bf16 %v4678_v43 }
 0x146   : > { %3901 = vmatmul.msk.bf16.gmra.mxu2 %vm1353_vm2, %v1332_v8  ;;  %v4643_v12 = vpop.permute.xlu1 %4642 }
 0x147   : > { %v4638_v9 = vpop.permute.xlu0 %4637  ;;  %v4645_v23 = vunpack.i.h.bf16 %v4643_v12  ;;  %v4644_v2 = vunpack.i.l.bf16 %v4643_v12 }
 0x148   : > { %v4640_v29 = vunpack.i.h.bf16 %v4638_v9  ;;  %v4639_v19 = vunpack.i.l.bf16 %v4638_v9 }
 0x149   : > { %v1249_v28 = vsel %vm1242_vm1, %v5671_v4, %v4644_v2  ;;  %v1250_v34 = vsel %vm1242_vm1, %v5675_v20, %v4645_v23  ;;  %vm1559_vm1 = vcmask 254976  }
 0x14a   : > { %v1325_v11 = vsel %vm1310_vm12, %v1308_v27, %v4639_v19  ;;  %v1326_v24 = vsel %vm1310_vm12, %v1309_v42, %v4640_v29  ;;  %v6956_v19 = vld [vmem:[#allocation13_spill] sm:$0xff] }
 0x14b   : > { %v1334_v30 = vpack.c.bf16 %v1326_v24, %v1325_v11  ;;  %v5857_v27 = vperm.slane %v6956_v19, 0 }
 0x14d   : > { %3903 = vmatmul.msk.bf16.gmra.mxu3 %vm1353_vm2, %v1334_v30 }
 0x14e   : > { %v4658_v40 = vpop.permute.xlu1 %4657 }
 0x14f   : > { %v4653_v61 = vpop.permute.xlu0 %4652  ;;  %v4660_v47 = vunpack.i.h.bf16 %v4658_v40  ;;  %v4659_v22 = vunpack.i.l.bf16 %v4658_v40 }
 0x150   : > { %v4655_v44 = vunpack.i.h.bf16 %v4653_v61  ;;  %v4654_v7 = vunpack.i.l.bf16 %v4653_v61 }
 0x151   : > { %v1279_v36 = vsel %vm1276_vm7, %v1262_v31, %v4659_v22  ;;  %v1280_v10 = vsel %vm1276_vm7, %v1263_v45, %v4660_v47 }
 0x152   : > { %v1266_v3 = vsel %vm1259_vm6, %v1249_v28, %v4654_v7  ;;  %v1267_v41 = vsel %vm1259_vm6, %v1250_v34, %v4655_v44  ;;  %vm1882_vm6 = vcmask 1041409  }
 0x153   : > { %v1283_v25 = vsel %vm1276_vm7, %v1266_v3, %v4664_v53  ;;  %v1284_v1 = vsel %vm1276_vm7, %v1267_v41, %v4665_v13  ;;  %vm1884_vm7 = vcmask 1042434  }
 0x156   : > { %v4673_v38 = vpop.permute.xlu1 %4672 }
 0x157   : > { %v4668_v46 = vpop.permute.xlu0 %4667  ;;  %v4675_v5 = vunpack.i.h.bf16 %v4673_v38  ;;  %v4674_v17 = vunpack.i.l.bf16 %v4673_v38 }
 0x158   : > { %v4670_v48 = vunpack.i.h.bf16 %v4668_v46  ;;  %v4669_v14 = vunpack.i.l.bf16 %v4668_v46 }
 0x159   : > { %v1300_v26 = vsel %vm1293_vm10, %v1283_v25, %v4674_v17  ;;  %v1301_v20 = vsel %vm1293_vm10, %v1284_v1, %v4675_v5 }
 0x15a   : > { %v1296_v18 = vsel %vm1293_vm10, %v1279_v36, %v4669_v14  ;;  %v1297_v37 = vsel %vm1293_vm10, %v1280_v10, %v4670_v48  ;;  %vm1886_vm10 = vcmask 1043459  }
 0x15b   : > { %v1313_v63 = vsel %vm1310_vm12, %v1296_v18, %v4679_v39  ;;  %v1314_v16 = vsel %vm1310_vm12, %v1297_v37, %v4680_v32 }
 0x15c   : > { %v1328_v0 = vpack.c.bf16 %v1314_v16, %v1313_v63 }
 0x15e   : > { %3897 = vmatmul.msk.bf16.gmra.mxu0 %vm1353_vm2, %v1328_v0 }
 0x15f   : > { %v4683_v8 = vpop.permute.xlu0 %4682 }
 0x160   : > { %v4685_v35 = vunpack.i.h.bf16 %v4683_v8  ;;  %v4684_v4 = vunpack.i.l.bf16 %v4683_v8 }
 0x162   : > { %v1317_v12 = vsel %vm1310_vm12, %v1300_v26, %v4684_v4  ;;  %v1318_v9 = vsel %vm1310_vm12, %v1301_v20, %v4685_v35 }
 0x163   : > { %v1330_v15 = vpack.c.bf16 %v1318_v9, %v1317_v12 }
 0x165   : > { %3899 = vmatmul.msk.bf16.gmra.mxu1 %vm1353_vm2, %v1330_v15  ;;  %vm1890_vm2 = vcmask 1045509  }
 0x199   : > { %v1411_v58 = vpop.f32.mrf.mxu2 }
 0x19a   : > { %v1412_v42 = vadd.f32 %v1411_v58, %v5857_v27 }
 0x19c   : > { %v1439_v30 = vmax.f32 %v1412_v42, 0.0 }
 0x19e   : > { %v1487_v47 = vrot.slane %v1439_v30, 2  ;;  %v1488_v31 = vrot.slane %v1439_v30, 4  ;;  %v1489_v45 = vrot.slane %v1439_v30, 6  ;;  %v1704_v14 = vsel %vm1559_vm1, %v1439_v30, -inf }
 0x1a0   : > { %v1421_v29 = vpop.f32.mrf.mxu3  ;;  %v1713_v36 = vsel %vm1559_vm1, %v1487_v47, -inf  ;;  %v1722_v7 = vsel %vm1559_vm1, %v1488_v31, -inf  ;;  %v1731_v38 = vsel %vm1559_vm1, %v1489_v45, -inf }
 0x1a1   : > { %v1413_v11 = vpop.f32.mrf.mxu2  ;;  %v1422_v24 = vadd.f32 %v1421_v29, %v5857_v27 }
 0x1a2   : > { %v1414_v61 = vadd.f32 %v1413_v11, %v5857_v27 }
 0x1a3   : > { %v1443_v33 = vmax.f32 %v1422_v24, 0.0 }
 0x1a4   : > { %v1440_v22 = vmax.f32 %v1414_v61, 0.0 }
 0x1a5   : > { %v1499_v32 = vrot.slane %v1443_v33, 2  ;;  %v1500_v23 = vrot.slane %v1443_v33, 4  ;;  %v1501_v2 = vrot.slane %v1443_v33, 6  ;;  %v5870_v63 = vsel %vm1559_vm1, %v1443_v33, -inf }
 0x1a6   : > { %v1490_v10 = vrot.slane %v1440_v22, 2  ;;  %v1491_v44 = vrot.slane %v1440_v22, 4  ;;  %v1492_v18 = vrot.slane %v1440_v22, 6  ;;  %v5876_v28 = vsel %vm1559_vm1, %v1440_v22, -inf }
 0x1a7   : > { %v5873_v16 = vsel %vm1559_vm1, %v1499_v32, -inf  ;;  %v5879_v53 = vsel %vm1559_vm1, %v1500_v23, -inf  ;;  %v5882_v0 = vsel %vm1559_vm1, %v1501_v2, -inf }
 0x1a8   : > { %v1423_v40 = vpop.f32.mrf.mxu3  ;;  %v5885_v17 = vsel %vm1559_vm1, %v1490_v10, -inf  ;;  %v5888_v8 = vsel %vm1559_vm1, %v1491_v44, -inf  ;;  %v5892_v35 = vsel %vm1559_vm1, %v1492_v18, -inf }
 0x1a9   : > { %v1391_v6 = vpop.f32.mrf.mxu0  ;;  %v1424_v43 = vadd.f32 %v1423_v40, %v5857_v27 }
 0x1aa   : > { %v1392_v46 = vadd.f32 %v1391_v6, %v5857_v27 }
 0x1ab   : > { %v1401_v21 = vpop.f32.mrf.mxu1  ;;  %v1444_v48 = vmax.f32 %v1424_v43, 0.0 }
 0x1ac   : > { %v1402_v39 = vadd.f32 %v1401_v21, %v5857_v27  ;;  %v1431_v37 = vmax.f32 %v1392_v46, 0.0 }
 0x1ad   : > { %v1502_v3 = vrot.slane %v1444_v48, 2  ;;  %v1503_v41 = vrot.slane %v1444_v48, 4  ;;  %v1504_v25 = vrot.slane %v1444_v48, 6  ;;  %v5896_v19 = vsel %vm1559_vm1, %v1444_v48, -inf }
 0x1ae   : > { %v1435_v34 = vmax.f32 %v1402_v39, 0.0  ;;  %v1463_v4 = vrot.slane %v1431_v37, 2  ;;  %v1464_v26 = vrot.slane %v1431_v37, 4  ;;  %v1465_v20 = vrot.slane %v1431_v37, 6 }
 0x1af   : > { %v5899_v42 = vsel %vm1559_vm1, %v1502_v3, -inf  ;;  %v5902_v11 = vsel %vm1559_vm1, %v1503_v41, -inf  ;;  %v5906_v6 = vsel %vm1559_vm1, %v1504_v25, -inf  ;;  %v5909_v30 = vsel %vm1559_vm1, %v1431_v37, -inf }
 0x1b0   : > { %v1475_v12 = vrot.slane %v1435_v34, 2  ;;  %v1476_v9 = vrot.slane %v1435_v34, 4  ;;  %v1477_v15 = vrot.slane %v1435_v34, 6  ;;  %v5912_v61 = vsel %vm1559_vm1, %v1435_v34, -inf }
 0x1b1   : > { %v1393_v13 = vpop.f32.mrf.mxu0  ;;  %v5917_v21 = vsel %vm1559_vm1, %v1463_v4, -inf  ;;  %v5920_v33 = vsel %vm1559_vm1, %v1464_v26, -inf  ;;  %v5923_v43 = vsel %vm1559_vm1, %v1465_v20, -inf }
 0x1b2   : > { %v1394_v1 = vadd.f32 %v1393_v13, %v5857_v27  ;;  %v5926_v22 = vsel %vm1559_vm1, %v1475_v12, -inf  ;;  %v5929_v31 = vsel %vm1559_vm1, %v1476_v9, -inf  ;;  %v5932_v45 = vsel %vm1559_vm1, %v1477_v15, -inf }
 0x1b3   : > { %v1403_v5 = vpop.f32.mrf.mxu1 }
 0x1b4   : > { %v1404_v58 = vadd.f32 %v1403_v5, %v5857_v27  ;;  %v5914_v40 = vmax.f32 %v1394_v1, 0.0 }
 0x1b6   : > { %v5934_v46 = vmax.f32 %v1404_v58, 0.0  ;;  %v5942_v37 = vsel %vm1559_vm1, %v5914_v40, -inf }
 0x1c9   : > { %v1416_v29 = vpop.f32.mrf.mxu2 }
 0x1ca   : > { %v1417_v24 = vadd.f32 %v1416_v29, %v5857_v27 }
 0x1cc   : > { %v1441_v47 = vmax.f32 %v1417_v24, 0.0 }
 0x1ce   : > { %v1493_v32 = vrot.slane %v1441_v47, 2  ;;  %v1494_v39 = vrot.slane %v1441_v47, 4  ;;  %v1495_v23 = vrot.slane %v1441_v47, 6  ;;  %v1705_v2 = vsel %vm1559_vm1, %v1441_v47, -inf }
 0x1cf   : > { %v1706_v18 = vmax.f32 %v1704_v14, %v1705_v2 }
 0x1d0   : > { %v1714_v13 = vsel %vm1559_vm1, %v1493_v32, -inf  ;;  %v1723_v34 = vsel %vm1559_vm1, %v1494_v39, -inf  ;;  %v1732_v3 = vsel %vm1559_vm1, %v1495_v23, -inf  ;;  %v1426_v41 = vpop.f32.mrf.mxu3 }
 0x1d1   : > { %v1707_v5 = vrot.slane %v1706_v18, 4  ;;  %v1715_v25 = vmax.f32 %v1713_v36, %v1714_v13  ;;  %v1724_v1 = vmax.f32 %v1722_v7, %v1723_v34  ;;  %v1733_v4 = vmax.f32 %v1731_v38, %v1732_v3  ;;  %v1418_v26 = vpop.f32.mrf.mxu2 }
 0x1d2   : > { %v1427_v12 = vadd.f32 %v1426_v41, %v5857_v27  ;;  %v1419_v9 = vadd.f32 %v1418_v26, %v5857_v27 }
 0x1d3   : > { %v1708_v15 = vmax.f32 %v1706_v18, %v1707_v5  ;;  %v1716_v58 = vrot.slane %v1715_v25, 4  ;;  %v1725_v29 = vrot.slane %v1724_v1, 4  ;;  %v1734_v24 = vrot.slane %v1733_v4, 4 }
 0x1d4   : > { %v1445_v32 = vmax.f32 %v1427_v12, 0.0  ;;  %v5952_v36 = vmax.f32 %v1419_v9, 0.0 }
 0x1d5   : > { %v1709_v7 = vrot.slane %v1708_v15, 2  ;;  %v1717_v38 = vmax.f32 %v1715_v25, %v1716_v58  ;;  %v1726_v39 = vmax.f32 %v1724_v1, %v1725_v29  ;;  %v1735_v23 = vmax.f32 %v1733_v4, %v1734_v24 }
 0x1d6   : > { %v1505_v2 = vrot.slane %v1445_v32, 2  ;;  %v1506_v13 = vrot.slane %v1445_v32, 4  ;;  %v1507_v34 = vrot.slane %v1445_v32, 6  ;;  %v1777_v18 = vsel %vm1559_vm1, %v1445_v32, -inf }
 0x1d7   : > { %v1710_v3 = vmax.f32 %v1708_v15, %v1709_v7  ;;  %v1718_v41 = vrot.slane %v1717_v38, 2  ;;  %v1727_v5 = vrot.slane %v1726_v39, 2  ;;  %v1736_v26 = vrot.slane %v1735_v23, 2 }
 0x1d8   : > { %v1778_v47 = vmax.f32 %v5870_v63, %v1777_v18  ;;  %v1786_v12 = vsel %vm1559_vm1, %v1505_v2, -inf  ;;  %v1795_v9 = vsel %vm1559_vm1, %v1506_v13, -inf  ;;  %v1804_v25 = vsel %vm1559_vm1, %v1507_v34, -inf }
 0x1d9   : > { %v1711_v1 = vrot.slane %v1710_v3, 1  ;;  %v1719_v4 = vmax.f32 %v1717_v38, %v1718_v41  ;;  %v1728_v58 = vmax.f32 %v1726_v39, %v1727_v5  ;;  %v1737_v29 = vmax.f32 %v1735_v23, %v1736_v26 }
 0x1da   : > { %v1779_v24 = vrot.slane %v1778_v47, 4  ;;  %v1787_v14 = vmax.f32 %v5873_v16, %v1786_v12  ;;  %v1796_v15 = vmax.f32 %v5879_v53, %v1795_v9  ;;  %v1805_v32 = vmax.f32 %v5882_v0, %v1804_v25 }
 0x1db   : > { %v1712_v7 = vmax.f32 %v1710_v3, %v1711_v1  ;;  %v1720_v20 = vrot.slane %v1719_v4, 1  ;;  %v1729_v63 = vrot.slane %v1728_v58, 1  ;;  %v1738_v18 = vrot.slane %v1737_v29, 1 }
 0x1dc   : > { %v1780_v2 = vmax.f32 %v1778_v47, %v1779_v24  ;;  %v1788_v44 = vrot.slane %v1787_v14, 4  ;;  %v1797_v13 = vrot.slane %v1796_v15, 4  ;;  %v1806_v10 = vrot.slane %v1805_v32, 4 }
 0x1dd   : > { %v1721_v34 = vmax.f32 %v1719_v4, %v1720_v20  ;;  %v1730_v48 = vmax.f32 %v1728_v58, %v1729_v63  ;;  %v1739_v38 = vmax.f32 %v1737_v29, %v1738_v18  ;;  %v1496_v39 = vrot.slane %v5952_v36, 2 }
 0x1de   : > { %v1781_v23 = vrot.slane %v1780_v2, 2  ;;  %v1789_v41 = vmax.f32 %v1787_v14, %v1788_v44  ;;  %v1798_v16 = vmax.f32 %v1796_v15, %v1797_v13  ;;  %v1807_v5 = vmax.f32 %v1805_v32, %v1806_v10  ;;  %v1428_v32 = vpop.f32.mrf.mxu3 }
 0x1df   : > { %v1903_v53 = vsel %vm1882_vm6, %v1721_v34, %v1712_v7  ;;  %v1497_v0 = vrot.slane %v5952_v36, 4  ;;  %v1498_v3 = vrot.slane %v5952_v36, 6  ;;  %v1741_v47 = vsel %vm1559_vm1, %v5952_v36, -inf }
 0x1e0   : > { %v1904_v26 = vsel %vm1884_vm7, %v1730_v48, %v1903_v53  ;;  %v1782_v20 = vmax.f32 %v1780_v2, %v1781_v23  ;;  %v1790_v12 = vrot.slane %v1789_v41, 2  ;;  %v1799_v9 = vrot.slane %v1798_v16, 2 }
 0x1e1   : > { %v5970_v25 = vsel %vm1886_vm10, %v1739_v38, %v1904_v26  ;;  %v1808_v44 = vrot.slane %v1807_v5, 2  ;;  %v1742_v10 = vmax.f32 %v5876_v28, %v1741_v47  ;;  %v1750_v14 = vsel %vm1559_vm1, %v1496_v39, -inf }
 0x1e2   : > { %v1783_v1 = vrot.slane %v1782_v20, 1  ;;  %v1791_v4 = vmax.f32 %v1789_v41, %v1790_v12  ;;  %v1800_v58 = vmax.f32 %v1798_v16, %v1799_v9  ;;  %v1751_v29 = vmax.f32 %v5885_v17, %v1750_v14  ;;  %v1396_v17 = vpop.f32.mrf.mxu0 }
 0x1e3   : > { %v1809_v24 = vmax.f32 %v1807_v5, %v1808_v44  ;;  %v1743_v36 = vrot.slane %v1742_v10, 4  ;;  %v1759_v48 = vsel %vm1559_vm1, %v1497_v0, -inf  ;;  %v1768_v15 = vsel %vm1559_vm1, %v1498_v3, -inf }
 0x1e4   : > { %v1784_v7 = vmax.f32 %v1782_v20, %v1783_v1  ;;  %v1792_v63 = vrot.slane %v1791_v4, 1  ;;  %v1801_v18 = vrot.slane %v1800_v58, 1  ;;  %v1752_v2 = vrot.slane %v1751_v29, 4 }
 0x1e5   : > { %v1810_v28 = vrot.slane %v1809_v24, 1  ;;  %v1744_v13 = vmax.f32 %v1742_v10, %v1743_v36  ;;  %v1760_v34 = vmax.f32 %v5888_v8, %v1759_v48  ;;  %v1769_v38 = vmax.f32 %v5892_v35, %v1768_v15 }
 0x1e6   : > { %v1793_v39 = vmax.f32 %v1791_v4, %v1792_v63  ;;  %v1802_v23 = vmax.f32 %v1800_v58, %v1801_v18  ;;  %v1753_v41 = vmax.f32 %v1751_v29, %v1752_v2  ;;  %v1429_v16 = vadd.f32 %v1428_v32, %v5857_v27 }
 0x1e7   : > { %v1811_v5 = vmax.f32 %v1809_v24, %v1810_v28  ;;  %v1745_v53 = vrot.slane %v1744_v13, 2  ;;  %v1761_v0 = vrot.slane %v1760_v34, 4  ;;  %v1770_v3 = vrot.slane %v1769_v38, 4 }
 0x1e8   : > { %v1910_v47 = vsel %vm1882_vm6, %v1793_v39, %v1784_v7  ;;  %v1754_v26 = vrot.slane %v1753_v41, 2  ;;  %v1446_v20 = vmax.f32 %v1429_v16, 0.0  ;;  %v1397_v8 = vadd.f32 %v1396_v17, %v5857_v27 }
 0x1e9   : > { %v1911_v35 = vsel %vm1884_vm7, %v1802_v23, %v1910_v47  ;;  %v1746_v12 = vmax.f32 %v1744_v13, %v1745_v53  ;;  %v1762_v9 = vmax.f32 %v1760_v34, %v1761_v0  ;;  %v1771_v44 = vmax.f32 %v1769_v38, %v1770_v3 }
 0x1ea   : > { %v5984_v10 = vsel %vm1886_vm10, %v1811_v5, %v1911_v35  ;;  %v1755_v14 = vmax.f32 %v1753_v41, %v1754_v26  ;;  %v1508_v1 = vrot.slane %v1446_v20, 2  ;;  %v1509_v4 = vrot.slane %v1446_v20, 4  ;;  %v1406_v5 = vpop.f32.mrf.mxu1 }
 0x1eb   : > { %v1747_v58 = vrot.slane %v1746_v12, 1  ;;  %v1763_v29 = vrot.slane %v1762_v9, 2  ;;  %v1772_v24 = vrot.slane %v1771_v44, 2  ;;  %v1510_v36 = vrot.slane %v1446_v20, 6 }
 0x1ec   : > { %v1756_v48 = vrot.slane %v1755_v14, 1  ;;  %v1813_v15 = vsel %vm1559_vm1, %v1446_v20, -inf  ;;  %v1822_v32 = vsel %vm1559_vm1, %v1508_v1, -inf  ;;  %v1831_v7 = vsel %vm1559_vm1, %v1509_v4, -inf }
 0x1ed   : > { %v1748_v63 = vmax.f32 %v1746_v12, %v1747_v58  ;;  %v1764_v18 = vmax.f32 %v1762_v9, %v1763_v29  ;;  %v1773_v2 = vmax.f32 %v1771_v44, %v1772_v24  ;;  %v1814_v28 = vmax.f32 %v5896_v19, %v1813_v15 }
 0x1ee   : > { %v1757_v13 = vmax.f32 %v1755_v14, %v1756_v48  ;;  %v1823_v34 = vmax.f32 %v5899_v42, %v1822_v32  ;;  %v1832_v38 = vmax.f32 %v5902_v11, %v1831_v7  ;;  %v1840_v17 = vsel %vm1559_vm1, %v1510_v36, -inf }
 0x1ef   : > { %v1765_v39 = vrot.slane %v1764_v18, 1  ;;  %v1774_v23 = vrot.slane %v1773_v2, 1  ;;  %v1906_v41 = vsel %vm1888_vm14, %v1748_v63, %v5970_v25  ;;  %v1815_v16 = vrot.slane %v1814_v28, 4 }
 0x1f0   : > { %v1907_v53 = vsel %vm1890_vm2, %v1757_v13, %v1906_v41  ;;  %v1824_v0 = vrot.slane %v1823_v34, 4  ;;  %v1833_v3 = vrot.slane %v1832_v38, 4  ;;  %v1841_v19 = vmax.f32 %v5906_v6, %v1840_v17 }
 0x1f1   : > { %v1766_v47 = vmax.f32 %v1764_v18, %v1765_v39  ;;  %v1775_v42 = vmax.f32 %v1773_v2, %v1774_v23  ;;  %v1816_v26 = vmax.f32 %v1814_v28, %v1815_v16  ;;  %v1433_v11 = vmax.f32 %v1397_v8, 0.0 }
 0x1f2   : > { %v1825_v20 = vmax.f32 %v1823_v34, %v1824_v0  ;;  %v1834_v35 = vmax.f32 %v1832_v38, %v1833_v3  ;;  %v1842_v12 = vrot.slane %v1841_v19, 4  ;;  %v1407_v9 = vadd.f32 %v1406_v5, %v5857_v27 }
 0x1f3   : > { %v1908_v25 = vsel %vm6838_vm4, %v1766_v47, %v1907_v53  ;;  %v1817_v44 = vrot.slane %v1816_v26, 2  ;;  %v1469_v14 = vrot.slane %v1433_v11, 2  ;;  %v1470_v1 = vrot.slane %v1433_v11, 4 }
 0x1f4   : > { %v1909_v4 = vsel %vm6837_vm15, %v1775_v42, %v1908_v25  ;;  %v1826_v58 = vrot.slane %v1825_v20, 2  ;;  %v1835_v29 = vrot.slane %v1834_v35, 2  ;;  %v1843_v24 = vmax.f32 %v1841_v19, %v1842_v12 }
 0x1f5   : > { %3907 = vst.msk [vmem:[%s6001_s25 + $0x19] sm:$0xff] %vm1310_vm12, %v1909_v4  ;;  %v1818_v6 = vmax.f32 %v1816_v26, %v1817_v44  ;;  %v1471_v8 = vrot.slane %v1433_v11, 6  ;;  %v1561_v36 = vsel %vm1559_vm1, %v1433_v11, -inf  ;;  %v1570_v48 = vsel %vm1559_vm1, %v1469_v14, -inf }
 0x1f6   : > { %v1827_v15 = vmax.f32 %v1825_v20, %v1826_v58  ;;  %v1836_v32 = vmax.f32 %v1834_v35, %v1835_v29  ;;  %v1844_v7 = vrot.slane %v1843_v24, 2  ;;  %v1562_v63 = vmax.f32 %v5909_v30, %v1561_v36 }
 0x1f7   : > { %v1819_v18 = vrot.slane %v1818_v6, 1  ;;  %v1571_v2 = vmax.f32 %v5917_v21, %v1570_v48  ;;  %v1579_v28 = vsel %vm1559_vm1, %v1470_v1, -inf  ;;  %v1588_v13 = vsel %vm1559_vm1, %v1471_v8, -inf }
 0x1f8   : > { %v1828_v34 = vrot.slane %v1827_v15, 1  ;;  %v1837_v38 = vrot.slane %v1836_v32, 1  ;;  %v1845_v17 = vmax.f32 %v1843_v24, %v1844_v7  ;;  %v1563_v39 = vrot.slane %v1562_v63, 4 }
 0x1f9   : > { %v1820_v23 = vmax.f32 %v1818_v6, %v1819_v18  ;;  %v1572_v41 = vrot.slane %v1571_v2, 4  ;;  %v1580_v16 = vmax.f32 %v5920_v33, %v1579_v28  ;;  %v1589_v5 = vmax.f32 %v5923_v43, %v1588_v13 }
 0x1fa   : > { %v1829_v53 = vmax.f32 %v1827_v15, %v1828_v34  ;;  %v1838_v0 = vmax.f32 %v1836_v32, %v1837_v38  ;;  %v1846_v30 = vrot.slane %v1845_v17, 1  ;;  %v1564_v3 = vmax.f32 %v1562_v63, %v1563_v39  ;;  %v1398_v63 = vpop.f32.mrf.mxu0 }
 0x1fb   : > { %v1913_v21 = vsel %vm1888_vm14, %v1820_v23, %v5984_v10  ;;  %v1573_v19 = vmax.f32 %v1571_v2, %v1572_v41  ;;  %v1581_v47 = vrot.slane %v1580_v16, 4  ;;  %v1590_v42 = vrot.slane %v1589_v5, 4 }
 0x1fc   : > { %v1847_v26 = vmax.f32 %v1845_v17, %v1846_v30  ;;  %v1914_v11 = vsel %vm1890_vm2, %v1829_v53, %v1913_v21  ;;  %v1565_v20 = vrot.slane %v1564_v3, 2  ;;  %v1437_v35 = vmax.f32 %v1407_v9, 0.0 }
 0x1fd   : > { %v1915_v33 = vsel %vm6838_vm4, %v1838_v0, %v1914_v11  ;;  %v1574_v12 = vrot.slane %v1573_v19, 2  ;;  %v1582_v43 = vmax.f32 %v1580_v16, %v1581_v47  ;;  %v1591_v25 = vmax.f32 %v1589_v5, %v1590_v42 }
 0x1fe   : > { %v1916_v44 = vsel %vm6837_vm15, %v1847_v26, %v1915_v33  ;;  %v1566_v14 = vmax.f32 %v1564_v3, %v1565_v20  ;;  %v1481_v1 = vrot.slane %v1437_v35, 2  ;;  %v1482_v4 = vrot.slane %v1437_v35, 4 }
 0x1ff   : > { %v6020_v10 = vsel %vm1559_vm1, %v5934_v46, -inf  ;;  %3908 = vst.msk [vmem:[%s6001_s25 + $0x21] sm:$0xff] %vm1310_vm12, %v1916_v44  ;;  %v1575_v58 = vmax.f32 %v1573_v19, %v1574_v12  ;;  %v1583_v29 = vrot.slane %v1582_v43, 2  ;;  %v1483_v24 = vrot.slane %v1437_v35, 6  ;;  %v1408_v44 = vpop.f32.mrf.mxu1 }
 0x200   : > { %v1592_v9 = vrot.slane %v1591_v25, 2  ;;  %v1633_v6 = vsel %vm1559_vm1, %v1437_v35, -inf  ;;  %v1642_v8 = vsel %vm1559_vm1, %v1481_v1, -inf  ;;  %v1651_v36 = vsel %vm1559_vm1, %v1482_v4, -inf }
 0x201   : > { %v1567_v48 = vrot.slane %v1566_v14, 1  ;;  %v1576_v15 = vrot.slane %v1575_v58, 1  ;;  %v1584_v32 = vmax.f32 %v1582_v43, %v1583_v29  ;;  %v1634_v7 = vmax.f32 %v5912_v61, %v1633_v6 }
 0x202   : > { %v6957_v18 = vrot.slane %v5914_v40, 2  ;;  %v1643_v28 = vmax.f32 %v5926_v22, %v1642_v8  ;;  %v1652_v13 = vmax.f32 %v5929_v31, %v1651_v36  ;;  %v1660_v34 = vsel %vm1559_vm1, %v1483_v24, -inf }
 0x203   : > { %v6958_v38 = vrot.slane %v5914_v40, 4  ;;  %v1577_v39 = vmax.f32 %v1575_v58, %v1576_v15  ;;  %v1585_v23 = vrot.slane %v1584_v32, 1  ;;  %v1635_v41 = vrot.slane %v1634_v7, 4 }
 0x204   : > { %v1605_v2 = vsel %vm1559_vm1, %v6957_v18, -inf  ;;  %v1644_v16 = vrot.slane %v1643_v28, 4  ;;  %v1653_v61 = vrot.slane %v1652_v13, 4  ;;  %v1661_v5 = vmax.f32 %v5932_v45, %v1660_v34 }
 0x205   : > { %v1614_v17 = vsel %vm1559_vm1, %v6958_v38, -inf  ;;  %v1399_v53 = vadd.f32 %v1398_v63, %v5857_v27  ;;  %v6959_v0 = vrot.slane %v5914_v40, 6  ;;  %v1568_v31 = vmax.f32 %v1566_v14, %v1567_v48 }
 0x206   : > { %v1593_v30 = vmax.f32 %v1591_v25, %v1592_v9  ;;  %v1636_v3 = vmax.f32 %v1634_v7, %v1635_v41  ;;  %v1645_v21 = vmax.f32 %v1643_v28, %v1644_v16  ;;  %v1654_v19 = vmax.f32 %v1652_v13, %v1653_v61 }
 0x207   : > { %v1623_v22 = vsel %vm1559_vm1, %v6959_v0, -inf  ;;  %v1662_v47 = vrot.slane %v1661_v5, 4  ;;  %v1434_v42 = vmax.f32 %v1399_v53, 0.0  ;;  %v6960_v26 = vrot.slane %v5934_v46, 2 }
 0x208   : > { %v6961_v20 = vrot.slane %v5934_v46, 4  ;;  %v1586_v35 = vmax.f32 %v1584_v32, %v1585_v23  ;;  %v1637_v33 = vrot.slane %v1636_v3, 2  ;;  %v1883_v40 = vsel %vm1882_vm6, %v1577_v39, %v1568_v31 }
 0x209   : > { %v1677_v11 = vsel %vm1559_vm1, %v6960_v26, -inf  ;;  %v1646_v12 = vrot.slane %v1645_v21, 2  ;;  %v1655_v43 = vrot.slane %v1654_v19, 2  ;;  %v1663_v25 = vmax.f32 %v1661_v5, %v1662_v47 }
 0x20a   : > { %v1686_v45 = vsel %vm1559_vm1, %v6961_v20, -inf  ;;  %v1638_v14 = vmax.f32 %v1636_v3, %v1637_v33  ;;  %v1472_v1 = vrot.slane %v1434_v42, 2  ;;  %v1473_v4 = vrot.slane %v1434_v42, 4 }
 0x20b   : > { %v1474_v58 = vrot.slane %v1434_v42, 6  ;;  %v1594_v29 = vrot.slane %v1593_v30, 1  ;;  %v1647_v24 = vmax.f32 %v1645_v21, %v1646_v12  ;;  %v1656_v9 = vmax.f32 %v1654_v19, %v1655_v43 }
 0x20c   : > { %v1597_v6 = vsel %vm1559_vm1, %v1434_v42, -inf  ;;  %v1606_v36 = vsel %vm1559_vm1, %v1472_v1, -inf  ;;  %v1615_v48 = vsel %vm1559_vm1, %v1473_v4, -inf  ;;  %v1409_v15 = vadd.f32 %v1408_v44, %v5857_v27 }
 0x20d   : > { %v1598_v8 = vmax.f32 %v5942_v37, %v1597_v6  ;;  %v1885_v32 = vsel %vm1884_vm7, %v1586_v35, %v1883_v40  ;;  %v1639_v7 = vrot.slane %v1638_v14, 1  ;;  %v1664_v63 = vrot.slane %v1663_v25, 2 }
 0x20e   : > { %v1607_v18 = vmax.f32 %v1605_v2, %v1606_v36  ;;  %v1648_v28 = vrot.slane %v1647_v24, 1  ;;  %v1616_v34 = vmax.f32 %v1614_v17, %v1615_v48  ;;  %v1624_v38 = vsel %vm1559_vm1, %v1474_v58, -inf }
 0x20f   : > { %v1599_v13 = vrot.slane %v1598_v8, 4  ;;  %v6962_v39 = vrot.slane %v5934_v46, 6  ;;  %v1595_v23 = vmax.f32 %v1593_v30, %v1594_v29  ;;  %v1657_v41 = vrot.slane %v1656_v9, 1 }
 0x210   : > { %v1608_v16 = vrot.slane %v1607_v18, 4  ;;  %v1617_v5 = vrot.slane %v1616_v34, 4  ;;  %v1625_v27 = vmax.f32 %v1623_v22, %v1624_v38  ;;  %v1438_v53 = vmax.f32 %v1409_v15, 0.0 }
 0x211   : > { %v1695_v37 = vsel %vm1559_vm1, %v6962_v39, -inf  ;;  %v1600_v61 = vmax.f32 %v1598_v8, %v1599_v13  ;;  %v1887_v0 = vsel %vm1886_vm10, %v1595_v23, %v1885_v32  ;;  %v1640_v31 = vmax.f32 %v1638_v14, %v1639_v7 }
 0x212   : > { %v1665_v2 = vmax.f32 %v1663_v25, %v1664_v63  ;;  %v1609_v3 = vmax.f32 %v1607_v18, %v1608_v16  ;;  %v1649_v21 = vmax.f32 %v1647_v24, %v1648_v28  ;;  %v1618_v19 = vmax.f32 %v1616_v34, %v1617_v5 }
 0x213   : > { %v1601_v17 = vrot.slane %v1600_v61, 2  ;;  %v1626_v47 = vrot.slane %v1625_v27, 4  ;;  %v1658_v42 = vmax.f32 %v1656_v9, %v1657_v41  ;;  %v1484_v26 = vrot.slane %v1438_v53, 2 }
 0x214   : > { %v1610_v46 = vrot.slane %v1609_v3, 2  ;;  %v1485_v20 = vrot.slane %v1438_v53, 4  ;;  %v1619_v35 = vrot.slane %v1618_v19, 2  ;;  %v1486_v40 = vrot.slane %v1438_v53, 6 }
 0x215   : > { %v1602_v30 = vmax.f32 %v1600_v61, %v1601_v17  ;;  %v1627_v33 = vmax.f32 %v1625_v27, %v1626_v47  ;;  %v1669_v22 = vsel %vm1559_vm1, %v1438_v53, -inf  ;;  %v1678_v43 = vsel %vm1559_vm1, %v1484_v26, -inf }
 0x216   : > { %v1611_v12 = vmax.f32 %v1609_v3, %v1610_v46  ;;  %v1687_v25 = vsel %vm1559_vm1, %v1485_v20, -inf  ;;  %v1620_v14 = vmax.f32 %v1618_v19, %v1619_v35  ;;  %v1670_v4 = vmax.f32 %v6020_v10, %v1669_v22 }
 0x217   : > { %v1603_v44 = vrot.slane %v1602_v30, 1  ;;  %v1628_v1 = vrot.slane %v1627_v33, 2  ;;  %v1679_v29 = vmax.f32 %v1677_v11, %v1678_v43  ;;  %v1688_v24 = vmax.f32 %v1686_v45, %v1687_v25 }
 0x218   : > { %v1612_v58 = vrot.slane %v1611_v12, 1  ;;  %v1696_v9 = vsel %vm1559_vm1, %v1486_v40, -inf  ;;  %v1621_v8 = vrot.slane %v1620_v14, 1  ;;  %v1671_v48 = vrot.slane %v1670_v4, 4 }
 0x219   : > { %v1604_v6 = vmax.f32 %v1602_v30, %v1603_v44  ;;  %v1629_v36 = vmax.f32 %v1627_v33, %v1628_v1  ;;  %v1680_v32 = vrot.slane %v1679_v29, 4  ;;  %v1689_v7 = vrot.slane %v1688_v24, 4 }
 0x21a   : > { %v1613_v15 = vmax.f32 %v1611_v12, %v1612_v58  ;;  %v1697_v63 = vmax.f32 %v1695_v37, %v1696_v9  ;;  %v1622_v18 = vmax.f32 %v1620_v14, %v1621_v8  ;;  %v1672_v34 = vmax.f32 %v1670_v4, %v1671_v48  ;;  %v6964_v14 = vld [vmem:[#allocation14_spill] sm:$0xff] (%p418_p0)  ;;  %v6965_v4 = vld [vmem:[#allocation9_spill] sm:$0xff] (%p418_p0) }
 0x21b   : > { %v1630_v28 = vrot.slane %v1629_v36, 1  ;;  %v1889_v13 = vsel %vm1888_vm14, %v1604_v6, %v1887_v0  ;;  %v1681_v11 = vmax.f32 %v1679_v29, %v1680_v32  ;;  %v1690_v45 = vmax.f32 %v1688_v24, %v1689_v7  ;;  %v6966_v29 = vld [vmem:[#allocation15_spill] sm:$0xff] (%p418_p0) }
 0x21c   : > { %v1891_v10 = vsel %vm1890_vm2, %v1613_v15, %v1889_v13  ;;  %v1698_v38 = vrot.slane %v1697_v63, 4  ;;  %v1666_v39 = vrot.slane %v1665_v2, 1  ;;  %v1673_v16 = vrot.slane %v1672_v34, 2  ;;  %v6977_v15 = vld [vmem:[#allocation16_spill] sm:$0xff] (%p418_p0) }
 0x21d   : > { %v1631_v23 = vmax.f32 %v1629_v36, %v1630_v28  ;;  %v1893_v41 = vsel %vm6838_vm4, %v1622_v18, %v1891_v10  ;;  %v1896_v61 = vsel %vm1882_vm6, %v1649_v21, %v1640_v31  ;;  %v1682_v5 = vrot.slane %v1681_v11, 2 }
 0x21e   : > { %v1691_v37 = vrot.slane %v1690_v45, 2  ;;  %v1699_v27 = vmax.f32 %v1697_v63, %v1698_v38  ;;  %v1674_v0 = vmax.f32 %v1672_v34, %v1673_v16  ;;  %v1897_v47 = vsel %vm1884_vm7, %v1658_v42, %v1896_v61 }
 0x21f   : > { %v1895_v53 = vsel %vm6837_vm15, %v1631_v23, %v1893_v41  ;;  %v1683_v3 = vmax.f32 %v1681_v11, %v1682_v5  ;;  %v1667_v26 = vmax.f32 %v1665_v2, %v1666_v39  ;;  %v6963_v2 = vmov (%p418_p0), 0.0  }
 0x220   : > { %3905 = vst.msk [vmem:[%s6001_s25 + $0x9] sm:$0xff] %vm1310_vm12, %v1895_v53  ;;  %v1692_v17 = vmax.f32 %v1690_v45, %v1691_v37  ;;  %v1700_v19 = vrot.slane %v1699_v27, 2  ;;  %v1675_v46 = vrot.slane %v1674_v0, 1  ;;  %vm1928_vm1 = vcmask (%p418_p0), 253952  }
 0x221   : > { %v1684_v20 = vrot.slane %v1683_v3, 1  ;;  %v1898_v21 = vsel %vm1886_vm10, %v1667_v26, %v1897_v47  ;;  %v1943_v1 = vand.u32 (%p418_p0), 7, %v6964_v14  ;;  %v1936_v58 = vand.u32 (%p418_p0), 7, %v6965_v4 }
 0x222   : > { %v1693_v30 = vrot.slane %v1692_v17, 1  ;;  %v1701_v35 = vmax.f32 %v1699_v27, %v1700_v19  ;;  %v1676_v31 = vmax.f32 %v1674_v0, %v1675_v46  ;;  %v1950_v24 = vand.u32 (%p418_p0), 7, %v6966_v29 }
 0x223   : > { %v1685_v33 = vmax.f32 %v1683_v3, %v1684_v20  ;;  %vm6096_vm0 = vcmp.le.s32.totalorder (%p418_p0), %v1936_v58, 6  ;;  %vm6100_vm3 = vcmp.le.s32.totalorder (%p418_p0), %v1943_v1, 6  ;;  %vm6108_vm5 = vcmp.ge.s32.totalorder (%p418_p0), %v1943_v1, 1 }
 0x224   : > { %v1694_v40 = vmax.f32 %v1692_v17, %v1693_v30  ;;  %v1702_v12 = vrot.slane %v1701_v35, 1  ;;  %v1899_v22 = vsel %vm1888_vm14, %v1676_v31, %v1898_v21  ;;  %vm6125_vm8 = vcmp.ge.s32.totalorder (%p418_p0), %v1936_v58, 1  ;;  %v6982_v31 = vld [vmem:[#allocation17_spill] sm:$0xff] (%p418_p0) }
 0x225   : > { %v1900_v25 = vsel %vm1890_vm2, %v1685_v33, %v1899_v22  ;;  %420 = sbr.rel (!%p418_p0) target bundleno = 58 (0x3a), region = 73  ;;  %v1957_v32 = vand.u32 (%p418_p0), 7, %v6977_v15  ;;  %vm6156_vm9 = vcmp.le.s32.totalorder (%p418_p0), %v1950_v24, 6  ;;  %v1964_v21 = vand.u32 (%p418_p0), 7, %v6982_v31  ;;  %v6983_v33 = vld [vmem:[#allocation18_spill] sm:$0xff] (%p418_p0) }
 0x226   : > { %v1703_v43 = vmax.f32 %v1701_v35, %v1702_v12  ;;  %v1901_v44 = vsel %vm6838_vm4, %v1694_v40, %v1900_v25  ;;  %v1971_v40 = vand.u32 (%p418_p0), 7, %v6983_v33 }
 0x227   :  { %vm6160_vm11 = vcmp.le.s32.totalorder (%p418_p0), %v1957_v32, 6  ;;  %vm6192_vm13 = vcmp.le.s32.totalorder (%p418_p0), %v1964_v21, 6 }
 0x228   : > { %v1902_v42 = vsel %vm6837_vm15, %v1703_v43, %v1901_v44  ;;  %vm6090_vm15 = vcmp.ge.s32.totalorder (%p418_p0), %v1950_v24, 1 }
 0x229   : > { %3906 = vst.msk [vmem:[%s6001_s25 + $0x11] sm:$0xff] %vm1310_vm12, %v1902_v42 }
 0x22a   :  { %1927 = vst.msk [vmem:[#allocation3] sm:$0xff] %vm1310_vm12, %v6963_v2 }
 0x22b   :  { %1929 = vst.msk [vmem:[#allocation3 + $0x8] sm:$0x1] %vm1928_vm1, %v6963_v2 }
 0x22c   :  { %1931 = vst.msk [vmem:[#allocation3 + $0x51] sm:$0x1] %vm1928_vm1, %v6963_v2  ;;  %vm6196_vm1 = vcmp.le.s32.totalorder %v1971_v40, 6 }
 0x22d   :  { %1930 = vst.msk [vmem:[#allocation3 + $0x49] sm:$0xff] %vm1310_vm12, %v6963_v2 }
 0x230   :  { %v6094_v6 = vld [vmem:[#allocation3 + $0x10] sm:$0xff]  ;;  %v6106_v52 = vld [vmem:[#allocation3 + $0x1a] sm:$0xff]  ;;  %v6145_v11 = vld [vmem:[#allocation3 + $0x22] sm:$0xff] }
 0x231   :  { %v6104_v51 = vld [vmem:[#allocation3 + $0x12] sm:$0xff]  ;;  %v2086_v55 = vsel %vm6090_vm15, %v6094_v6, 0.0  ;;  %v2449_v57 = vsel %vm6100_vm3, %v6106_v52, 0.0  ;;  %v6123_v62 = vld [vmem:[#allocation3 + $0x9] sm:$0xff]  ;;  %v2118_v63 = vsel %vm6108_vm5, %v6094_v6, 0.0  ;;  %v2295_v28 = vsel %vm6125_vm8, %v6094_v6, 0.0 }
 0x232   :  { %v2448_v56 = vsel %vm6096_vm0, %v6104_v51, 0.0  ;;  %v2457_v60 = vsel %vm1310_vm12, %v2449_v57, 0.0  ;;  %v6130_v7 = vld [vmem:[#allocation3 + $0x18] sm:$0xff]  ;;  %v2101_v18 = vld [vmem:[#allocation3 + $0xa] sm:$0xff]  ;;  %v2092_v34 = vld [vmem:[#allocation3 + $0x1] sm:$0xff]  ;;  %v2450_v27 = vsel %vm6156_vm9, %v6145_v11, 0.0 }
 0x233   :  { %v2456_v59 = vsel %vm1310_vm12, %v2448_v56, 0.0  ;;  %v2465_v48 = vpack.c.bf16 %v2457_v60, %v2457_v60  ;;  %v2296_v13 = vsel %vm6108_vm5, %v6130_v7, 0.0  ;;  %v6143_v10 = vld [vmem:[#allocation3 + $0x8] sm:$0xff]  ;;  %v4686_v38 = vpack.i.bf16 %v6123_v62, %v2092_v34  ;;  %v6184_v26 = vld [vmem:[#allocation3 + $0x11] sm:$0xff]  ;;  %v6186_v20 = vld [vmem:[#allocation3 + $0x19] sm:$0xff] }
 0x234   :  { %v2464_v36 = vpack.c.bf16 %v2456_v59, %v2456_v59  ;;  %v4706_v45 = vpack.i.bf16 %v2296_v13, %v2295_v28  ;;  %v2117_v39 = vsel %vm6125_vm8, %v6143_v10, 0.0  ;;  %v2085_v23 = vsel %vm6108_vm5, %v6143_v10, 0.0  ;;  %v2100_v41 = vld [vmem:[#allocation3 + $0x2] sm:$0xff]  ;;  %v6154_v16 = vld [vmem:[#allocation3 + $0x2a] sm:$0xff]  ;;  %v6200_v42 = vld [vmem:[#allocation3 + $0x32] sm:$0xff] }
 0x235   :  { %2473 = vst [vmem:[#allocation4 + $0x14] sm:$0xf] %v2465_v48  ;;  %v4696_v61 = vpack.i.bf16 %v2118_v63, %v2117_v39  ;;  %4687 = vrot.lane.b32.xlu0 %v4686_v38, %s4846_s27  ;;  %v2451_v53 = vsel %vm6160_vm11, %v6154_v16, 0.0  ;;  %v2108_v0 = vsel %vm6096_vm0, %v2100_v41, 0.0  ;;  %v2109_v3 = vsel %vm6100_vm3, %v2101_v18, 0.0  ;;  %v6202_v1 = vld [vmem:[#allocation3 + $0x3a] sm:$0xff] }
 0x236   :  { %2472 = vst [vmem:[#allocation4 + $0x8] sm:$0xf] %v2464_v36  ;;  %4707 = vrot.lane.b32.xlu2 %v4706_v45, %s4845_s26  ;;  %v2458_v17 = vsel %vm1310_vm12, %v2450_v27, 0.0  ;;  %v2459_v19 = vsel %vm1310_vm12, %v2451_v53, 0.0  ;;  %v2279_v47 = vsel %vm6096_vm0, %v2101_v18, 0.0  ;;  %v2280_v46 = vsel %vm6100_vm3, %v6104_v51, 0.0 }
 0x237   :  { %4697 = vrot.lane.b32.xlu1 %v4696_v61, %s4847_s28  ;;  %v2466_v30 = vpack.c.bf16 %v2458_v17, %v2458_v17  ;;  %v2467_v35 = vpack.c.bf16 %v2459_v19, %v2459_v19  ;;  %v4691_v12 = vpack.i.bf16 %v2109_v3, %v2108_v0  ;;  %v4701_v22 = vpack.i.bf16 %v2280_v46, %v2279_v47  ;;  %v6219_v59 = vld [vmem:[#allocation3 + $0x20] sm:$0xff]  ;;  %v6991_v28 = vld [vmem:[#allocation20_spill] sm:$0xff] }
 0x238   :  { %v4716_v43 = vpack.i.bf16 %v6186_v20, %v6184_v26  ;;  %v2452_v58 = vsel %vm6192_vm13, %v6200_v42, 0.0  ;;  %v2453_v29 = vsel %vm6196_vm1, %v6202_v1, 0.0  ;;  %vm6215_vm0 = vcmp.ge.s32.totalorder %v1957_v32, 1  ;;  %v6990_v63 = vld [vmem:[#allocation19_spill] sm:$0xff]  ;;  %v6235_v45 = vld [vmem:[#allocation3 + $0x28] sm:$0xff] }
 0x239   :  { %2474 = vst [vmem:[#allocation4 + $0x20] sm:$0xf] %v2466_v30  ;;  %v2460_v24 = vsel %vm1310_vm12, %v2452_v58, 0.0  ;;  %v2461_v49 = vsel %vm1310_vm12, %v2453_v29, 0.0  ;;  %v2119_v60 = vsel %vm6090_vm15, %v6130_v7, 0.0  ;;  %v2110_v36 = vsel %vm6156_vm9, %v6104_v51, 0.0 }
 0x23a   :  { %2475 = vst [vmem:[#allocation4 + $0x2c] sm:$0xf] %v2467_v35  ;;  %v2468_v50 = vpack.c.bf16 %v2460_v24, %v2460_v24  ;;  %v2469_v56 = vpack.c.bf16 %v2461_v49, %v2461_v49  ;;  %v2111_v48 = vsel %vm6160_vm11, %v6106_v52, 0.0  ;;  %v2120_v15 = vsel %vm6215_vm0, %v6219_v59, 0.0  ;;  %v6251_v39 = vld [vmem:[#allocation3 + $0x42] sm:$0xff]  ;;  %v2447_v41 = vld [vmem:[#allocation3 + $0x4a] sm:$0xff] }
 0x23b   :  { %v4726_v32 = vpack.i.bf16 %v2120_v15, %v2119_v60  ;;  %v1978_v18 = vand.u32 7, %v6990_v63  ;;  %v1985_v13 = vand.u32 7, %v6991_v28  ;;  %v4721_v34 = vpack.i.bf16 %v2111_v48, %v2110_v36  ;;  %v6273_v17 = vld [vmem:[#allocation3 + $0x29] sm:$0xff]  ;;  %v6322_v48 = vld [vmem:[#allocation3 + $0x38] sm:$0xff]  ;;  %v4285_v15 = vld [vmem:[%s6798_s3 + $0xa8] sm:$0xff] }
 0x23c   :  { %2476 = vst [vmem:[#allocation4 + $0x38] sm:$0xf] %v2468_v50  ;;  %v2281_v61 = vsel %vm6156_vm9, %v6106_v52, 0.0  ;;  %v2282_v27 = vsel %vm6160_vm11, %v6145_v11, 0.0  ;;  %v2297_v3 = vsel %vm6090_vm15, %v6219_v59, 0.0  ;;  %v2298_v5 = vsel %vm6215_vm0, %v6235_v45, 0.0 }
 0x23d   :  { %4692 = vrot.lane.b32.xlu0 %v4691_v12, %s4845_s26  ;;  %2477 = vst [vmem:[#allocation4 + $0x44] sm:$0xf] %v2469_v56  ;;  %vm6241_vm3 = vcmp.le.s32.totalorder %v1978_v18, 6  ;;  %vm6247_vm4 = vcmp.le.s32.totalorder %v1985_v13, 6  ;;  %v6271_v52 = vld [vmem:[#allocation3 + $0x21] sm:$0xff]  ;;  %v4731_v30 = vpack.i.bf16 %v2282_v27, %v2281_v61  ;;  %v4736_v35 = vpack.i.bf16 %v2298_v5, %v2297_v3  ;;  %v4271_v24 = vld [vmem:[%s6798_s3 + $0x38] sm:$0xff] }
 0x23e   :  { %4712 = vrot.lane.b32.xlu2 %v4716_v43, %s4847_s28  ;;  %v2454_v53 = vsel %vm6241_vm3, %v6251_v39, 0.0  ;;  %v2455_v0 = vsel %vm6247_vm4, %v2447_v41, 0.0  ;;  %v4746_v31 = vpack.i.bf16 %v6273_v17, %v6271_v52  ;;  %vm6279_vm9 = vcmp.ge.s32.totalorder %v1964_v21, 1  ;;  %v4286_v50 = vld [vmem:[%s6798_s3 + $0xb0] sm:$0xff]  ;;  %v4279_v56 = vld [vmem:[%s6798_s3 + $0x78] sm:$0xff]  ;;  %2756 = vmatpush.bf16.msra.mxu0 %v4271_v24  ;;  %v4277_v51 = vld [vmem:[%s6798_s3 + $0x68] sm:$0xff] }
 0x23f   :  { %4702 = vrot.lane.b32.xlu1 %v4701_v22, %s4846_s27  ;;  %v2462_v37 = vsel %vm1310_vm12, %v2454_v53, 0.0  ;;  %v2463_v19 = vsel %vm1310_vm12, %v2455_v0, 0.0  ;;  %vm6283_vm11 = vcmp.ge.s32.totalorder %v1971_v40, 1  ;;  %v6287_v22 = vld [vmem:[#allocation3 + $0x30] sm:$0xff]  ;;  %v2112_v58 = vsel %vm6192_vm13, %v6145_v11, 0.0  ;;  %v4270_v11 = vld [vmem:[%s6798_s3 + $0x30] sm:$0xff]  ;;  %2785 = vmatpush.bf16.msra.mxu1 %v4279_v56 }
 0x240   :  { %v2470_v47 = vpack.c.bf16 %v2462_v37, %v2462_v37  ;;  %v2471_v46 = vpack.c.bf16 %v2463_v19, %v2463_v19  ;;  %v2122_v21 = vsel %vm6283_vm11, %v6287_v22, 0.0  ;;  %v4287_v40 = vld [vmem:[%s6798_s3 + $0xb8] sm:$0xff]  ;;  %v2113_v29 = vsel %vm6196_vm1, %v6154_v16, 0.0  ;;  %v4278_v36 = vld [vmem:[%s6798_s3 + $0x70] sm:$0xff]  ;;  %v6344_v53 = vld [vmem:[#allocation3 + $0x39] sm:$0xff] }
 0x241   :  { %2814 = vmatpush.bf16.msra.mxu2 %v4287_v40  ;;  %v4751_v60 = vpack.i.bf16 %v2113_v29, %v2112_v58  ;;  %v2299_v41 = vsel %vm6279_vm9, %v6287_v22, 0.0  ;;  %v2300_v61 = vsel %vm6283_vm11, %v6322_v48, 0.0  ;;  %v6342_v27 = vld [vmem:[#allocation3 + $0x31] sm:$0xff]  ;;  %v2293_v37 = vld [vmem:[#allocation3 + $0x40] sm:$0xff]  ;;  %v2114_v28 = vsel %vm6241_vm3, %v6200_v42, 0.0  ;;  %v4282_v38 = vld [vmem:[%s6798_s3 + $0x90] sm:$0xff] }
 0x242   :  { %2478 = vst [vmem:[#allocation4 + $0x50] sm:$0xf] %v2470_v47  ;;  %2757 = vmatpush.bf16.msra.mxu0 %v4270_v11  ;;  %v4766_v44 = vpack.i.bf16 %v2300_v61, %v2299_v41  ;;  %v4776_v0 = vpack.i.bf16 %v6344_v53, %v6342_v27  ;;  %v4283_v19 = vld [vmem:[%s6798_s3 + $0x98] sm:$0xff]  ;;  %v4274_v61 = vld [vmem:[%s6798_s3 + $0x50] sm:$0xff]  ;;  %vm3052_vm15 = vcmask 520192   ;;  %vm7004_vm5 = vcmask 1046534  }
 0x243   :  { %2479 = vst [vmem:[#allocation4 + $0x5c] sm:$0xf] %v2471_v46  ;;  %2786 = vmatpush.bf16.msra.mxu1 %v4278_v36  ;;  %v4267_v56 = vld [vmem:[%s6798_s3 + $0x18] sm:$0xff]  ;;  %v4266_v36 = vld [vmem:[%s6798_s3 + $0x10] sm:$0xff] }
 0x244   :  { %v4275_v11 = vld [vmem:[%s6798_s3 + $0x58] sm:$0xff]  ;;  %3053 = vst.msk [vmem:[#allocation5] sm:$0x1f] %vm3052_vm15, %v6963_v2 }
 0x245   :  { %4717 = vrot.lane.b32.xlu0 %v4716_v43, %s4846_s27  ;;  %v2121_v43 = vsel %vm6279_vm9, %v6235_v45, 0.0  ;;  %2815 = vmatpush.bf16.msra.mxu2 %v4286_v50  ;;  %v4281_v50 = vld [vmem:[%s6798_s3 + $0x88] sm:$0xff]  ;;  %3054 = vst.msk [vmem:[#allocation5 + $0x15] sm:$0x1f] %vm3052_vm15, %v6963_v2 }
 0x246   :  { %4727 = vrot.lane.b32.xlu2 %v4726_v32, %s4847_s28  ;;  %v4756_v49 = vpack.i.bf16 %v2122_v21, %v2121_v43  ;;  %v2283_v32 = vsel %vm6192_vm13, %v6154_v16, 0.0  ;;  %v4284_v16 = vld [vmem:[%s6798_s3 + $0xa0] sm:$0xff]  ;;  %vm6353_vm13 = vcmp.ge.s32.totalorder %v1978_v18, 1  ;;  %v2286_v43 = vsel %vm6247_vm4, %v6251_v39, 0.0 }
 0x247   :  { %4722 = vrot.lane.b32.xlu1 %v4721_v34, %s4845_s26  ;;  %v2284_v34 = vsel %vm6196_vm1, %v6200_v42, 0.0  ;;  %vm6359_vm1 = vcmp.ge.s32.totalorder %v1985_v13, 1  ;;  %v2123_v63 = vsel %vm6353_vm13, %v6322_v48, 0.0  ;;  %v2115_v13 = vsel %vm6247_vm4, %v6202_v1, 0.0  ;;  %v4268_v39 = vld [vmem:[%s6798_s3 + $0x20] sm:$0xff]  ;;  %2787 = vmatpush.bf16.msra.mxu1 %v4277_v51 }
 0x248   :  { %v4761_v25 = vpack.i.bf16 %v2284_v34, %v2283_v32  ;;  %v2124_v18 = vsel %vm6359_vm1, %v2293_v37, 0.0  ;;  %v4781_v46 = vpack.i.bf16 %v2115_v13, %v2114_v28  ;;  %v2285_v42 = vsel %vm6241_vm3, %v6202_v1, 0.0  ;;  %v4269_v1 = vld [vmem:[%s6798_s3 + $0x28] sm:$0xff]  ;;  %v4254_v32 = vld [vmem:[#allocation4 + $0x10] sm:$0xf0] }
 0x249   :  { %2816 = vmatpush.bf16.msra.mxu2 %v4285_v15  ;;  %v4786_v47 = vpack.i.bf16 %v2124_v18, %v2123_v63  ;;  %v2301_v21 = vsel %vm6353_vm13, %v2293_v37, 0.0  ;;  %v4791_v29 = vpack.i.bf16 %v2286_v43, %v2285_v42  ;;  %2758 = vmatpush.bf16.msra.mxu0 %v4269_v1  ;;  %v3919_v15 = vld [vmem:[#allocation4 + $0x8] sm:$0xf]  ;;  %v4257_v63 = vld [vmem:[#allocation4 + $0x28] sm:$0xf0]  ;;  %vm2229_vm4 = vcmask 523264  }
 0x24a   :  { %v3920_v34 = vor.u32 %v4254_v32, %v3919_v15  ;;  %vm2238_vm3 = vcmask 785408  }
 0x24d   :  { %4732 = vrot.lane.b32.xlu0 %v4731_v30, %s4846_s27  ;;  %2817 = vmatpush.bf16.msra.mxu2 %v4284_v16  ;;  %v2294_v30 = vld [vmem:[#allocation3 + $0x48] sm:$0xff]  ;;  %v4265_v16 = vld [vmem:[%s6798_s3 + $0x8] sm:$0xff] }
 0x24e   :  { %4742 = vrot.lane.b32.xlu2 %v4746_v31, %s4847_s28  ;;  %v2302_v40 = vsel %vm6359_vm1, %v2294_v30, 0.0  ;;  %2759 = vmatpush.bf16.msra.mxu0 %v4268_v39 }
 0x24f   :  { %4737 = vrot.lane.b32.xlu1 %v4736_v35, %s4845_s26  ;;  %v6382_v35 = vld [vmem:[#allocation3 + $0x41] sm:$0xff]  ;;  %v4796_v24 = vpack.i.bf16 %v2302_v40, %v2301_v21 }
 0x251   :  { %2818 = vmatpush.bf16.msra.mxu2 %v4283_v19  ;;  %v3931_v19 = vld [vmem:[#allocation4 + $0x20] sm:$0xf] }
 0x252   :  { %2760 = vmatpush.bf16.msra.mxu0 %v4267_v56  ;;  %v3932_v18 = vor.u32 %v4257_v63, %v3931_v19 }
 0x255   :  { %4747 = vrot.lane.b32.xlu0 %v4746_v31, %s4846_s27  ;;  %v2303_v31 = vld [vmem:[#allocation3 + $0x49] sm:$0xff]  ;;  %2819 = vmatpush.bf16.msra.mxu2 %v4282_v38 }
 0x256   :  { %4757 = vrot.lane.b32.xlu2 %v4756_v49, %s4847_s28  ;;  %v4801_v58 = vpack.i.bf16 %v2303_v31, %v6382_v35  ;;  %v4276_v49 = vld [vmem:[%s6798_s3 + $0x60] sm:$0xff]  ;;  %2761 = vmatpush.bf16.msra.mxu0 %v4266_v36 }
 0x257   :  { %4752 = vrot.lane.b32.xlu1 %v4751_v60, %s4845_s26  ;;  %2788 = vmatpush.bf16.msra.mxu1 %v4276_v49  ;;  %v4280_v60 = vld [vmem:[%s6798_s3 + $0x80] sm:$0xff] }
 0x259   :  { %2820 = vmatpush.bf16.msra.mxu2 %v4281_v50 }
 0x25a   :  { %2762 = vmatpush.bf16.msra.mxu0 %v4265_v16  ;;  %v3943_v16 = vld [vmem:[#allocation4 + $0x38] sm:$0xf] }
 0x25b   :  { %2789 = vmatpush.bf16.msra.mxu1 %v4275_v11 }
 0x25d   :  { %4762 = vrot.lane.b32.xlu0 %v4761_v25, %s4846_s27  ;;  %2821 = vmatpush.bf16.msra.mxu2 %v4280_v60  ;;  %v4273_v25 = vld [vmem:[%s6798_s3 + $0x48] sm:$0xff] }
 0x25e   :  { %4772 = vrot.lane.b32.xlu2 %v4776_v0, %s4847_s28 }
 0x25f   :  { %4767 = vrot.lane.b32.xlu1 %v4766_v44, %s4845_s26  ;;  %2790 = vmatpush.bf16.msra.mxu1 %v4274_v61  ;;  %v4264_v44 = vld [vmem:[%s6798_s3] sm:$0xff] }
 0x260   :  { %2822 = vmatmul.bf16.vlgmr.msra.gmra.mxu2 %v3920_v34  ;;  %2763 = vmatpush.bf16.msra.mxu0 %v4264_v44 }
 0x263   :  { %2791 = vmatpush.bf16.msra.mxu1 %v4273_v25  ;;  %v4260_v25 = vld [vmem:[#allocation4 + $0x40] sm:$0xf0] }
 0x265   :  { %4777 = vrot.lane.b32.xlu0 %v4776_v0, %s4846_s27  ;;  %v4272_v0 = vld [vmem:[%s6798_s3 + $0x40] sm:$0xff] }
 0x266   :  { %4787 = vrot.lane.b32.xlu2 %v4786_v47, %s4847_s28 }
 0x267   :  { %4782 = vrot.lane.b32.xlu1 %v4781_v46, %s4845_s26  ;;  %2792 = vmatpush.bf16.msra.mxu1 %v4272_v0  ;;  %v2076_v46 = vld [vmem:[#allocation3] sm:$0xff] }
 0x268   :  { %v2084_v42 = vsel %vm6125_vm8, %v2076_v46, 0.0  ;;  %vm7005_vm8 = vcmask 1047559  }
 0x26d   :  { %4792 = vrot.lane.b32.xlu0 %v4791_v29, %s4846_s27 }
 0x26e   :  { %4802 = vrot.lane.b32.xlu2 %v4801_v58, %s4847_s28 }
 0x26f   :  { %4797 = vrot.lane.b32.xlu1 %v4796_v24, %s4845_s26 }
 0x270   :  { %2827 = vmatmul.bf16.gmra.mxu2 %v3932_v18 }
 0x290   :  { %v4708_v41 = vpop.permute.xlu2 %4707 }
 0x291   :  { %v4710_v50 = vunpack.i.h.bf16 %v4708_v41  ;;  %v4709_v56 = vunpack.i.l.bf16 %v4708_v41 }
 0x298   :  { %v4713_v37 = vpop.permute.xlu2 %4712 }
 0x299   :  { %v4715_v21 = vunpack.i.h.bf16 %v4713_v37  ;;  %v4714_v40 = vunpack.i.l.bf16 %v4713_v37  ;;  %v3944_v37 = vor.u32 %v4260_v25, %v3943_v16 }
 0x29b   :  { %2832 = vmatmul.bf16.gmra.mxu2 %v3944_v37 }
 0x2a0   :  { %v4728_v47 = vpop.permute.xlu2 %4727 }
 0x2a1   :  { %v4730_v46 = vunpack.i.h.bf16 %v4728_v47 }
 0x2a7   :  { %v4688_v28 = vpop.permute.xlu0 %4687 }
 0x2a8   :  { %v4690_v30 = vunpack.i.h.bf16 %v4688_v28  ;;  %v4689_v31 = vunpack.i.l.bf16 %v4688_v28  ;;  %v4743_v61 = vpop.permute.xlu2 %4742 }
 0x2a9   :  { %v4698_v13 = vpop.permute.xlu1 %4697 }
 0x2aa   :  { %v4700_v58 = vunpack.i.h.bf16 %v4698_v13  ;;  %v4699_v29 = vunpack.i.l.bf16 %v4698_v13  ;;  %v2222_v38 = vsel %vm1310_vm12, %v2085_v23, %v4690_v30  ;;  %v2221_v39 = vsel %vm1310_vm12, %v2084_v42, %v4689_v31 }
 0x2ab   :  { %v4729_v30 = vunpack.i.l.bf16 %v4728_v47 }
 0x2af   :  { %v4693_v43 = vpop.permute.xlu0 %4692 }
 0x2b0   :  { %v4695_v24 = vunpack.i.h.bf16 %v4693_v43  ;;  %v4694_v1 = vunpack.i.l.bf16 %v4693_v43 }
 0x2b1   :  { %v4703_v51 = vpop.permute.xlu1 %4702 }
 0x2b2   :  { %v4705_v8 = vunpack.i.h.bf16 %v4703_v51  ;;  %v4704_v49 = vunpack.i.l.bf16 %v4703_v51  ;;  %v2230_v11 = vsel %vm2229_vm4, %v2221_v39, %v4694_v1  ;;  %v2231_v60 = vsel %vm2229_vm4, %v2222_v38, %v4695_v24  ;;  %v4758_v51 = vpop.permute.xlu2 %4757 }
 0x2b3   :  { %v2239_v36 = vsel %vm2238_vm3, %v2230_v11, %v4699_v29  ;;  %v2240_v15 = vsel %vm2238_vm3, %v2231_v60, %v4700_v58 }
 0x2b4   :  { %v2401_v54 = vsel %vm1310_vm12, %v6184_v26, %v4705_v8  ;;  %v2400_v10 = vsel %vm1310_vm12, %v6123_v62, %v4704_v49  ;;  %v2247_v23 = vpack.c.bf16 %v2239_v36, %v2239_v36  ;;  %v2248_v32 = vpack.c.bf16 %v2240_v15, %v2240_v15 }
 0x2b5   :  { %v2409_v34 = vsel %vm2229_vm4, %v2401_v54, %v4710_v50  ;;  %v2408_v41 = vsel %vm2229_vm4, %v2400_v10, %v4709_v56  ;;  %v2087_v62 = vsel %vm6215_vm0, %v6130_v7, 0.0  ;;  %v4745_v49 = vunpack.i.h.bf16 %v4743_v61 }
 0x2b6   :  { %v2416_v44 = vsel %vm2238_vm3, %v2408_v41, %v4714_v40  ;;  %v2417_v0 = vsel %vm2238_vm3, %v2409_v34, %v4715_v21  ;;  %2255 = vst [vmem:[#allocation4] sm:$0xf] %v2247_v23  ;;  %v4744_v50 = vunpack.i.l.bf16 %v4743_v61  ;;  %v3955_v41 = vld [vmem:[#allocation4 + $0x50] sm:$0xf]  ;;  %v4263_v61 = vld [vmem:[#allocation4 + $0x58] sm:$0xf0] }
 0x2b7   :  { %v2424_v19 = vpack.c.bf16 %v2416_v44, %v2416_v44  ;;  %v2425_v26 = vpack.c.bf16 %v2417_v0, %v2417_v0  ;;  %2256 = vst [vmem:[#allocation4 + $0xc] sm:$0xf] %v2248_v32  ;;  %v4718_v63 = vpop.permute.xlu0 %4717  ;;  %v3956_v44 = vor.u32 %v4263_v61, %v3955_v41 }
 0x2b8   :  { %v4720_v18 = vunpack.i.h.bf16 %v4718_v63  ;;  %v4719_v28 = vunpack.i.l.bf16 %v4718_v63  ;;  %v4759_v63 = vunpack.i.l.bf16 %v4758_v51 }
 0x2b9   :  { %2432 = vst [vmem:[#allocation4 + $0x4] sm:$0xf] %v2424_v19  ;;  %v4723_v13 = vpop.permute.xlu1 %4722  ;;  %2837 = vmatmul.bf16.gmra.mxu2 %v3956_v44 }
 0x2ba   :  { %2433 = vst [vmem:[#allocation4 + $0x10] sm:$0xf] %v2425_v26  ;;  %v4725_v31 = vunpack.i.h.bf16 %v4723_v13  ;;  %v4724_v42 = vunpack.i.l.bf16 %v4723_v13  ;;  %v2224_v43 = vsel %vm1310_vm12, %v2087_v62, %v4720_v18  ;;  %v2223_v57 = vsel %vm1310_vm12, %v2086_v55, %v4719_v28  ;;  %v4773_v18 = vpop.permute.xlu2 %4772 }
 0x2bb   :  { %v4760_v62 = vunpack.i.h.bf16 %v4758_v51  ;;  %v4774_v51 = vunpack.i.l.bf16 %v4773_v18 }
 0x2bc   :  { %v2232_v7 = vsel %vm2229_vm4, %v2223_v57, %v4724_v42  ;;  %v2233_v21 = vsel %vm2229_vm4, %v2224_v43, %v4725_v31 }
 0x2bd   :  { %v2241_v40 = vsel %vm2238_vm3, %v2232_v7, %v4729_v30  ;;  %v2242_v58 = vsel %vm2238_vm3, %v2233_v21, %v4730_v46  ;;  %v3911_v24 = vld [vmem:[#allocation4] sm:$0xf] }
 0x2be   :  { %v2249_v47 = vpack.c.bf16 %v2241_v40, %v2241_v40  ;;  %v2250_v29 = vpack.c.bf16 %v2242_v58, %v2242_v58  ;;  %v4253_v1 = vld [vmem:[#allocation4 + $0x8] sm:$0xf0]  ;;  %v4775_v58 = vunpack.i.h.bf16 %v4773_v18 }
 0x2bf   :  { %v4733_v38 = vpop.permute.xlu0 %4732  ;;  %v3912_v9 = vor.u32 %v4253_v1, %v3911_v24 }
 0x2c0   :  { %2257 = vst [vmem:[#allocation4 + $0x18] sm:$0xf] %v2249_v47  ;;  %v4252_v39 = vld [vmem:[#allocation4 + $0x4] sm:$0xf]  ;;  %v4735_v6 = vunpack.i.h.bf16 %v4733_v38  ;;  %v4734_v55 = vunpack.i.l.bf16 %v4733_v38 }
 0x2c1   :  { %2258 = vst [vmem:[#allocation4 + $0x24] sm:$0xf] %v2250_v29  ;;  %v4738_v8 = vpop.permute.xlu1 %4737  ;;  %v3913_v56 = vld [vmem:[#allocation4 + $0xc] sm:$0xf0]  ;;  %2764 = vmatmul.bf16.vlgmr.msra.gmra.mxu0 %v3912_v9 }
 0x2c2   :  { %v4740_v11 = vunpack.i.h.bf16 %v4738_v8  ;;  %v4739_v60 = vunpack.i.l.bf16 %v4738_v8  ;;  %v3916_v36 = vor.u32 %v4252_v39, %v3913_v56  ;;  %v2403_v15 = vsel %vm1310_vm12, %v6271_v52, %v4735_v6  ;;  %v4788_v8 = vpop.permute.xlu2 %4787 }
 0x2c3   :  { %v2402_v54 = vsel %vm1310_vm12, %v6186_v20, %v4734_v55  ;;  %v2088_v52 = vsel %vm6279_vm9, %v6219_v59, 0.0  ;;  %v2089_v20 = vsel %vm6283_vm11, %v6235_v45, 0.0 }
 0x2c4   :  { %v2410_v10 = vsel %vm2229_vm4, %v2402_v54, %v4739_v60  ;;  %v2411_v23 = vsel %vm2229_vm4, %v2403_v15, %v4740_v11  ;;  %2793 = vmatmul.bf16.vlgmr.msra.gmra.mxu1 %v3916_v36 }
 0x2c5   :  { %v2418_v32 = vsel %vm2238_vm3, %v2410_v10, %v4744_v50  ;;  %v2419_v34 = vsel %vm2238_vm3, %v2411_v23, %v4745_v49 }
 0x2c6   :  { %v2426_v16 = vpack.c.bf16 %v2418_v32, %v2418_v32  ;;  %v2427_v25 = vpack.c.bf16 %v2419_v34, %v2419_v34  ;;  %v4790_v32 = vunpack.i.h.bf16 %v4788_v8  ;;  %v4789_v34 = vunpack.i.l.bf16 %v4788_v8 }
 0x2c7   :  { %v4748_v0 = vpop.permute.xlu0 %4747  ;;  %v3923_v31 = vld [vmem:[#allocation4 + $0x18] sm:$0xf] }
 0x2c8   :  { %2434 = vst [vmem:[#allocation4 + $0x1c] sm:$0xf] %v2426_v16  ;;  %v4750_v37 = vunpack.i.h.bf16 %v4748_v0  ;;  %v4749_v19 = vunpack.i.l.bf16 %v4748_v0  ;;  %v4256_v42 = vld [vmem:[#allocation4 + $0x20] sm:$0xf0] }
 0x2c9   :  { %2435 = vst [vmem:[#allocation4 + $0x28] sm:$0xf] %v2427_v25  ;;  %v4753_v26 = vpop.permute.xlu1 %4752  ;;  %v3924_v40 = vor.u32 %v4256_v42, %v3923_v31 }
 0x2ca   :  { %v4755_v28 = vunpack.i.h.bf16 %v4753_v26  ;;  %v4754_v13 = vunpack.i.l.bf16 %v4753_v26  ;;  %v2226_v46 = vsel %vm1310_vm12, %v2089_v20, %v4750_v37  ;;  %v2225_v33 = vsel %vm1310_vm12, %v2088_v52, %v4749_v19  ;;  %v4803_v20 = vpop.permute.xlu2 %4802 }
 0x2cc   :  { %v2234_v59 = vsel %vm2229_vm4, %v2225_v33, %v4754_v13  ;;  %v2235_v12 = vsel %vm2229_vm4, %v2226_v46, %v4755_v28  ;;  %v4804_v33 = vunpack.i.l.bf16 %v4803_v20 }
 0x2cd   :  { %v2243_v45 = vsel %vm2238_vm3, %v2234_v59, %v4759_v63  ;;  %v2244_v30 = vsel %vm2238_vm3, %v2235_v12, %v4760_v62  ;;  %v4805_v63 = vunpack.i.h.bf16 %v4803_v20 }
 0x2ce   :  { %v2251_v43 = vpack.c.bf16 %v2243_v45, %v2243_v45  ;;  %v2252_v57 = vpack.c.bf16 %v2244_v30, %v2244_v30 }
 0x2cf   :  { %v4255_v7 = vld [vmem:[#allocation4 + $0x1c] sm:$0xf]  ;;  %v4763_v21 = vpop.permute.xlu0 %4762 }
 0x2d0   :  { %2259 = vst [vmem:[#allocation4 + $0x30] sm:$0xf] %v2251_v43  ;;  %v3925_v47 = vld [vmem:[#allocation4 + $0x24] sm:$0xf0]  ;;  %v4765_v29 = vunpack.i.h.bf16 %v4763_v21  ;;  %v4764_v24 = vunpack.i.l.bf16 %v4763_v21 }
 0x2d1   :  { %2260 = vst [vmem:[#allocation4 + $0x3c] sm:$0xf] %v2252_v57  ;;  %v4768_v1 = vpop.permute.xlu1 %4767  ;;  %v3928_v38 = vor.u32 %v4255_v7, %v3925_v47  ;;  %2769 = vmatmul.bf16.gmra.mxu0 %v3924_v40 }
 0x2d2   :  { %v4770_v9 = vunpack.i.h.bf16 %v4768_v1  ;;  %v4769_v39 = vunpack.i.l.bf16 %v4768_v1  ;;  %v2405_v6 = vsel %vm1310_vm12, %v6342_v27, %v4765_v29  ;;  %v2404_v55 = vsel %vm1310_vm12, %v6273_v17, %v4764_v24 }
 0x2d3   :  { %v2090_v27 = vsel %vm6353_vm13, %v6287_v22, 0.0  ;;  %v2091_v17 = vsel %vm6359_vm1, %v6322_v48, 0.0 }
 0x2d4   :  { %v2412_v49 = vsel %vm2229_vm4, %v2404_v55, %v4769_v39  ;;  %v2413_v50 = vsel %vm2229_vm4, %v2405_v6, %v4770_v9  ;;  %2798 = vmatmul.bf16.gmra.mxu1 %v3928_v38 }
 0x2d5   :  { %v2420_v56 = vsel %vm2238_vm3, %v2412_v49, %v4774_v51  ;;  %v2421_v11 = vsel %vm2238_vm3, %v2413_v50, %v4775_v58  ;;  %v6528_v51 = vld [vmem:[%s6799_s4] ss:$0 sm:$0xff] }
 0x2d6   :  { %v2428_v60 = vpack.c.bf16 %v2420_v56, %v2420_v56  ;;  %v2429_v36 = vpack.c.bf16 %v2421_v11, %v2421_v11 }
 0x2d7   :  { %v4778_v15 = vpop.permute.xlu0 %4777  ;;  %v3935_v44 = vld [vmem:[#allocation4 + $0x30] sm:$0xf] }
 0x2d8   :  { %2436 = vst [vmem:[#allocation4 + $0x34] sm:$0xf] %v2428_v60  ;;  %v4780_v54 = vunpack.i.h.bf16 %v4778_v15  ;;  %v4779_v10 = vunpack.i.l.bf16 %v4778_v15  ;;  %v4259_v52 = vld [vmem:[#allocation4 + $0x38] sm:$0xf0] }
 0x2d9   :  { %2437 = vst [vmem:[#allocation4 + $0x40] sm:$0xf] %v2429_v36  ;;  %v4783_v23 = vpop.permute.xlu1 %4782  ;;  %v3936_v62 = vor.u32 %v4259_v52, %v3935_v44 }
 0x2da   :  { %v4785_v41 = vunpack.i.h.bf16 %v4783_v23  ;;  %v4784_v61 = vunpack.i.l.bf16 %v4783_v23  ;;  %v2228_v16 = vsel %vm1310_vm12, %v2091_v17, %v4780_v54  ;;  %v2227_v25 = vsel %vm1310_vm12, %v2090_v27, %v4779_v10 }
 0x2dc   :  { %v2236_v3 = vsel %vm2229_vm4, %v2227_v25, %v4784_v61  ;;  %v2237_v22 = vsel %vm2229_vm4, %v2228_v16, %v4785_v41 }
 0x2dd   :  { %v2245_v5 = vsel %vm2238_vm3, %v2236_v3, %v4789_v34  ;;  %v2246_v48 = vsel %vm2238_vm3, %v2237_v22, %v4790_v32 }
 0x2de   :  { %v2253_v0 = vpack.c.bf16 %v2245_v5, %v2245_v5  ;;  %v2254_v37 = vpack.c.bf16 %v2246_v48, %v2246_v48 }
 0x2df   :  { %v4258_v19 = vld [vmem:[#allocation4 + $0x34] sm:$0xf]  ;;  %v4793_v26 = vpop.permute.xlu0 %4792 }
 0x2e0   :  { %2261 = vst [vmem:[#allocation4 + $0x48] sm:$0xf] %v2253_v0  ;;  %v3937_v18 = vld [vmem:[#allocation4 + $0x3c] sm:$0xf0]  ;;  %v4795_v28 = vunpack.i.h.bf16 %v4793_v26  ;;  %v4794_v13 = vunpack.i.l.bf16 %v4793_v26 }
 0x2e1   :  { %2262 = vst [vmem:[#allocation4 + $0x54] sm:$0xf] %v2254_v37  ;;  %v4798_v46 = vpop.permute.xlu1 %4797  ;;  %v3940_v59 = vor.u32 %v4258_v19, %v3937_v18  ;;  %2774 = vmatmul.bf16.gmra.mxu0 %v3936_v62 }
 0x2e2   :  { %v4800_v12 = vunpack.i.h.bf16 %v4798_v46  ;;  %v4799_v45 = vunpack.i.l.bf16 %v4798_v46  ;;  %v2407_v30 = vsel %vm1310_vm12, %v6382_v35, %v4795_v28  ;;  %v2406_v31 = vsel %vm1310_vm12, %v6344_v53, %v4794_v13 }
 0x2e3   :  { %v2823_v53 = vpop.f32.mrf.mxu2  ;;  %vm2907_vm12 = vcmask 517120  }
 0x2e4   :  { %v2414_v42 = vsel %vm2229_vm4, %v2406_v31, %v4799_v45  ;;  %v2415_v43 = vsel %vm2229_vm4, %v2407_v30, %v4800_v12  ;;  %2803 = vmatmul.bf16.gmra.mxu1 %v3940_v59 }
 0x2e5   :  { %v2422_v57 = vsel %vm2238_vm3, %v2414_v42, %v4804_v33  ;;  %v2423_v7 = vsel %vm2238_vm3, %v2415_v43, %v4805_v63 }
 0x2e6   :  { %v2430_v21 = vpack.c.bf16 %v2422_v57, %v2422_v57  ;;  %v2431_v40 = vpack.c.bf16 %v2423_v7, %v2423_v7 }
 0x2e7   :  { %v3947_v58 = vld [vmem:[#allocation4 + $0x48] sm:$0xf] }
 0x2e8   :  { %2438 = vst [vmem:[#allocation4 + $0x4c] sm:$0xf] %v2430_v21  ;;  %v4262_v47 = vld [vmem:[#allocation4 + $0x50] sm:$0xf0] }
 0x2e9   :  { %2439 = vst [vmem:[#allocation4 + $0x58] sm:$0xf] %v2431_v40  ;;  %v3948_v35 = vor.u32 %v4262_v47, %v3947_v58 }
 0x2eb   :  { %v2825_v6 = vpop.f32.mrf.mxu2 }
 0x2ef   :  { %v4261_v29 = vld [vmem:[#allocation4 + $0x4c] sm:$0xf] }
 0x2f0   :  { %v3949_v24 = vld [vmem:[#allocation4 + $0x54] sm:$0xf0] }
 0x2f1   :  { %v3952_v1 = vor.u32 %v4261_v29, %v3949_v24  ;;  %2779 = vmatmul.bf16.gmra.mxu0 %v3948_v35 }
 0x2f3   :  { %v2828_v36 = vpop.f32.mrf.mxu2 }
 0x2f4   :  { %2808 = vmatmul.bf16.gmra.mxu1 %v3952_v1 }
 0x2fb   :  { %v2830_v28 = vpop.f32.mrf.mxu2 }
 0x33e   :  { %v2765_v38 = vpop.f32.mrf.mxu0 }
 0x33f   :  { %v2766_v9 = vadd.f32 %v6528_v51, %v2765_v38 }
 0x341   :  { %v2794_v39 = vpop.f32.mrf.mxu1 }
 0x342   :  { %v2795_v55 = vadd.f32 %v2794_v39, %v2766_v9  ;;  %v2833_v9 = vpop.f32.mrf.mxu2 }
 0x344   :  { %v2824_v8 = vadd.f32 %v2823_v53, %v2795_v55 }
 0x346   :  { %v2767_v49 = vpop.f32.mrf.mxu0  ;;  %v2843_v11 = vmax.f32 %v2824_v8, 0.0 }
 0x347   :  { %v2768_v50 = vadd.f32 %v6528_v51, %v2767_v49 }
 0x348   :  { %v2859_v17 = vrot.slane %v2843_v11, 2  ;;  %v2860_v15 = vrot.slane %v2843_v11, 4  ;;  %v2861_v54 = vrot.slane %v2843_v11, 6  ;;  %v2908_v32 = vsel %vm2907_vm12, %v2843_v11, -inf }
 0x349   :  { %v2796_v56 = vpop.f32.mrf.mxu1 }
 0x34a   :  { %v2797_v60 = vadd.f32 %v2796_v56, %v2768_v50  ;;  %v2917_v22 = vsel %vm2907_vm12, %v2859_v17, -inf  ;;  %v2926_v5 = vsel %vm2907_vm12, %v2860_v15, -inf  ;;  %v2935_v52 = vsel %vm2907_vm12, %v2861_v54, -inf }
 0x34c   :  { %v2826_v27 = vadd.f32 %v2825_v6, %v2797_v60 }
 0x34e   :  { %v2844_v10 = vmax.f32 %v2826_v27, 0.0  ;;  %v2770_v23 = vpop.f32.mrf.mxu0 }
 0x34f   :  { %v2771_v34 = vadd.f32 %v6528_v51, %v2770_v23 }
 0x350   :  { %v2862_v41 = vrot.slane %v2844_v10, 2  ;;  %v2863_v61 = vrot.slane %v2844_v10, 4  ;;  %v2864_v16 = vrot.slane %v2844_v10, 6  ;;  %v2909_v25 = vsel %vm2907_vm12, %v2844_v10, -inf }
 0x351   :  { %v2799_v3 = vpop.f32.mrf.mxu1  ;;  %v2910_v48 = vmax.f32 %v2908_v32, %v2909_v25 }
 0x352   :  { %v2800_v44 = vadd.f32 %v2799_v3, %v2771_v34  ;;  %v2918_v20 = vsel %vm2907_vm12, %v2862_v41, -inf  ;;  %v2927_v0 = vsel %vm2907_vm12, %v2863_v61, -inf  ;;  %v2936_v37 = vsel %vm2907_vm12, %v2864_v16, -inf }
 0x353   :  { %v2911_v19 = vrot.slane %v2910_v48, 4  ;;  %v2919_v26 = vmax.f32 %v2917_v22, %v2918_v20  ;;  %v2928_v62 = vmax.f32 %v2926_v5, %v2927_v0  ;;  %v2937_v63 = vmax.f32 %v2935_v52, %v2936_v37 }
 0x354   :  { %v2829_v18 = vadd.f32 %v2828_v36, %v2800_v44 }
 0x355   :  { %v2912_v13 = vmax.f32 %v2910_v48, %v2911_v19  ;;  %v2920_v46 = vrot.slane %v2919_v26, 4  ;;  %v2929_v33 = vrot.slane %v2928_v62, 4  ;;  %v2938_v59 = vrot.slane %v2937_v63, 4 }
 0x356   :  { %v2772_v12 = vpop.f32.mrf.mxu0  ;;  %v2845_v31 = vmax.f32 %v2829_v18, 0.0 }
 0x357   :  { %v2921_v45 = vmax.f32 %v2919_v26, %v2920_v46  ;;  %v2930_v30 = vmax.f32 %v2928_v62, %v2929_v33  ;;  %v2913_v43 = vrot.slane %v2912_v13, 2  ;;  %v2939_v7 = vmax.f32 %v2937_v63, %v2938_v59 }
 0x358   :  { %v2773_v21 = vadd.f32 %v6528_v51, %v2772_v12  ;;  %v2865_v47 = vrot.slane %v2845_v31, 2  ;;  %v2866_v24 = vrot.slane %v2845_v31, 4  ;;  %v2867_v1 = vrot.slane %v2845_v31, 6 }
 0x359   :  { %v2801_v42 = vpop.f32.mrf.mxu1  ;;  %v2922_v57 = vrot.slane %v2921_v45, 2  ;;  %v2931_v58 = vrot.slane %v2930_v30, 2  ;;  %v2914_v35 = vmax.f32 %v2912_v13, %v2913_v43  ;;  %v2940_v53 = vrot.slane %v2939_v7, 2  ;;  %v2835_v13 = vpop.f32.mrf.mxu2 }
 0x35a   :  { %v2802_v29 = vadd.f32 %v2801_v42, %v2773_v21  ;;  %v2944_v8 = vsel %vm2907_vm12, %v2845_v31, -inf  ;;  %v2953_v49 = vsel %vm2907_vm12, %v2865_v47, -inf  ;;  %v2962_v60 = vsel %vm2907_vm12, %v2866_v24, -inf }
 0x35b   :  { %v2923_v40 = vmax.f32 %v2921_v45, %v2922_v57  ;;  %v2932_v55 = vmax.f32 %v2930_v30, %v2931_v58  ;;  %v2915_v11 = vrot.slane %v2914_v35, 1  ;;  %v2971_v36 = vsel %vm2907_vm12, %v2867_v1, -inf }
 0x35c   :  { %v2831_v38 = vadd.f32 %v2830_v28, %v2802_v29  ;;  %v2941_v17 = vmax.f32 %v2939_v7, %v2940_v53  ;;  %v4332_v29 = vld [vmem:[%s6800_s5 + $0x138] sm:$0xff] }
 0x35d   :  { %v2924_v6 = vrot.slane %v2923_v40, 1  ;;  %v2933_v32 = vrot.slane %v2932_v55, 1  ;;  %v2916_v44 = vmax.f32 %v2914_v35, %v2915_v11  ;;  %3636 = vmatpush.bf16.msrb.mxu2 %v4332_v29 }
 0x35e   :  { %v2775_v39 = vpop.f32.mrf.mxu0  ;;  %v2846_v50 = vmax.f32 %v2831_v38, 0.0  ;;  %v2942_v52 = vrot.slane %v2941_v17, 1 }
 0x35f   :  { %v2776_v2 = vadd.f32 %v6528_v51, %v2775_v39  ;;  %v2925_v23 = vmax.f32 %v2923_v40, %v2924_v6  ;;  %v2934_v37 = vmax.f32 %v2932_v55, %v2933_v32 }
 0x360   :  { %v2868_v15 = vrot.slane %v2846_v50, 2  ;;  %v2869_v54 = vrot.slane %v2846_v50, 4  ;;  %v2870_v10 = vrot.slane %v2846_v50, 6  ;;  %v2945_v34 = vsel %vm2907_vm12, %v2846_v50, -inf }
 0x361   :  { %v2804_v56 = vpop.f32.mrf.mxu1  ;;  %v2946_v61 = vmax.f32 %v2944_v8, %v2945_v34  ;;  %v3072_v63 = vsel %vm1882_vm6, %v2925_v23, %v2916_v44  ;;  %v2943_v45 = vmax.f32 %v2941_v17, %v2942_v52  ;;  %v4331_v17 = vld [vmem:[%s6800_s5 + $0x130] sm:$0xff] }
 0x362   :  { %v2805_v27 = vadd.f32 %v2804_v56, %v2776_v2  ;;  %v2954_v16 = vsel %vm2907_vm12, %v2868_v15, -inf  ;;  %v2963_v25 = vsel %vm2907_vm12, %v2869_v54, -inf  ;;  %v2972_v3 = vsel %vm2907_vm12, %v2870_v10, -inf  ;;  %3637 = vmatpush.bf16.msrb.mxu2 %v4331_v17 }
 0x363   :  { %v2955_v22 = vmax.f32 %v2953_v49, %v2954_v16  ;;  %v2964_v5 = vmax.f32 %v2962_v60, %v2963_v25  ;;  %v2973_v48 = vmax.f32 %v2971_v36, %v2972_v3  ;;  %v2947_v20 = vrot.slane %v2946_v61, 4  ;;  %v2838_v16 = vpop.f32.mrf.mxu2 }
 0x364   :  { %v2834_v41 = vadd.f32 %v2833_v9, %v2805_v27  ;;  %v3074_v42 = vsel %vm1884_vm7, %v2934_v37, %v3072_v63 }
 0x365   :  { %v2956_v19 = vrot.slane %v2955_v22, 4  ;;  %v2965_v26 = vrot.slane %v2964_v5, 4  ;;  %v2974_v62 = vrot.slane %v2973_v48, 4  ;;  %v2948_v18 = vmax.f32 %v2946_v61, %v2947_v20 }
 0x366   :  { %v2777_v0 = vpop.f32.mrf.mxu0  ;;  %v2847_v28 = vmax.f32 %v2834_v41, 0.0  ;;  %v3076_v9 = vsel %vm1886_vm10, %v2943_v45, %v3074_v42 }
 0x367   :  { %v2957_v33 = vmax.f32 %v2955_v22, %v2956_v19  ;;  %v2966_v59 = vmax.f32 %v2964_v5, %v2965_v26  ;;  %v2975_v12 = vmax.f32 %v2973_v48, %v2974_v62  ;;  %v2949_v30 = vrot.slane %v2948_v18, 2 }
 0x368   :  { %v2778_v31 = vadd.f32 %v6528_v51, %v2777_v0  ;;  %v2871_v40 = vrot.slane %v2847_v28, 2  ;;  %v2872_v58 = vrot.slane %v2847_v28, 4  ;;  %v2873_v53 = vrot.slane %v2847_v28, 6  ;;  %v4330_v0 = vld [vmem:[%s6800_s5 + $0x128] sm:$0xff] }
 0x369   :  { %v2806_v46 = vpop.f32.mrf.mxu1  ;;  %v2958_v43 = vrot.slane %v2957_v33, 2  ;;  %v2967_v57 = vrot.slane %v2966_v59, 2  ;;  %v2976_v7 = vrot.slane %v2975_v12, 2  ;;  %v2950_v21 = vmax.f32 %v2948_v18, %v2949_v30  ;;  %3638 = vmatpush.bf16.msrb.mxu2 %v4330_v0 }
 0x36a   :  { %v2807_v47 = vadd.f32 %v2806_v46, %v2778_v31  ;;  %v2980_v39 = vsel %vm2907_vm12, %v2847_v28, -inf  ;;  %v2989_v11 = vsel %vm2907_vm12, %v2871_v40, -inf  ;;  %v2998_v60 = vsel %vm2907_vm12, %v2872_v58, -inf }
 0x36b   :  { %v2959_v35 = vmax.f32 %v2957_v33, %v2958_v43  ;;  %v2968_v24 = vmax.f32 %v2966_v59, %v2967_v57  ;;  %v2977_v1 = vmax.f32 %v2975_v12, %v2976_v7  ;;  %v2951_v38 = vrot.slane %v2950_v21, 1  ;;  %v4328_v57 = vld [vmem:[%s6800_s5 + $0x118] sm:$0xff] }
 0x36c   :  { %v2836_v6 = vadd.f32 %v2835_v13, %v2807_v47  ;;  %v3007_v10 = vsel %vm2907_vm12, %v2873_v53, -inf  ;;  %v4329_v13 = vld [vmem:[%s6800_s5 + $0x120] sm:$0xff]  ;;  %v2840_v47 = vpop.f32.mrf.mxu2 }
 0x36d   :  { %v2960_v2 = vrot.slane %v2959_v35, 1  ;;  %v2969_v8 = vrot.slane %v2968_v24, 1  ;;  %v2978_v49 = vrot.slane %v2977_v1, 1  ;;  %v2952_v56 = vmax.f32 %v2950_v21, %v2951_v38  ;;  %3639 = vmatpush.bf16.msrb.mxu2 %v4329_v13 }
 0x36e   :  { %v2780_v55 = vpop.f32.mrf.mxu0  ;;  %v2848_v36 = vmax.f32 %v2836_v6, 0.0 }
 0x36f   :  { %v2781_v50 = vadd.f32 %v6528_v51, %v2780_v55  ;;  %v2961_v15 = vmax.f32 %v2959_v35, %v2960_v2  ;;  %v2970_v54 = vmax.f32 %v2968_v24, %v2969_v8  ;;  %v3078_v32 = vsel %vm1888_vm14, %v2952_v56, %v3076_v9  ;;  %v4327_v9 = vld [vmem:[%s6800_s5 + $0x110] sm:$0xff] }
 0x370   :  { %v2874_v34 = vrot.slane %v2848_v36, 2  ;;  %v2875_v41 = vrot.slane %v2848_v36, 4  ;;  %v2876_v61 = vrot.slane %v2848_v36, 6  ;;  %v2979_v25 = vmax.f32 %v2977_v1, %v2978_v49 }
 0x371   :  { %v2809_v27 = vpop.f32.mrf.mxu1  ;;  %v3080_v3 = vsel %vm1890_vm2, %v2961_v15, %v3078_v32  ;;  %v2981_v22 = vsel %vm2907_vm12, %v2848_v36, -inf  ;;  %3640 = vmatpush.bf16.msrb.mxu2 %v4328_v57 }
 0x372   :  { %v2810_v23 = vadd.f32 %v2809_v27, %v2781_v50  ;;  %v3082_v48 = vsel %vm7004_vm5, %v2970_v54, %v3080_v3  ;;  %v2982_v44 = vmax.f32 %v2980_v39, %v2981_v22  ;;  %v2990_v52 = vsel %vm2907_vm12, %v2874_v34, -inf }
 0x373   :  { %v2999_v20 = vsel %vm2907_vm12, %v2875_v41, -inf  ;;  %v3084_v37 = vsel %vm7005_vm8, %v2979_v25, %v3082_v48  ;;  %v2991_v19 = vmax.f32 %v2989_v11, %v2990_v52  ;;  %v3008_v62 = vsel %vm2907_vm12, %v2876_v61, -inf }
 0x374   :  { %v2839_v5 = vadd.f32 %v2838_v16, %v2810_v23  ;;  %v3000_v26 = vmax.f32 %v2998_v60, %v2999_v20  ;;  %3094 = vst.msk [vmem:[#allocation5 + $0x5] sm:$0xff] %vm2229_vm4, %v3084_v37  ;;  %v2983_v63 = vrot.slane %v2982_v44, 4  ;;  %v3009_v18 = vmax.f32 %v3007_v10, %v3008_v62  ;;  %v4326_v10 = vld [vmem:[%s6800_s5 + $0x108] sm:$0xff]  ;;  %v4325_v20 = vld [vmem:[%s6800_s5 + $0x100] sm:$0xff] }
 0x375   :  { %v2992_v46 = vrot.slane %v2991_v19, 4  ;;  %3641 = vmatpush.bf16.msrb.mxu2 %v4327_v9 }
 0x376   :  { %v2782_v28 = vpop.f32.mrf.mxu0  ;;  %v3001_v33 = vrot.slane %v3000_v26, 4  ;;  %v2984_v12 = vmax.f32 %v2982_v44, %v2983_v63  ;;  %v2849_v45 = vmax.f32 %v2839_v5, 0.0  ;;  %v3010_v43 = vrot.slane %v3009_v18, 4 }
 0x377   :  { %v2783_v59 = vadd.f32 %v6528_v51, %v2782_v28  ;;  %v2993_v31 = vmax.f32 %v2991_v19, %v2992_v46 }
 0x378   :  { %v3002_v42 = vmax.f32 %v3000_v26, %v3001_v33  ;;  %v2985_v40 = vrot.slane %v2984_v12, 2  ;;  %v2877_v58 = vrot.slane %v2849_v45, 2  ;;  %v2878_v35 = vrot.slane %v2849_v45, 4 }
 0x379   :  { %v2811_v30 = vpop.f32.mrf.mxu1  ;;  %v2994_v7 = vrot.slane %v2993_v31, 2  ;;  %v3011_v1 = vmax.f32 %v3009_v18, %v3010_v43  ;;  %v2879_v53 = vrot.slane %v2849_v45, 6  ;;  %v3016_v6 = vsel %vm2907_vm12, %v2849_v45, -inf  ;;  %3642 = vmatpush.bf16.msrb.mxu2 %v4326_v10  ;;  %v4316_v43 = vld [vmem:[%s6800_s5 + $0xb8] sm:$0xff] }
 0x37a   :  { %v2812_v21 = vadd.f32 %v2811_v30, %v2783_v59  ;;  %v3003_v29 = vrot.slane %v3002_v42, 2  ;;  %v2986_v39 = vmax.f32 %v2984_v12, %v2985_v40  ;;  %v3025_v55 = vsel %vm2907_vm12, %v2877_v58, -inf  ;;  %v4300_v40 = vld [vmem:[%s6800_s5 + $0x38] sm:$0xff]  ;;  %3608 = vmatpush.bf16.msrb.mxu0 %v4316_v43  ;;  %v4293_v43 = vld [vmem:[%s6800_s5] sm:$0xff] }
 0x37b   :  { %v2995_v51 = vmax.f32 %v2993_v31, %v2994_v7  ;;  %v3034_v8 = vsel %vm2907_vm12, %v2878_v35, -inf  ;;  %v3012_v11 = vrot.slane %v3011_v1, 2  ;;  %v3043_v27 = vsel %vm2907_vm12, %v2879_v53, -inf  ;;  %3580 = vmatpush.bf16.msra.mxu3 %v4300_v40 }
 0x37c   :  { %v2841_v24 = vadd.f32 %v2840_v47, %v2812_v21  ;;  %v3004_v2 = vmax.f32 %v3002_v42, %v3003_v29  ;;  %v2987_v23 = vrot.slane %v2986_v39, 1  ;;  %v4315_v29 = vld [vmem:[%s6800_s5 + $0xb0] sm:$0xff] }
 0x37d   :  { %v2996_v56 = vrot.slane %v2995_v51, 1  ;;  %v3013_v22 = vmax.f32 %v3011_v1, %v3012_v11  ;;  %3643 = vmatpush.bf16.msrb.mxu2 %v4325_v20  ;;  %v4299_v1 = vld [vmem:[%s6800_s5 + $0x30] sm:$0xff]  ;;  %v3156_v11 = vld [vmem:[#allocation5 + $0x4] sm:$0xff] }
 0x37e   :  { %v2850_v38 = vmax.f32 %v2841_v24, 0.0  ;;  %v3005_v61 = vrot.slane %v3004_v2, 1  ;;  %v2988_v0 = vmax.f32 %v2986_v39, %v2987_v23  ;;  %3609 = vmatpush.bf16.msrb.mxu0 %v4315_v29  ;;  %v3174_v29 = vld [vmem:[#allocation5 + $0x5] sm:$0xff] }
 0x37f   :  { %v2997_v3 = vmax.f32 %v2995_v51, %v2996_v56  ;;  %v3014_v18 = vrot.slane %v3013_v22, 1  ;;  %3581 = vmatpush.bf16.msra.mxu3 %v4299_v1 }
 0x380   :  { %v2880_v49 = vrot.slane %v2850_v38, 2  ;;  %v2881_v50 = vrot.slane %v2850_v38, 4  ;;  %v2882_v60 = vrot.slane %v2850_v38, 6  ;;  %v3017_v36 = vsel %vm2907_vm12, %v2850_v38, -inf }
 0x381   :  { %v3018_v17 = vmax.f32 %v3016_v6, %v3017_v36  ;;  %v3006_v26 = vmax.f32 %v3004_v2, %v3005_v61  ;;  %v3085_v28 = vsel %vm1882_vm6, %v2997_v3, %v2988_v0  ;;  %v3015_v57 = vmax.f32 %v3013_v22, %v3014_v18  ;;  %vm7006_vm6 = vmmov %vm7004_vm5  ;;  %v4314_v6 = vld [vmem:[%s6800_s5 + $0xa8] sm:$0xff] }
 0x382   :  { %v3026_v15 = vsel %vm2907_vm12, %v2880_v49, -inf  ;;  %v3035_v54 = vsel %vm2907_vm12, %v2881_v50, -inf  ;;  %v3044_v41 = vsel %vm2907_vm12, %v2882_v60, -inf  ;;  %v3100_v2 = vand.u32 3, %v6965_v4  ;;  %3610 = vmatpush.bf16.msrb.mxu0 %v4314_v6  ;;  %v4313_v49 = vld [vmem:[%s6800_s5 + $0xa0] sm:$0xff]  ;;  %v4298_v18 = vld [vmem:[%s6800_s5 + $0x28] sm:$0xff] }
 0x383   :  { %v3027_v32 = vmax.f32 %v3025_v55, %v3026_v15  ;;  %v3036_v34 = vmax.f32 %v3034_v8, %v3035_v54  ;;  %v3019_v16 = vrot.slane %v3018_v17, 4  ;;  %v3045_v25 = vmax.f32 %v3043_v27, %v3044_v41  ;;  %v3136_v60 = vld [vmem:[#allocation5 + $0x1] sm:$0xff]  ;;  %3582 = vmatpush.bf16.msra.mxu3 %v4298_v18  ;;  %v4319_v6 = vld [vmem:[%s6800_s5 + $0xd0] sm:$0xff] }
 0x384   :  { %v3086_v30 = vsel %vm1884_vm7, %v3006_v26, %v3085_v28  ;;  %vm7007_vm7 = vmmov %vm7005_vm8  ;;  %v3107_v8 = vand.u32 3, %v6964_v14  ;;  %vm6644_vm0 = vcmp.le.s32.totalorder %v3100_v2, 2  ;;  %v4311_v28 = vld [vmem:[%s6800_s5 + $0x90] sm:$0xff] }
 0x385   :  { %v3028_v5 = vrot.slane %v3027_v32, 4  ;;  %v3037_v48 = vrot.slane %v3036_v34, 4  ;;  %v3020_v44 = vmax.f32 %v3018_v17, %v3019_v16  ;;  %v3046_v52 = vrot.slane %v3045_v25, 4 }
 0x386   :  { %v3087_v51 = vsel %vm1886_vm10, %v3015_v57, %v3086_v30  ;;  %vm6632_vm10 = vcmp.le.s32.totalorder %v3107_v8, 2  ;;  %3611 = vmatpush.bf16.msrb.mxu0 %v4313_v49  ;;  %v4295_v30 = vld [vmem:[%s6800_s5 + $0x10] sm:$0xff]  ;;  %v4308_v57 = vld [vmem:[%s6800_s5 + $0x78] sm:$0xff]  ;;  %v4317_v49 = vld [vmem:[%s6800_s5 + $0xc0] sm:$0xff] }
 0x387   :  { %v3029_v37 = vmax.f32 %v3027_v32, %v3028_v5  ;;  %v3038_v19 = vmax.f32 %v3036_v34, %v3037_v48  ;;  %v3021_v62 = vrot.slane %v3020_v44, 2  ;;  %v3047_v63 = vmax.f32 %v3045_v25, %v3046_v52 }
 0x389   :  { %v3030_v13 = vrot.slane %v3029_v37, 2  ;;  %v3039_v46 = vrot.slane %v3038_v19, 2  ;;  %v3022_v33 = vmax.f32 %v3020_v44, %v3021_v62  ;;  %v3048_v59 = vrot.slane %v3047_v63, 2 }
 0x38b   :  { %v3031_v12 = vmax.f32 %v3029_v37, %v3030_v13  ;;  %v3040_v45 = vmax.f32 %v3038_v19, %v3039_v46  ;;  %v3023_v31 = vrot.slane %v3022_v33, 1  ;;  %v3049_v42 = vmax.f32 %v3047_v63, %v3048_v59  ;;  %v4312_v63 = vld [vmem:[%s6800_s5 + $0x98] sm:$0xff]  ;;  %v4297_v46 = vld [vmem:[%s6800_s5 + $0x20] sm:$0xff]  ;;  %v4323_v59 = vld [vmem:[%s6800_s5 + $0xf0] sm:$0xff] }
 0x38c   :  { %3612 = vmatpush.bf16.msrb.mxu0 %v4312_v63  ;;  %v4324_v13 = vld [vmem:[%s6800_s5 + $0xf8] sm:$0xff]  ;;  %3583 = vmatpush.bf16.msra.mxu3 %v4297_v46 }
 0x38d   :  { %v3032_v7 = vrot.slane %v3031_v12, 1  ;;  %v3041_v21 = vrot.slane %v3040_v45, 1  ;;  %v3024_v58 = vmax.f32 %v3022_v33, %v3023_v31  ;;  %v3050_v47 = vrot.slane %v3049_v42, 1  ;;  %v4310_v33 = vld [vmem:[%s6800_s5 + $0x88] sm:$0xff]  ;;  %3622 = vmatpush.bf16.msrb.mxu1 %v4324_v13 }
 0x38e   :  { %v4322_v31 = vld [vmem:[%s6800_s5 + $0xe8] sm:$0xff] }
 0x38f   :  { %v3033_v35 = vmax.f32 %v3031_v12, %v3032_v7  ;;  %v3042_v24 = vmax.f32 %v3040_v45, %v3041_v21  ;;  %v3088_v53 = vsel %vm1888_vm14, %v3024_v58, %v3087_v51  ;;  %v3051_v38 = vmax.f32 %v3049_v42, %v3050_v47  ;;  %v4296_v12 = vld [vmem:[%s6800_s5 + $0x18] sm:$0xff]  ;;  %v4309_v45 = vld [vmem:[%s6800_s5 + $0x80] sm:$0xff]  ;;  %v4294_v42 = vld [vmem:[%s6800_s5 + $0x8] sm:$0xff] }
 0x390   :  { %vm6636_vm14 = vcmp.ge.s32.totalorder %v3100_v2, 1  ;;  %3613 = vmatpush.bf16.msrb.mxu0 %v4311_v28  ;;  %3584 = vmatpush.bf16.msra.mxu3 %v4296_v12  ;;  %v4321_v7 = vld [vmem:[%s6800_s5 + $0xe0] sm:$0xff]  ;;  %v4307_v21 = vld [vmem:[%s6800_s5 + $0x70] sm:$0xff]  ;;  %v4320_v51 = vld [vmem:[%s6800_s5 + $0xd8] sm:$0xff] }
 0x391   :  { %v3089_v9 = vsel %vm1890_vm2, %v3033_v35, %v3088_v53  ;;  %vm6640_vm2 = vcmp.ge.s32.totalorder %v3107_v8, 1  ;;  %v3158_v41 = vsel %vm6636_vm14, %v3156_v11, 0.0  ;;  %3623 = vmatpush.bf16.msrb.mxu1 %v4323_v59  ;;  %v4318_v2 = vld [vmem:[%s6800_s5 + $0xc8] sm:$0xff]  ;;  %v4303_v8 = vld [vmem:[%s6800_s5 + $0x50] sm:$0xff] }
 0x392   :  { %v3090_v39 = vsel %vm7006_vm6, %v3042_v24, %v3089_v9  ;;  %v4306_v24 = vld [vmem:[%s6800_s5 + $0x68] sm:$0xff] }
 0x393   :  { %v3091_v55 = vsel %vm7007_vm7, %v3051_v38, %v3090_v39  ;;  %v4305_v39 = vld [vmem:[%s6800_s5 + $0x60] sm:$0xff] }
 0x394   :  { %3095 = vst.msk [vmem:[#allocation5 + $0xd] sm:$0xff] %vm2229_vm4, %v3091_v55  ;;  %3614 = vmatpush.bf16.msrb.mxu0 %v4310_v33  ;;  %3585 = vmatpush.bf16.msra.mxu3 %v4295_v30  ;;  %v4304_v55 = vld [vmem:[%s6800_s5 + $0x58] sm:$0xff] }
 0x395   :  { %3624 = vmatpush.bf16.msrb.mxu1 %v4322_v31 }
 0x398   :  { %3615 = vmatpush.bf16.msrb.mxu0 %v4309_v45  ;;  %3586 = vmatpush.bf16.msra.mxu3 %v4294_v42 }
 0x399   :  { %3625 = vmatpush.bf16.msrb.mxu1 %v4321_v7 }
 0x39b   :  { %v3137_v14 = vld [vmem:[#allocation5 + $0x9] sm:$0xff]  ;;  %v3215_v32 = vld [vmem:[#allocation5 + $0x12] sm:$0xff] }
 0x39c   :  { %v3176_v27 = vld [vmem:[#allocation5 + $0x6] sm:$0xff]  ;;  %v3177_v17 = vld [vmem:[#allocation5 + $0xe] sm:$0xff]  ;;  %v4806_v15 = vpack.i.bf16 %v3137_v14, %v3136_v60  ;;  %v3217_v16 = vsel %vm6632_vm10, %v3215_v32, 0.0  ;;  %3587 = vmatpush.bf16.msra.mxu3 %v4293_v43 }
 0x39d   :  { %v3178_v54 = vsel %vm6644_vm0, %v3176_v27, 0.0  ;;  %v3179_v10 = vsel %vm6632_vm10, %v3177_v17, 0.0  ;;  %v6652_v23 = vld [vmem:[#allocation5 + $0xa] sm:$0xff]  ;;  %v3219_v5 = vsel %vm2229_vm4, %v3217_v16, 0.0  ;;  %3626 = vmatpush.bf16.msrb.mxu1 %v4320_v51  ;;  %v4301_v17 = vld [vmem:[%s6800_s5 + $0x40] sm:$0xff] }
 0x39e   :  { %v3157_v34 = vld [vmem:[#allocation5 + $0xc] sm:$0xff]  ;;  %v3216_v61 = vsel %vm6644_vm0, %v6652_v23, 0.0  ;;  %v4816_v25 = vpack.i.bf16 %v3179_v10, %v3178_v54  ;;  %4807 = vrot.lane.b32.xlu0 %v4806_v15, %s4845_s26  ;;  %v3221_v52 = vpack.c.bf16 %v3219_v5, %v3219_v5  ;;  %v3155_v20 = vsel %vm6632_vm10, %v6652_v23, 0.0  ;;  %v3132_v15 = vld [vmem:[#allocation5] sm:$0xff] }
 0x39f   :  { %v3159_v3 = vsel %vm6640_vm2, %v3157_v34, 0.0  ;;  %v3218_v22 = vsel %vm2229_vm4, %v3216_v61, 0.0  ;;  %v3199_v0 = vld [vmem:[#allocation5 + $0x11] sm:$0xff]  ;;  %v4302_v27 = vld [vmem:[%s6800_s5 + $0x48] sm:$0xff]  ;;  %v3134_v61 = vsel %vm6636_vm14, %v3132_v15, 0.0 }
 0x3a0   :  { %v4811_v48 = vpack.i.bf16 %v3159_v3, %v3158_v41  ;;  %v3220_v44 = vpack.c.bf16 %v3218_v22, %v3218_v22  ;;  %4817 = vrot.lane.b32.xlu2 %v4816_v25, %s4845_s26  ;;  %3223 = vst [vmem:[#allocation6 + $0x24] sm:$0xf] %v3221_v52  ;;  %v4821_v37 = vpack.i.bf16 %v3199_v0, %v3137_v14  ;;  %v3175_v35 = vld [vmem:[#allocation5 + $0xd] sm:$0xff]  ;;  %v3152_v41 = vld [vmem:[#allocation5 + $0x2] sm:$0xff] }
 0x3a1   :  { %3594 = vmatpush.bf16.msrb.mxu3 %v4308_v57  ;;  %3627 = vmatpush.bf16.msrb.mxu1 %v4319_v6  ;;  %v3133_v54 = vld [vmem:[#allocation5 + $0x8] sm:$0xff]  ;;  %v3154_v0 = vsel %vm6644_vm0, %v3152_v41, 0.0  ;;  %v3195_v63 = vld [vmem:[#allocation5 + $0x10] sm:$0xff] }
 0x3a2   :  { %4812 = vrot.lane.b32.xlu1 %v4811_v48, %s4845_s26  ;;  %3222 = vst [vmem:[#allocation6 + $0x10] sm:$0xf] %v3220_v44  ;;  %v3135_v16 = vsel %vm6640_vm2, %v3133_v54, 0.0  ;;  %v3196_v4 = vsel %vm6636_vm14, %v3133_v54, 0.0  ;;  %v3197_v50 = vsel %vm6640_vm2, %v3195_v63, 0.0 }
 0x3a5   :  { %3595 = vmatpush.bf16.msrb.mxu3 %v4307_v21  ;;  %3628 = vmatpush.bf16.msrb.mxu1 %v4318_v2  ;;  %v4336_v21 = vld [vmem:[%s6802_s7 + $0x18] sm:$0xff] }
 0x3a6   :  { %4822 = vrot.lane.b32.xlu0 %v4821_v37, %s4845_s26 }
 0x3a7   :  { %v4292_v26 = vld [vmem:[#allocation6 + $0x20] sm:$0xf0] }
 0x3a9   :  { %v4071_v19 = vld [vmem:[#allocation6 + $0x10] sm:$0xf]  ;;  %3596 = vmatpush.bf16.msrb.mxu3 %v4306_v24  ;;  %3629 = vmatpush.bf16.msrb.mxu1 %v4317_v49 }
 0x3aa   :  { %v4072_v62 = vor.u32 %v4292_v26, %v4071_v19 }
 0x3ac   :  { %3644 = vmatmul.bf16.vlgmr.msrb.gmra.mxu2 %v4072_v62 }
 0x3ad   :  { %3597 = vmatpush.bf16.msrb.mxu3 %v4305_v39 }
 0x3b1   :  { %3598 = vmatpush.bf16.msrb.mxu3 %v4304_v55 }
 0x3b5   :  { %3599 = vmatpush.bf16.msrb.mxu3 %v4303_v8 }
 0x3b9   :  { %3600 = vmatpush.bf16.msrb.mxu3 %v4302_v27 }
 0x3bd   :  { %3601 = vmatpush.bf16.msrb.mxu3 %v4301_v17 }
 0x3fa   :  { %v4818_v40 = vpop.permute.xlu2 %4817 }
 0x3fb   :  { %v4820_v58 = vunpack.i.h.bf16 %v4818_v40  ;;  %v4819_v47 = vunpack.i.l.bf16 %v4818_v40  ;;  %v4827_v40 = vld [vmem:[%s6801_s6] ss:$0 sm:$0xff] }
 0x3fd   :  { %v3189_v1 = vsel %vm2229_vm4, %v3175_v35, %v4820_v58  ;;  %v3188_v53 = vsel %vm2229_vm4, %v3174_v29, %v4819_v47  ;;  %v4335_v58 = vld [vmem:[%s6802_s7 + $0x10] sm:$0xff]  ;;  %v4334_v47 = vld [vmem:[%s6802_s7 + $0x8] sm:$0xff] }
 0x3fe   :  { %v3191_v38 = vpack.c.bf16 %v3189_v1, %v3189_v1  ;;  %v3190_v9 = vpack.c.bf16 %v3188_v53, %v3188_v53  ;;  %v4333_v53 = vld [vmem:[%s6802_s7] sm:$0xff] }
 0x400   :  { %3193 = vst [vmem:[#allocation6 + $0x1c] sm:$0xf] %v3191_v38 }
 0x401   :  { %3192 = vst [vmem:[#allocation6 + $0x8] sm:$0xf] %v3190_v9 }
 0x407   :  { %v4291_v11 = vld [vmem:[#allocation6 + $0x18] sm:$0xf0] }
 0x408   :  { %v4063_v60 = vld [vmem:[#allocation6 + $0x8] sm:$0xf] }
 0x409   :  { %v4064_v14 = vor.u32 %v4291_v11, %v4063_v60 }
 0x40b   :  { %3616 = vmatmul.bf16.vlgmr.msrb.gmra.mxu0 %v4064_v14 }
 0x410   :  { %v4808_v10 = vpop.permute.xlu0 %4807 }
 0x411   :  { %v4810_v32 = vunpack.i.h.bf16 %v4808_v10  ;;  %v4809_v34 = vunpack.i.l.bf16 %v4808_v10 }
 0x413   :  { %v3146_v3 = vsel %vm2229_vm4, %v3134_v61, %v4809_v34  ;;  %v3147_v22 = vsel %vm2229_vm4, %v3135_v16, %v4810_v32 }
 0x414   :  { %v4813_v25 = vpop.permute.xlu1 %4812  ;;  %v3148_v44 = vpack.c.bf16 %v3146_v3, %v3146_v3  ;;  %v3149_v52 = vpack.c.bf16 %v3147_v22, %v3147_v22 }
 0x415   :  { %v4815_v5 = vunpack.i.h.bf16 %v4813_v25  ;;  %v4814_v48 = vunpack.i.l.bf16 %v4813_v25 }
 0x416   :  { %3150 = vst [vmem:[#allocation6] sm:$0xf] %v3148_v44  ;;  %v3671_v44 = vld [vmem:[%s6803_s8] sm:$0x1] }
 0x417   :  { %v3168_v37 = vsel %vm2229_vm4, %v3154_v0, %v4814_v48  ;;  %v3169_v19 = vsel %vm2229_vm4, %v3155_v20, %v4815_v5  ;;  %3151 = vst [vmem:[#allocation6 + $0x14] sm:$0xf] %v3149_v52 }
 0x418   :  { %v3170_v26 = vpack.c.bf16 %v3168_v37, %v3168_v37  ;;  %v3171_v62 = vpack.c.bf16 %v3169_v19, %v3169_v19  ;;  %v4823_v18 = vpop.permute.xlu0 %4822 }
 0x419   :  { %v4825_v28 = vunpack.i.h.bf16 %v4823_v18  ;;  %v4824_v13 = vunpack.i.l.bf16 %v4823_v18 }
 0x41a   :  { %3172 = vst [vmem:[#allocation6 + $0x4] sm:$0xf] %v3170_v26 }
 0x41b   :  { %3173 = vst [vmem:[#allocation6 + $0x18] sm:$0xf] %v3171_v62  ;;  %v3209_v23 = vsel %vm2229_vm4, %v3197_v50, %v4825_v28  ;;  %v3208_v20 = vsel %vm2229_vm4, %v3196_v4, %v4824_v13 }
 0x41c   :  { %v3211_v46 = vpack.c.bf16 %v3209_v23, %v3209_v23  ;;  %v3210_v33 = vpack.c.bf16 %v3208_v20, %v3208_v20 }
 0x41d   :  { %v4055_v59 = vld [vmem:[#allocation6] sm:$0xf] }
 0x41e   :  { %3213 = vst [vmem:[#allocation6 + $0x20] sm:$0xf] %v3211_v46  ;;  %v4290_v12 = vld [vmem:[#allocation6 + $0x10] sm:$0xf0] }
 0x41f   :  { %3212 = vst [vmem:[#allocation6 + $0xc] sm:$0xf] %v3210_v33  ;;  %v4056_v45 = vor.u32 %v4290_v12, %v4055_v59 }
 0x421   :  { %3588 = vmatmul.bf16.vlgmr.msra.gmra.mxu3 %v4056_v45  ;;  %v4288_v56 = vld [vmem:[#allocation6 + $0x4] sm:$0xf] }
 0x422   :  { %v4057_v43 = vld [vmem:[#allocation6 + $0x14] sm:$0xf0]  ;;  %3703 = vmatpush.bf16.msra.mxu3 %v4336_v21 }
 0x423   :  { %v4060_v36 = vor.u32 %v4288_v56, %v4057_v43 }
 0x425   :  { %v4065_v30 = vld [vmem:[#allocation6 + $0x1c] sm:$0xf0] }
 0x426   :  { %v4289_v31 = vld [vmem:[#allocation6 + $0xc] sm:$0xf]  ;;  %3704 = vmatpush.bf16.msra.mxu3 %v4335_v58 }
 0x427   :  { %v4068_v42 = vor.u32 %v4289_v31, %v4065_v30 }
 0x429   :  { %3630 = vmatmul.bf16.vlgmr.msrb.gmra.mxu1 %v4068_v42 }
 0x42a   :  { %3705 = vmatpush.bf16.msra.mxu3 %v4334_v47 }
 0x42e   :  { %3706 = vmatpush.bf16.msra.mxu3 %v4333_v53 }
 0x42f   :  { %v3645_v9 = vpop.f32.mrf.mxu2 }
 0x431   :  { %3602 = vmatmul.bf16.vlgmr.msrb.gmra.mxu3 %v4060_v36 }
 0x437   :  { %v3647_v27 = vpop.f32.mrf.mxu2 }
 0x488   :  { %v3617_v35 = vpop.f32.mrf.mxu0 }
 0x490   :  { %v3619_v8 = vpop.f32.mrf.mxu0 }
 0x4a4   :  { %v3589_v57 = vpop.f32.mrf.mxu3 }
 0x4a5   :  { %v3590_v29 = vadd.f32 %v4827_v40, %v3589_v57 }
 0x4a6   :  { %v3631_v1 = vpop.f32.mrf.mxu1 }
 0x4ac   :  { %v3591_v7 = vpop.f32.mrf.mxu3 }
 0x4ad   :  { %v3592_v39 = vadd.f32 %v4827_v40, %v3591_v7 }
 0x4ae   :  { %v3633_v60 = vpop.f32.mrf.mxu1 }
 0x4b4   :  { %v3603_v24 = vpop.f32.mrf.mxu3 }
 0x4b5   :  { %v3604_v51 = vadd.f32 %v3603_v24, %v3590_v29 }
 0x4b7   :  { %v3618_v38 = vadd.f32 %v3617_v35, %v3604_v51 }
 0x4b9   :  { %v3632_v6 = vadd.f32 %v3631_v1, %v3618_v38 }
 0x4bb   :  { %v3646_v49 = vadd.f32 %v3645_v9, %v3632_v6 }
 0x4bc   :  { %v3605_v55 = vpop.f32.mrf.mxu3 }
 0x4bd   :  { %v3606_v2 = vadd.f32 %v3605_v55, %v3592_v39  ;;  %v3650_v17 = vmax.f32 %v3646_v49, 0.0 }
 0x4bf   :  { %v3620_v11 = vadd.f32 %v3619_v8, %v3606_v2  ;;  %v3652_v10 = vsel %vm2229_vm4, %v3650_v17, 0.0 }
 0x4c1   :  { %v3634_v14 = vadd.f32 %v3633_v60, %v3620_v11 }
 0x4c3   :  { %v3648_v15 = vadd.f32 %v3647_v27, %v3634_v14 }
 0x4c5   :  { %v3651_v54 = vmax.f32 %v3648_v15, 0.0 }
 0x4c7   :  { %v3653_v32 = vsel %vm2229_vm4, %v3651_v54, 0.0 }
 0x4c8   :  { %v3654_v34 = vadd.f32 %v3653_v32, %v3652_v10 }
 0x4ca   :  { %v3655_v41 = vrot.slane %v3654_v34, 4 }
 0x4cc   :  { %v3656_v61 = vadd.f32 %v3655_v41, %v3654_v34 }
 0x4ce   :  { %v3657_v16 = vrot.slane %v3656_v61, 2 }
 0x4d0   :  { %v3658_v25 = vadd.f32 %v3657_v16, %v3656_v61 }
 0x4d2   :  { %v3659_v3 = vrot.slane %v3658_v25, 1 }
 0x4d4   :  { %v3660_v22 = vadd.f32 %v3659_v3, %v3658_v25 }
 0x4d6   :  { %v3661_v5 = vmul.f32 0.0625, %v3660_v22 }
 0x4d8   :  { %v3662_v48 = vpack.c.bf16 %v3661_v5, %v3661_v5 }
 0x4da   :  { %4249 = vmatmul.msk.bf16.vlgmr.msra.gmra.mxu3 %vm2229_vm4, %v3662_v48 }
 0x55d   :  { %v3708_v52 = vpop.f32.mrf.mxu3 }
 0x55e   :  { %v3709_v0 = vadd.f32 %v3708_v52, %v3671_v44 }
 0x560   :  { %3712 = vst [vmem:[%s6804_s9] sm:$0x1] %v3709_v0 }
 0x565   :  { %v3710_v37 = vpop.f32.mrf.mxu3 }

</bundles_post_ra>
